<compile_context>
chip_gen: v6e
topology: v6e:2x2x1
jax: 0.10.0
libtpu: 0.0.40
codegen_flags: <defaults>
</compile_context>

<pallas_src>
import functools
import math

import jax
import jax.numpy as jnp
from jax.experimental import pallas as pl
from jax.experimental.pallas import tpu as pltpu


class KeyGen:
    def __init__(self, key):
        self.key = key

    def __call__(self):
        self.key, sub = jax.random.split(self.key)
        return sub


# --------------------------------------------------------------------------
# Pallas kernel: one-shot matmul (full K in one block) + fused bias epilogue
# --------------------------------------------------------------------------
def _mm_bias_kernel(a_ref, b_ref, bias_ref, o_ref):
    acc = jnp.dot(a_ref[...], b_ref[...], preferred_element_type=jnp.float32)
    o_ref[...] = (acc + bias_ref[...]).astype(o_ref.dtype)


def matmul_bias(a, b_bf16, bias, *, tm=128):
    """a: (M, K) float; b_bf16: (K, N) bf16 (pre-packed weights); bias: (N,) f32."""
    M, K = a.shape
    K2, N = b_bf16.shape
    assert K == K2, (K, K2)
    a = a.astype(jnp.bfloat16)

    # M tiling: if M is not a multiple of tm, use a single full-M block
    # (full-dim blocks are always legal) instead of runtime zero-padding.
    if M % tm != 0:
        tm = M

    # N tiling: 256-wide tiles fill the v6e/v7x MXU (128 is fine on v5e);
    # the M axis already gives a multi-way "parallel" grid for v7x's 2 TCs.
    if N % 256 == 0:
        tn = 256
    elif N % 128 == 0:
        tn = 128
    else:
        tn = N

    grid = (M // tm, N // tn)
    bias2 = bias.reshape(1, N).astype(jnp.float32)

    return pl.pallas_call(
        _mm_bias_kernel,
        out_shape=jax.ShapeDtypeStruct((M, N), jnp.float32),
        grid_spec=pltpu.PrefetchScalarGridSpec(
            num_scalar_prefetch=0,
            grid=grid,
            in_specs=[
                pl.BlockSpec((tm, K), lambda i, j: (i, 0)),   # full K, no K loop
                pl.BlockSpec((K, tn), lambda i, j: (0, j)),
                pl.BlockSpec((1, tn), lambda i, j: (0, j)),
            ],
            out_specs=pl.BlockSpec((tm, tn), lambda i, j: (i, j)),
        ),
        compiler_params=pltpu.CompilerParams(
            dimension_semantics=("parallel", "parallel"),
            vmem_limit_bytes=32 * 1024 * 1024,   # explicit: above v5e's 16 MiB default
        ),
    )(a, b_bf16, bias2)


# --------------------------------------------------------------------------
# cheap XLA glue (non-hot-path): avg-pool and patch extraction
# --------------------------------------------------------------------------
def _avg_pool3x3(x):
    # PyTorch AvgPool2d(3, stride=1, padding=1) defaults to count_include_pad=True.
    s = jax.lax.reduce_window(x, 0.0, jax.lax.add, (1, 3, 3, 1), (1, 1, 1, 1),
                              [(0, 0), (1, 1), (1, 1), (0, 0)])
    return s / 9.0


def _im2col(x, kh, kw):
    # x: (B, H, W, C), SAME padding (k//2). Row layout: ((i*kw + j)*C + c).
    B, H, W, C = x.shape
    ph, pw = kh // 2, kw // 2
    xp = jnp.pad(x, ((0, 0), (ph, ph), (pw, pw), (0, 0)))
    cols = [xp[:, i:i + H, j:j + W, :] for i in range(kh) for j in range(kw)]
    return jnp.concatenate(cols, axis=-1).reshape(B * H * W, kh * kw * C)


# --------------------------------------------------------------------------
# one-time weight packing (outside the hot path): fuse / pad / bf16-cast
# --------------------------------------------------------------------------
def prepare_params(raw, cin):
    f32 = jnp.float32

    def rs(w):  # (kh, kw, ci, co) -> (kh*kw*ci, co) matching _im2col row layout
        kh, kw, ci, co = w.shape
        return w.reshape(kh * kw * ci, co).astype(f32)

    # M1: fused branch-entry 1x1 convs.  cols: [b2a 0:48 | b3a 48:112 | zero pad]
    w1 = jnp.zeros((cin, 128), f32)
    w1 = w1.at[:, 0:48].set(rs(raw["b2a_w"]))
    w1 = w1.at[:, 48:112].set(rs(raw["b3a_w"]))
    bias1 = (jnp.zeros((128,), f32)
             .at[0:48].set(raw["b2a_b"])
             .at[48:112].set(raw["b3a_b"]))

    # M2: branch3 middle 3x3 conv (64 -> 96), padded to 128 output lanes.
    w2 = jnp.zeros((9 * 64, 128), f32).at[:, 0:96].set(rs(raw["b3b_w"]))
    bias2 = jnp.zeros((128,), f32).at[0:96].set(raw["b3b_b"])

    # M3: block-structured "concat" matmul producing the final (M, 256) output.
    #   A3 = [x | avgpool(x) | im2col(b2a, 5x5) | im2col(b3b, 3x3)]
    #   output cols: branch1 0:64 | branch2 64:128 | branch3 128:224 | branch4 224:256
    k3 = 2 * cin + 25 * 48 + 9 * 96
    w3 = jnp.zeros((k3, 256), f32)
    w3 = w3.at[0:cin, 0:64].set(rs(raw["br1_w"]))
    w3 = w3.at[cin:2 * cin, 224:256].set(rs(raw["br4_w"]))
    off = 2 * cin
    w3 = w3.at[off:off + 25 * 48, 64:128].set(rs(raw["b2b_w"]))
    off += 25 * 48
    w3 = w3.at[off:off + 9 * 96, 128:224].set(rs(raw["b3c_w"]))
    bias3 = (jnp.zeros((256,), f32)
             .at[0:64].set(raw["br1_b"])
             .at[64:128].set(raw["b2b_b"])
             .at[128:224].set(raw["b3c_b"])
             .at[224:256].set(raw["br4_b"]))

    return {
        "w1": w1.astype(jnp.bfloat16), "bias1": bias1,
        "w2": w2.astype(jnp.bfloat16), "bias2": bias2,
        "w3": w3.astype(jnp.bfloat16), "bias3": bias3,
    }


# --------------------------------------------------------------------------
# InceptionA forward (NCHW in / NCHW out, like the PyTorch module)
# --------------------------------------------------------------------------
def inception_a_forward(p, x_nchw):
    x = jnp.transpose(x_nchw, (0, 2, 3, 1)).astype(jnp.float32)   # NCHW -> NHWC
    B, H, W, Cin = x.shape
    M = B * H * W
    xf = x.reshape(M, Cin)
    apf = _avg_pool3x3(x).reshape(M, Cin)

    # Stage 1: fused branch-entry 1x1 convs (branch2a: 48ch, branch3a: 64ch)
    s1 = matmul_bias(xf, p["w1"], p["bias1"])                     # (M, 128)
    b2a = s1[:, 0:48].reshape(B, H, W, 48)
    b3a = s1[:, 48:112].reshape(B, H, W, 64)

    # Stage 2: branch3 middle 3x3 conv (64 -> 96)
    s2 = matmul_bias(_im2col(b3a, 3, 3), p["w2"], p["bias2"])     # (M, 128)
    b3b = s2[:, 0:96].reshape(B, H, W, 96)

    # Stage 3: "concat" matmul — computes branch1 (1x1 on x), branch2 tail
    # (5x5 on b2a), branch3 tail (3x3 on b3b) and branch4 (1x1 on avgpool(x))
    # and writes them directly into their channel slots of the lane-dense
    # (M, 256) output, so no channel concat of narrow tensors is needed.
    a3 = jnp.concatenate(
        [xf, apf, _im2col(b2a, 5, 5), _im2col(b3b, 3, 3)], axis=-1)
    out = matmul_bias(a3, p["w3"], p["bias3"])                    # (M, 256)
    out = out.reshape(B, H, W, 256)
    return jnp.transpose(out, (0, 3, 1, 2))                       # NHWC -> NCHW


# --------------------------------------------------------------------------
# deterministic parameter init (shapes match the PyTorch InceptionA module)
# --------------------------------------------------------------------------
def _init_conv(kg, kh, kw, cin, cout):
    w = jax.random.normal(kg(), (kh, kw, cin, cout), jnp.float32) / math.sqrt(kh * kw * cin)
    b = 0.01 * jax.random.normal(kg(), (cout,), jnp.float32)
    return w, b


def init_raw_params(key, in_channels):
    kg = KeyGen(key)
    raw = {}
    raw["br1_w"], raw["br1_b"] = _init_conv(kg, 1, 1, in_channels, 64)   # branch1
    raw["b2a_w"], raw["b2a_b"] = _init_conv(kg, 1, 1, in_channels, 48)   # branch2[0]
    raw["b2b_w"], raw["b2b_b"] = _init_conv(kg, 5, 5, 48, 64)            # branch2[1]
    raw["b3a_w"], raw["b3a_b"] = _init_conv(kg, 1, 1, in_channels, 64)   # branch3[0]
    raw["b3b_w"], raw["b3b_b"] = _init_conv(kg, 3, 3, 64, 96)            # branch3[1]
    raw["b3c_w"], raw["b3c_b"] = _init_conv(kg, 3, 3, 96, 96)            # branch3[2]
    raw["br4_w"], raw["br4_b"] = _init_conv(kg, 1, 1, in_channels, 32)   # branch4[1]
    return raw


# --------------------------------------------------------------------------
if __name__ == "__main__":
    key = jax.random.PRNGKey(0)
    pkey, xkey = jax.random.split(key)

    in_channels = 4
    raw = init_raw_params(pkey, in_channels)
    params = prepare_params(raw, in_channels)          # one-time packing (not in hot path)

    # small NCHW input consistent with the PyTorch module
    x = jax.random.normal(xkey, (2, in_channels, 16, 16), jnp.float32)

    fwd = jax.jit(functools.partial(inception_a_forward, params))
    out = jax.block_until_ready(fwd(x))

    assert out.shape == (2, 256, 16, 16), out.shape    # 64 + 64 + 96 + 32 channels
    assert bool(jnp.all(jnp.isfinite(out)))
    print("KERNEL_OK")
</pallas_src>

<mosaic_0001>
module attributes {stable_mosaic.version = 11 : i64} {
  func.func @_mm_bias_kernel(%arg0: i32, %arg1: i32, %arg2: memref<128x4xbf16, #tpu.memory_space<vmem>>, %arg3: memref<4x128xbf16, #tpu.memory_space<vmem>>, %arg4: memref<1x128xf32, #tpu.memory_space<vmem>>, %arg5: memref<128x128xf32, #tpu.memory_space<vmem>>) attributes {dimension_semantics = [#tpu.dimension_semantics<parallel>, #tpu.dimension_semantics<parallel>], iteration_bounds = array<i64: 4, 1>, scalar_prefetch = 0 : i64, scratch_operands = 0 : i64, tpu.core_type = #tpu.core_type<tc>, window_params = [{transform_indices = @transform_0, window_bounds = array<i64: 128, 4>}, {transform_indices = @transform_1, window_bounds = array<i64: 4, 128>}, {transform_indices = @transform_2, window_bounds = array<i64: 1, 128>}, {transform_indices = @transform_3, window_bounds = array<i64: 128, 128>}]} {
    %c0 = arith.constant 0 : index
    %c0_0 = arith.constant 0 : index
    %0 = vector.load %arg2[%c0, %c0_0] : memref<128x4xbf16, #tpu.memory_space<vmem>>, vector<128x4xbf16>
    %c0_1 = arith.constant 0 : index
    %c0_2 = arith.constant 0 : index
    %1 = vector.load %arg3[%c0_1, %c0_2] : memref<4x128xbf16, #tpu.memory_space<vmem>>, vector<4x128xbf16>
    %cst = arith.constant dense<0.000000e+00> : vector<128x128xf32>
    %2 = tpu.matmul %0, %1, %cst {dimension_numbers = #tpu.dot_dimension_numbers<[1], [0], [0], [1], [0, 0, 1, 1], [], []>} : vector<128x4xbf16>, vector<4x128xbf16>, vector<128x128xf32> -> vector<128x128xf32>
    %c0_3 = arith.constant 0 : index
    %c0_4 = arith.constant 0 : index
    %3 = vector.load %arg4[%c0_3, %c0_4] : memref<1x128xf32, #tpu.memory_space<vmem>>, vector<1x128xf32>
    %4 = vector.broadcast %3 : vector<1x128xf32> to vector<128x128xf32>
    %5 = arith.addf %2, %4 : vector<128x128xf32>
    %c0_5 = arith.constant 0 : index
    %c0_6 = arith.constant 0 : index
    %6 = vector.load %arg5[%c0_5, %c0_6] : memref<128x128xf32, #tpu.memory_space<vmem>>, vector<128x128xf32>
    tpu.vector_store %arg5[%c0_5, %c0_6], %5 {strides = array<i32>} : memref<128x128xf32, #tpu.memory_space<vmem>>, vector<128x128xf32>,
    return
  }
  func.func @transform_0(%arg0: i32, %arg1: i32) -> (i32, i32) {
    %c0_i32 = arith.constant 0 : i32
    %c0_i32_0 = arith.constant 0 : i32
    return %arg0, %c0_i32 : i32, i32
  }
  func.func @transform_1(%arg0: i32, %arg1: i32) -> (i32, i32) {
    %c0_i32 = arith.constant 0 : i32
    %c0_i32_0 = arith.constant 0 : i32
    return %c0_i32, %arg1 : i32, i32
  }
  func.func @transform_2(%arg0: i32, %arg1: i32) -> (i32, i32) {
    %c0_i32 = arith.constant 0 : i32
    %c0_i32_0 = arith.constant 0 : i32
    return %c0_i32, %arg1 : i32, i32
  }
  func.func @transform_3(%arg0: i32, %arg1: i32) -> (i32, i32) {
    %c0_i32 = arith.constant 0 : i32
    return %arg0, %arg1 : i32, i32
  }
}

module attributes {stable_mosaic.version = 11 : i64} {
  func.func @_mm_bias_kernel(%arg0: i32, %arg1: i32, %arg2: memref<128x576xbf16, #tpu.memory_space<vmem>>, %arg3: memref<576x128xbf16, #tpu.memory_space<vmem>>, %arg4: memref<1x128xf32, #tpu.memory_space<vmem>>, %arg5: memref<128x128xf32, #tpu.memory_space<vmem>>) attributes {dimension_semantics = [#tpu.dimension_semantics<parallel>, #tpu.dimension_semantics<parallel>], iteration_bounds = array<i64: 4, 1>, scalar_prefetch = 0 : i64, scratch_operands = 0 : i64, tpu.core_type = #tpu.core_type<tc>, window_params = [{transform_indices = @transform_0, window_bounds = array<i64: 128, 576>}, {transform_indices = @transform_1, window_bounds = array<i64: 576, 128>}, {transform_indices = @transform_2, window_bounds = array<i64: 1, 128>}, {transform_indices = @transform_3, window_bounds = array<i64: 128, 128>}]} {
    %c0 = arith.constant 0 : index
    %c0_0 = arith.constant 0 : index
    %0 = vector.load %arg2[%c0, %c0_0] : memref<128x576xbf16, #tpu.memory_space<vmem>>, vector<128x576xbf16>
    %c0_1 = arith.constant 0 : index
    %c0_2 = arith.constant 0 : index
    %1 = vector.load %arg3[%c0_1, %c0_2] : memref<576x128xbf16, #tpu.memory_space<vmem>>, vector<576x128xbf16>
    %cst = arith.constant dense<0.000000e+00> : vector<128x128xf32>
    %2 = tpu.matmul %0, %1, %cst {dimension_numbers = #tpu.dot_dimension_numbers<[1], [0], [0], [1], [0, 0, 1, 1], [], []>} : vector<128x576xbf16>, vector<576x128xbf16>, vector<128x128xf32> -> vector<128x128xf32>
    %c0_3 = arith.constant 0 : index
    %c0_4 = arith.constant 0 : index
    %3 = vector.load %arg4[%c0_3, %c0_4] : memref<1x128xf32, #tpu.memory_space<vmem>>, vector<1x128xf32>
    %4 = vector.broadcast %3 : vector<1x128xf32> to vector<128x128xf32>
    %5 = arith.addf %2, %4 : vector<128x128xf32>
    %c0_5 = arith.constant 0 : index
    %c0_6 = arith.constant 0 : index
    %6 = vector.load %arg5[%c0_5, %c0_6] : memref<128x128xf32, #tpu.memory_space<vmem>>, vector<128x128xf32>
    tpu.vector_store %arg5[%c0_5, %c0_6], %5 {strides = array<i32>} : memref<128x128xf32, #tpu.memory_space<vmem>>, vector<128x128xf32>,
    return
  }
  func.func @transform_0(%arg0: i32, %arg1: i32) -> (i32, i32) {
    %c0_i32 = arith.constant 0 : i32
    %c0_i32_0 = arith.constant 0 : i32
    return %arg0, %c0_i32 : i32, i32
  }
  func.func @transform_1(%arg0: i32, %arg1: i32) -> (i32, i32) {
    %c0_i32 = arith.constant 0 : i32
    %c0_i32_0 = arith.constant 0 : i32
    return %c0_i32, %arg1 : i32, i32
  }
  func.func @transform_2(%arg0: i32, %arg1: i32) -> (i32, i32) {
    %c0_i32 = arith.constant 0 : i32
    %c0_i32_0 = arith.constant 0 : i32
    return %c0_i32, %arg1 : i32, i32
  }
  func.func @transform_3(%arg0: i32, %arg1: i32) -> (i32, i32) {
    %c0_i32 = arith.constant 0 : i32
    return %arg0, %arg1 : i32, i32
  }
}

module attributes {stable_mosaic.version = 11 : i64} {
  func.func @_mm_bias_kernel(%arg0: i32, %arg1: i32, %arg2: memref<128x2072xbf16, #tpu.memory_space<vmem>>, %arg3: memref<2072x256xbf16, #tpu.memory_space<vmem>>, %arg4: memref<1x256xf32, #tpu.memory_space<vmem>>, %arg5: memref<128x256xf32, #tpu.memory_space<vmem>>) attributes {dimension_semantics = [#tpu.dimension_semantics<parallel>, #tpu.dimension_semantics<parallel>], iteration_bounds = array<i64: 4, 1>, scalar_prefetch = 0 : i64, scratch_operands = 0 : i64, tpu.core_type = #tpu.core_type<tc>, window_params = [{transform_indices = @transform_0, window_bounds = array<i64: 128, 2072>}, {transform_indices = @transform_1, window_bounds = array<i64: 2072, 256>}, {transform_indices = @transform_2, window_bounds = array<i64: 1, 256>}, {transform_indices = @transform_3, window_bounds = array<i64: 128, 256>}]} {
    %c0 = arith.constant 0 : index
    %c0_0 = arith.constant 0 : index
    %0 = vector.load %arg2[%c0, %c0_0] : memref<128x2072xbf16, #tpu.memory_space<vmem>>, vector<128x2072xbf16>
    %c0_1 = arith.constant 0 : index
    %c0_2 = arith.constant 0 : index
    %1 = vector.load %arg3[%c0_1, %c0_2] : memref<2072x256xbf16, #tpu.memory_space<vmem>>, vector<2072x256xbf16>
    %cst = arith.constant dense<0.000000e+00> : vector<128x256xf32>
    %2 = tpu.matmul %0, %1, %cst {dimension_numbers = #tpu.dot_dimension_numbers<[1], [0], [0], [1], [0, 0, 1, 1], [], []>} : vector<128x2072xbf16>, vector<2072x256xbf16>, vector<128x256xf32> -> vector<128x256xf32>
    %c0_3 = arith.constant 0 : index
    %c0_4 = arith.constant 0 : index
    %3 = vector.load %arg4[%c0_3, %c0_4] : memref<1x256xf32, #tpu.memory_space<vmem>>, vector<1x256xf32>
    %4 = vector.broadcast %3 : vector<1x256xf32> to vector<128x256xf32>
    %5 = arith.addf %2, %4 : vector<128x256xf32>
    %c0_5 = arith.constant 0 : index
    %c0_6 = arith.constant 0 : index
    %6 = vector.load %arg5[%c0_5, %c0_6] : memref<128x256xf32, #tpu.memory_space<vmem>>, vector<128x256xf32>
    tpu.vector_store %arg5[%c0_5, %c0_6], %5 {strides = array<i32>} : memref<128x256xf32, #tpu.memory_space<vmem>>, vector<128x256xf32>,
    return
  }
  func.func @transform_0(%arg0: i32, %arg1: i32) -> (i32, i32) {
    %c0_i32 = arith.constant 0 : i32
    %c0_i32_0 = arith.constant 0 : i32
    return %arg0, %c0_i32 : i32, i32
  }
  func.func @transform_1(%arg0: i32, %arg1: i32) -> (i32, i32) {
    %c0_i32 = arith.constant 0 : i32
    %c0_i32_0 = arith.constant 0 : i32
    return %c0_i32, %arg1 : i32, i32
  }
  func.func @transform_2(%arg0: i32, %arg1: i32) -> (i32, i32) {
    %c0_i32 = arith.constant 0 : i32
    %c0_i32_0 = arith.constant 0 : i32
    return %c0_i32, %arg1 : i32, i32
  }
  func.func @transform_3(%arg0: i32, %arg1: i32) -> (i32, i32) {
    %c0_i32 = arith.constant 0 : i32
    return %arg0, %arg1 : i32, i32
  }
}

</mosaic_0001>

<bundles_post_ra>
// kernel: inception_a_forward.3
= control target key start
LH: loop header
LB: loop body
LE: loop exit
PB: predicated region body
PF: predicated region fallthrough
CT: control target
= control target key end

     0   :  { %8 = vsyncpa [#allocation3], 0  ;;  %s875_s0 = inlined_call_operand.vmem [shape: bf16[512,4], index: 0, kind: input, shape index: {}]   ;;  %s876_s1 = inlined_call_operand.hbm [shape: bf16[4,128], index: 1, kind: input, shape index: {}]   ;;  %s877_s2 = inlined_call_operand.hbm [shape: f32[1,128], index: 2, kind: input, shape index: {}]   ;;  %s878_s3 = inlined_call_operand.vmem [shape: f32[512,128], index: 3, kind: output, shape index: {}]  }
   0x1   :  { %9 = vsyncpa [#allocation5], 0  ;;  %s764_s12 = smov 0   ;;  %s766_s13 = smov 0  }
   0x2   :  { %s768_s14 = smov 0  }
   0x3 LB: > { %s542_s15 = sadd.s32 4294967295, %s740_s14   ;;  %s27_s16 = sadd.s32 1, %s736_s13  ;;  %s740_s14 = sphi %s768_s14, %s15_s14   ;;  %s736_s13 = sphi %s766_s13, %s886_s13   ;;  %s732_s12 = sphi %s764_s12, %s885_s12  }
   0x4   : > { %p29_p0 = scmp.ge.s32.totalorder %s27_s16, 4  ;;  %p544_p1 = scmp.ge.s32.totalorder %s740_s14, 1 }
   0x5   : > { %p138_p2 = scmp.lt.s32.totalorder %s740_s14, 5  ;;  %p789_p4 = scmp.eq.s32.totalorder %s542_s15, 0 }
   0x6   : > { %s888_s16 = smov (%p29_p0, %s27_s16), 0  ;;  %s742_s19 = smov [#allocation2]  }
   0x7   : > { %p785_p3 = pnand %p544_p1, %p138_p2  ;;  %s153_s20 = sshll.u32 %s742_s19, 4  ;;  %s154_s20 = int_to_ptr.vmem [resolvable:$true] %s153_s20 }
   0x8   : > { %s882_s18 = scalar_select %p789_p4, 1, 0 }
   0x9   : > { %p613_p5 = pneg %p785_p3  ;;  %s743_s21 = smov [#allocation4]  }
   0xa   : > { %s166_s22 = sshll.u32 %s743_s21, 4  ;;  %s669_s24 = scalar_lea.vmem %s154_s20, 32  ;;  %s167_s22 = int_to_ptr.vmem [resolvable:$true] %s166_s22 }
   0xb   : > { %p797_p6 = pnand %p789_p4, %p613_p5  ;;  %p670_p8 = scmp.ne.s32.totalorder %s154_s20, %s669_s24 }
   0xc   : > { %p677_p11 = scmp.lt.s32.totalorder %s154_s20, %s154_s20  ;;  %p678_p12 = scmp.lt.s32.totalorder %s669_s24, %s669_s24 }
   0xd   : > { %p660_p7 = pneg %p797_p6 }
   0xe   : > { %p679_p13 = por %p678_p12, %p677_p11 }
   0xf   : > { %p672_p9 = pnand %p670_p8, %p660_p7 }
  0x11   : > { %p673_p10 = pneg %p672_p9 }
  0x13   : > { %p680_p0 = pnand %p679_p13, %p673_p10 }
  0x15   : > { %683 = shalt.err (!%p680_p0)
}
  0x16   : > { %616 = dma.hbm_to_vmem [thread:$0]  (!%p797_p6), %s876_s1, 32, %s154_s20, [#allocation3]  }
  0x17   : > { %s695_s27 = scalar_lea.vmem %s167_s22, 16  ;;  %s702_s28 = scalar_lea.vmem %s167_s22, 32 }
  0x18   : > { %p696_p1 = scmp.ne.s32.totalorder %s167_s22, %s695_s27  ;;  %p703_p8 = scmp.lt.s32.totalorder %s167_s22, %s167_s22 }
  0x19   : > { %p704_p9 = scmp.lt.s32.totalorder %s702_s28, %s695_s27 }
  0x1a   : > { %p698_p2 = pnand %p696_p1, %p660_p7 }
  0x1b   : > { %p705_p4 = por %p704_p9, %p703_p8 }
  0x1c   : > { %p699_p5 = pneg %p698_p2 }
  0x1e   : > { %p706_p11 = pnand %p705_p4, %p699_p5 }
  0x20   : > { %709 = shalt.err (!%p706_p11)
}
  0x21   : > { %619 = dma.hbm_to_vmem [thread:$0]  (!%p797_p6), %s877_s2, 16, %s167_s22, [#allocation5]  }
  0x22   : > { %188 = sbr.rel (%p785_p3) target bundleno = 261 (0x105), region = 32  ;;  %p884_p10 = scmp.ne.s32.totalorder (!%p785_p3), %s882_s18, 0 }
  0x27   : > { %723 = dma.done.wait (%p884_p10), [#allocation3], 32  }
  0x28   : > { %725 = vsyncadd (%p884_p10), [#allocation3], 4294967264 }
  0x29   : > { %727 = dma.done.wait (%p884_p10), [#allocation5], 16  }
  0x2a   : > { %729 = vsyncadd (%p884_p10), [#allocation5], 4294967280  ;;  %s551_s4 = sshll.u32 %s732_s12, 4  ;;  %vm324_vm0 = vcmask 1041408   ;;  %vm299_vm1 = vcmask 31744  }
  0x2b   : > { %p220_p4 = scmp.lt.s32.totalorder %s551_s4, 63  ;;  %v251_v0 = vld [vmem:[#allocation2] sm:$0x3]  ;;  %v555_v10 = vld [vmem:[#allocation4] ss:$0 sm:$0xff] }
  0x2c   : > { %603 = vmatprep.subr.msk.bf16.mxu0 %vm324_vm0, %v251_v0  ;;  %604 = vmatprep.subr.msk.bf16.mxu1 %vm324_vm0, %v251_v0  ;;  %v326_v1 = vsel %vm324_vm0, %v251_v0, 0 }
  0x2d   : > { %s890_s4 = smov (!%p220_p4, %s551_s4), 63  ;;  %584 = vmatpush3.bf16.msra.mxu0 %v326_v1  ;;  %602 = vmatpush3.bf16.msra.mxu1 %v326_v1 }
  0x2e   : > { %s552_s5 = sshll.u32 %s890_s4, 2  ;;  %s554_s9 = sshll.u32 %s890_s4, 3 }
  0x2f   : > { %s223_s8 = scalar_lea.vmem %s875_s0, %s552_s5  ;;  %s848_s12 = scalar_lea.vmem %s878_s3, %s554_s9 }
  0x30   : > { %v650_v2 = vld [vmem:[%s223_s8] sm:$0xff]   ;;  %v652_v4 = vld [vmem:[%s223_s8 + $0x8] sm:$0xff]   ;;  %v654_v6 = vld [vmem:[%s223_s8 + $0x10] sm:$0xff]  }
  0x31   : > { %v651_v3 = vld [vmem:[%s223_s8 + $0x20] sm:$0xff]   ;;  %585 = vmatprep.mubr.msk.bf16.mxu0 %vm299_vm1, %v650_v2  ;;  %v653_v5 = vld [vmem:[%s223_s8 + $0x28] sm:$0xff]   ;;  %v655_v7 = vld [vmem:[%s223_s8 + $0x30] sm:$0xff]  }
  0x32   : > { %593 = vmatprep.mubr.msk.bf16.mxu1 %vm299_vm1, %v651_v3  ;;  %586 = vmatmul.mubr.msk.bf16.vlgmr.msra.gmra.mxu0 %vm299_vm1, %v652_v4  ;;  %v656_v8 = vld [vmem:[%s223_s8 + $0x18] sm:$0xff]  }
  0x33   : > { %594 = vmatmul.mubr.msk.bf16.vlgmr.msra.gmra.mxu1 %vm299_vm1, %v653_v5  ;;  %589 = vmatprep.mubr.msk.bf16.mxu0 %vm299_vm1, %v654_v6  ;;  %v657_v9 = vld [vmem:[%s223_s8 + $0x38] sm:$0xff]  }
  0x34   : > { %597 = vmatprep.mubr.msk.bf16.mxu1 %vm299_vm1, %v655_v7 }
  0x3a   : > { %590 = vmatmul.mubr.msk.bf16.gmra.mxu0 %vm299_vm1, %v656_v8 }
  0x3b   : > { %598 = vmatmul.mubr.msk.bf16.gmra.mxu1 %vm299_vm1, %v657_v9 }
  0xf2   : > { %v587_v11 = vpop.f32.mrf.mxu0 }
  0xf3   : > { %v371_v12 = vadd.f32 %v587_v11, %v555_v10  ;;  %v595_v13 = vpop.f32.mrf.mxu1 }
  0xf4   : > { %v403_v14 = vadd.f32 %v595_v13, %v555_v10  ;;  %v362_v15 = vpop.f32.mrf.mxu0 }
  0xf5   : > { %427 = vst [vmem:[%s848_s12 + $0x10] sm:$0xff] %v371_v12  ;;  %v363_v16 = vadd.f32 %v555_v10, %v362_v15  ;;  %v394_v17 = vpop.f32.mrf.mxu1 }
  0xf6   : > { %435 = vst [vmem:[%s848_s12 + $0x50] sm:$0xff] %v403_v14  ;;  %v395_v18 = vadd.f32 %v555_v10, %v394_v17  ;;  %v588_v19 = vpop.f32.mrf.mxu0 }
  0xf7   : > { %425 = vst [vmem:[%s848_s12] sm:$0xff] %v363_v16  ;;  %v374_v20 = vadd.f32 %v588_v19, %v555_v10  ;;  %v596_v21 = vpop.f32.mrf.mxu1 }
  0xf8   : > { %433 = vst [vmem:[%s848_s12 + $0x40] sm:$0xff] %v395_v18  ;;  %v406_v22 = vadd.f32 %v596_v21, %v555_v10  ;;  %v365_v23 = vpop.f32.mrf.mxu0 }
  0xf9   : > { %428 = vst [vmem:[%s848_s12 + $0x18] sm:$0xff] %v374_v20  ;;  %v366_v24 = vadd.f32 %v555_v10, %v365_v23  ;;  %v397_v25 = vpop.f32.mrf.mxu1 }
  0xfa   : > { %436 = vst [vmem:[%s848_s12 + $0x58] sm:$0xff] %v406_v22  ;;  %v398_v26 = vadd.f32 %v555_v10, %v397_v25  ;;  %v591_v27 = vpop.f32.mrf.mxu0 }
  0xfb   : > { %426 = vst [vmem:[%s848_s12 + $0x8] sm:$0xff] %v366_v24  ;;  %v387_v28 = vadd.f32 %v591_v27, %v555_v10  ;;  %v599_v29 = vpop.f32.mrf.mxu1 }
  0xfc   : > { %434 = vst [vmem:[%s848_s12 + $0x48] sm:$0xff] %v398_v26  ;;  %v419_v30 = vadd.f32 %v599_v29, %v555_v10  ;;  %v378_v31 = vpop.f32.mrf.mxu0 }
  0xfd   : > { %431 = vst [vmem:[%s848_s12 + $0x30] sm:$0xff] %v387_v28  ;;  %v379_v32 = vadd.f32 %v555_v10, %v378_v31  ;;  %v410_v33 = vpop.f32.mrf.mxu1 }
  0xfe   : > { %439 = vst [vmem:[%s848_s12 + $0x70] sm:$0xff] %v419_v30  ;;  %v411_v34 = vadd.f32 %v555_v10, %v410_v33  ;;  %v592_v35 = vpop.f32.mrf.mxu0 }
  0xff   : > { %429 = vst [vmem:[%s848_s12 + $0x20] sm:$0xff] %v379_v32  ;;  %v390_v36 = vadd.f32 %v592_v35, %v555_v10  ;;  %v600_v37 = vpop.f32.mrf.mxu1 }
 0x100   : > { %437 = vst [vmem:[%s848_s12 + $0x60] sm:$0xff] %v411_v34  ;;  %v422_v38 = vadd.f32 %v600_v37, %v555_v10  ;;  %v381_v39 = vpop.f32.mrf.mxu0 }
 0x101   : > { %432 = vst [vmem:[%s848_s12 + $0x38] sm:$0xff] %v390_v36  ;;  %v382_v40 = vadd.f32 %v555_v10, %v381_v39  ;;  %v413_v41 = vpop.f32.mrf.mxu1 }
 0x102   : > { %440 = vst [vmem:[%s848_s12 + $0x78] sm:$0xff] %v422_v38  ;;  %v414_v42 = vadd.f32 %v555_v10, %v413_v41 }
 0x103   : > { %430 = vst [vmem:[%s848_s12 + $0x28] sm:$0xff] %v382_v40 }
 0x104   : > { %438 = vst [vmem:[%s848_s12 + $0x68] sm:$0xff] %v414_v42 }
 0x105 PF: > { %s15_s14 = sadd.s32 1, %s740_s14   ;;  %s885_s12 = smov %s736_s13 }
 0x106   : > { %p12_p3 = scmp.ge.s32.totalorder %s15_s14, 6   ;;  %s886_s13 = smov %s888_s16 }
 0x108   :  { %14 = sbr.rel (!%p12_p3) target bundleno = 3 (0x3), region = 73 }
 0x10d   :  { %469 = vsyncpa [#allocation3], 1 }
 0x10e   :  { %471 = vsyncpa [#allocation3 + $0x1], 1 }
 0x10f   :  { %472 = vsyncpa [#allocation5], 1 }

// kernel: inception_a_forward.4
= control target key start
LH: loop header
LB: loop body
LE: loop exit
PB: predicated region body
PF: predicated region fallthrough
CT: control target
= control target key end

     0   :  { %s1637_s12 = smov 0   ;;  %s1639_s13 = smov 0   ;;  %s1964_s0 = inlined_call_operand.vmem [shape: bf16[512,576], index: 0, kind: input, shape index: {}]   ;;  %s1965_s1 = inlined_call_operand.vmem [shape: bf16[576,128], index: 1, kind: input, shape index: {}]   ;;  %s1966_s2 = inlined_call_operand.vmem [shape: f32[1,128], index: 2, kind: input, shape index: {}]   ;;  %s1967_s3 = inlined_call_operand.vmem [shape: f32[512,128], index: 3, kind: output, shape index: {}]  }
   0x1   :  { %s1641_s14 = smov 0  }
   0x2 LB: > { %s25_s15 = sadd.s32 1, %s1611_s13  ;;  %p1212_p0 = scmp.ge.s32.totalorder %s1615_s14, 1  ;;  %s1615_s14 = sphi %s1641_s14, %s13_s14   ;;  %s1611_s13 = sphi %s1639_s13, %s1977_s13   ;;  %s1607_s12 = sphi %s1637_s12, %s1976_s12  }
   0x3   : > { %p27_p1 = scmp.ge.s32.totalorder %s25_s15, 4  ;;  %p170_p2 = scmp.lt.s32.totalorder %s1615_s14, 5 }
   0x5   : > { %s1979_s15 = smov (%p27_p1, %s25_s15), 0  ;;  %p171_p3 = pnand %p1212_p0, %p170_p2 }
   0x7   : > { %174 = sbr.rel (%p171_p3) target bundleno = 321 (0x141), region = 32 }
   0xc   : > { %v1501_v0 = vld [vmem:[%s1965_s1 + $0x78] sm:$0xff]   ;;  %v1505_v4 = vld [vmem:[%s1965_s1 + $0x70] sm:$0xff]   ;;  %v1509_v8 = vld [vmem:[%s1965_s1 + $0x68] sm:$0xff]   ;;  %s1213_s23 = sshll.u32 %s1607_s12, 4  ;;  %vm772_vm0 = vcmask 523264  }
   0xd   : > { %v1502_v1 = vld [vmem:[%s1965_s1 + $0xf8] sm:$0xff]   ;;  %1304 = vmatprep.subr.bf16.mxu0 %v1501_v0  ;;  %v1506_v5 = vld [vmem:[%s1965_s1 + $0xf0] sm:$0xff]   ;;  %v1510_v9 = vld [vmem:[%s1965_s1 + $0xe8] sm:$0xff]   ;;  %p206_p4 = scmp.lt.s32.totalorder %s1213_s23, 63 }
   0xe   : > { %v1503_v2 = vld [vmem:[%s1965_s1 + $0x38] sm:$0xff]   ;;  %1368 = vmatprep.subr.bf16.mxu1 %v1502_v1  ;;  %v1507_v6 = vld [vmem:[%s1965_s1 + $0x30] sm:$0xff]   ;;  %v1511_v10 = vld [vmem:[%s1965_s1 + $0x28] sm:$0xff]  }
   0xf   : > { %v1504_v3 = vld [vmem:[%s1965_s1 + $0xb8] sm:$0xff]   ;;  %1305 = vmatpush3.bf16.msra.mxu0 %v1503_v2  ;;  %v1508_v7 = vld [vmem:[%s1965_s1 + $0xb0] sm:$0xff]   ;;  %v1512_v11 = vld [vmem:[%s1965_s1 + $0xa8] sm:$0xff]   ;;  %s1981_s23 = smov (!%p206_p4, %s1213_s23), 63 }
  0x10   : > { %1369 = vmatpush3.bf16.msra.mxu1 %v1504_v3  ;;  %1306 = vmatprep.subr.bf16.mxu0 %v1505_v4  ;;  %v1513_v12 = vld [vmem:[%s1965_s1 + $0x60] sm:$0xff]   ;;  %v1517_v16 = vld [vmem:[%s1965_s1 + $0x58] sm:$0xff]   ;;  %v1521_v20 = vld [vmem:[%s1965_s1 + $0x50] sm:$0xff]   ;;  %s1476_s22 = smul.u32 20, %s1981_s23  ;;  %s1216_s26 = sshll.u32 %s1981_s23, 3 }
  0x11   : > { %1370 = vmatprep.subr.bf16.mxu1 %v1506_v5  ;;  %v1514_v13 = vld [vmem:[%s1965_s1 + $0xe0] sm:$0xff]   ;;  %v1518_v17 = vld [vmem:[%s1965_s1 + $0xd8] sm:$0xff]   ;;  %v1522_v21 = vld [vmem:[%s1965_s1 + $0xd0] sm:$0xff]   ;;  %s1906_s23 = scalar_lea.vmem %s1967_s3, %s1216_s26 }
  0x12   : > { %v1515_v14 = vld [vmem:[%s1965_s1 + $0x20] sm:$0xff]   ;;  %v1519_v18 = vld [vmem:[%s1965_s1 + $0x18] sm:$0xff]   ;;  %v1523_v22 = vld [vmem:[%s1965_s1 + $0x10] sm:$0xff]   ;;  %s1754_s6 = scalar_lea.vmem %s1964_s0, %s1476_s22 }
  0x13   : > { %1307 = vmatpush3.bf16.msra.mxu0 %v1507_v6  ;;  %v1516_v15 = vld [vmem:[%s1965_s1 + $0xa0] sm:$0xff]   ;;  %v1520_v19 = vld [vmem:[%s1965_s1 + $0x98] sm:$0xff]   ;;  %v1524_v23 = vld [vmem:[%s1965_s1 + $0x90] sm:$0xff]  }
  0x14   : > { %1371 = vmatpush3.bf16.msra.mxu1 %v1508_v7  ;;  %1308 = vmatprep.subr.bf16.mxu0 %v1509_v8  ;;  %v1525_v24 = vld [vmem:[%s1965_s1 + $0x48] sm:$0xff]   ;;  %v1529_v28 = vld [vmem:[%s1965_s1 + $0x40] sm:$0xff]   ;;  %v1539_v36 = vld [vmem:[%s1965_s1 + $0x118] sm:$0xff]  }
  0x15   : > { %1372 = vmatprep.subr.bf16.mxu1 %v1510_v9  ;;  %v1526_v25 = vld [vmem:[%s1965_s1 + $0xc8] sm:$0xff]   ;;  %v1530_v29 = vld [vmem:[%s1965_s1 + $0xc0] sm:$0xff]   ;;  %v1552_v42 = vld [vmem:[%s1965_s1 + $0x110] sm:$0xff]  }
  0x16   : > { %v1527_v26 = vld [vmem:[%s1965_s1 + $0x8] sm:$0xff]   ;;  %v1531_v30 = vld [vmem:[%s1965_s1] sm:$0xff]   ;;  %v1548_v43 = vld [vmem:[%s1754_s6 + $0x5c] ss:$20 sps:$4 sm:$0xff]  }
  0x17   : > { %1309 = vmatpush3.bf16.msra.mxu0 %v1511_v10  ;;  %v1528_v27 = vld [vmem:[%s1965_s1 + $0x88] sm:$0xff]   ;;  %v1532_v31 = vld [vmem:[%s1965_s1 + $0x80] sm:$0xff]   ;;  %v1553_v47 = vld [vmem:[%s1754_s6 + $0x7c] ss:$20 sps:$4 sm:$0xff]  }
  0x18   : > { %1373 = vmatpush3.bf16.msra.mxu1 %v1512_v11  ;;  %1310 = vmatprep.subr.bf16.mxu0 %v1513_v12  ;;  %v1533_v32 = vld [vmem:[%s1754_s6] ss:$20 sps:$4 sm:$0xff]   ;;  %v1535_v33 = vld [vmem:[%s1754_s6 + $0x4] ss:$20 sps:$4 sm:$0xff]   ;;  %v1536_v34 = vld [vmem:[%s1754_s6 + $0x8] ss:$20 sps:$4 sm:$0xff]  }
  0x19   : > { %1374 = vmatprep.subr.bf16.mxu1 %v1514_v13  ;;  %v1538_v35 = vld [vmem:[%s1754_s6 + $0xc] ss:$20 sps:$4 sm:$0xff]   ;;  %829 = vmatprep.mubr.bf16.mxu0 %v1535_v33  ;;  %v1542_v38 = vld [vmem:[%s1754_s6 + $0x34] ss:$20 sps:$4 sm:$0xff]   ;;  %v1545_v40 = vld [vmem:[%s1754_s6 + $0x30] ss:$20 sps:$4 sm:$0xff]  }
  0x1a   : > { %926 = vmatprep.mubr.bf16.mxu1 %v1538_v35  ;;  %v1540_v37 = vld [vmem:[%s1754_s6 + $0x2c] ss:$20 sps:$4 sm:$0xff]   ;;  %v1544_v39 = vld [vmem:[%s1754_s6 + $0x28] ss:$20 sps:$4 sm:$0xff]   ;;  %v1550_v44 = vld [vmem:[%s1754_s6 + $0x50] ss:$20 sps:$4 sm:$0xff]  }
  0x1b   : > { %1311 = vmatpush3.bf16.msra.mxu0 %v1515_v14  ;;  %v1546_v41 = vld [vmem:[%s1754_s6 + $0x54] ss:$20 sps:$4 sm:$0xff]   ;;  %v1551_v45 = vld [vmem:[%s1754_s6 + $0x58] ss:$20 sps:$4 sm:$0xff]   ;;  %v1578_v49 = vld [vmem:[%s1965_s1 + $0x100] sm:$0xff]  }
  0x1c   : > { %1375 = vmatpush3.bf16.msra.mxu1 %v1516_v15  ;;  %1312 = vmatprep.subr.bf16.mxu0 %v1517_v16  ;;  %v1565_v46 = vld [vmem:[%s1965_s1 + $0x108] sm:$0xff]   ;;  %v1555_v48 = vld [vmem:[%s1754_s6 + $0x84] ss:$20 sps:$4 sm:$0xff]   ;;  %v1558_v51 = vld [vmem:[%s1754_s6 + $0x80] ss:$20 sps:$4 sm:$0xff]  }
  0x1d   : > { %1376 = vmatprep.subr.bf16.mxu1 %v1518_v17  ;;  %v1557_v50 = vld [vmem:[%s1754_s6 + $0x78] ss:$20 sps:$4 sm:$0xff]   ;;  %v1563_v54 = vld [vmem:[%s1754_s6 + $0xa0] ss:$20 sps:$4 sm:$0xff]   ;;  %v1564_v55 = vld [vmem:[%s1754_s6 + $0xa8] ss:$20 sps:$4 sm:$0xff]  }
  0x1e   : > { %v1559_v52 = vld [vmem:[%s1754_s6 + $0xa4] ss:$20 sps:$4 sm:$0xff]   ;;  %v1561_v53 = vld [vmem:[%s1754_s6 + $0xac] ss:$20 sps:$4 sm:$0xff]   ;;  %v1568_v57 = vld [vmem:[%s1754_s6 + $0xd4] ss:$20 sps:$4 sm:$0xff]  }
  0x1f   : > { %1313 = vmatpush3.bf16.msra.mxu0 %v1519_v18  ;;  %v1566_v56 = vld [vmem:[%s1754_s6 + $0xcc] ss:$20 sps:$4 sm:$0xff]   ;;  %v1570_v58 = vld [vmem:[%s1754_s6 + $0xc8] ss:$20 sps:$4 sm:$0xff]   ;;  %v1571_v59 = vld [vmem:[%s1754_s6 + $0xd0] ss:$20 sps:$4 sm:$0xff]  }
  0x20   : > { %1377 = vmatpush3.bf16.msra.mxu1 %v1520_v19  ;;  %1314 = vmatprep.subr.bf16.mxu0 %v1521_v20  ;;  %v1572_v60 = vld [vmem:[%s1754_s6 + $0xf4] ss:$20 sps:$4 sm:$0xff]   ;;  %v1574_v61 = vld [vmem:[%s1754_s6 + $0xfc] ss:$20 sps:$4 sm:$0xff]   ;;  %v1577_v63 = vld [vmem:[%s1754_s6 + $0xf8] ss:$20 sps:$4 sm:$0xff]  }
  0x21   : > { %1378 = vmatprep.subr.bf16.mxu1 %v1522_v21  ;;  %v1576_v62 = vld [vmem:[%s1754_s6 + $0xf0] ss:$20 sps:$4 sm:$0xff]   ;;  %v1583_v2 = vld [vmem:[%s1754_s6 + $0x118] ss:$20 sps:$4 sm:$0xff]   ;;  %v1584_v3 = vld [vmem:[%s1754_s6 + $0x120] ss:$20 sps:$4 sm:$0xff]  }
  0x22   : > { %v1579_v0 = vld [vmem:[%s1754_s6 + $0x11c] ss:$20 sps:$4 sm:$0xff]   ;;  %v1581_v1 = vld [vmem:[%s1754_s6 + $0x124] ss:$20 sps:$4 sm:$0xff]   ;;  %v1589_v8 = vld [vmem:[%s1754_s6 + $0x60] ss:$20 sps:$4 sm:$0xff]  }
  0x23   : > { %1315 = vmatpush3.bf16.msra.mxu0 %v1523_v22  ;;  %v1585_v4 = vld [vmem:[%s1754_s6 + $0x10] ss:$20 sps:$4 sm:$0xff]   ;;  %v1587_v6 = vld [vmem:[%s1754_s6 + $0x38] ss:$20 sps:$4 sm:$0xff]   ;;  %v1590_v9 = vld [vmem:[%s1754_s6 + $0x100] ss:$20 sps:$4 sm:$0xff]  }
  0x24   : > { %1379 = vmatpush3.bf16.msra.mxu1 %v1524_v23  ;;  %1316 = vmatprep.subr.bf16.mxu0 %v1525_v24  ;;  %v1586_v5 = vld [vmem:[%s1754_s6 + $0xb0] ss:$20 sps:$4 sm:$0xff]   ;;  %v1588_v7 = vld [vmem:[%s1754_s6 + $0xd8] ss:$20 sps:$4 sm:$0xff]   ;;  %v1591_v10 = vld [vmem:[%s1754_s6 + $0x88] ss:$20 sps:$4 sm:$0xff]  }
  0x25   : > { %1380 = vmatprep.subr.bf16.mxu1 %v1526_v25  ;;  %v1592_v11 = vld [vmem:[%s1754_s6 + $0x128] ss:$20 sps:$4 sm:$0xff]  }
  0x27   : > { %1317 = vmatpush3.bf16.msra.mxu0 %v1527_v26 }
  0x28   : > { %1381 = vmatpush3.bf16.msra.mxu1 %v1528_v27  ;;  %1318 = vmatprep.subr.bf16.mxu0 %v1529_v28 }
  0x29   : > { %1382 = vmatprep.subr.bf16.mxu1 %v1530_v29 }
  0x2b   : > { %1319 = vmatpush3.bf16.msra.mxu0 %v1531_v30 }
  0x2c   : > { %1383 = vmatpush3.bf16.msra.mxu1 %v1532_v31  ;;  %1444 = vmatprep.subr.bf16.mxu0 %v1539_v36 }
  0x2d   : > { %1468 = vmatprep.subr.bf16.mxu1 %v1539_v36 }
  0x2e   : > { %830 = vmatmul.mubr.bf16.vlgmr.msra.gmra.mxu0 %v1533_v32 }
  0x2f   : > { %927 = vmatmul.mubr.bf16.vlgmr.msra.gmra.mxu1 %v1536_v34  ;;  %1445 = vmatpush3.bf16.msra.mxu0 %v1539_v36 }
  0x30   : > { %1472 = vmatpush3.bf16.msra.mxu1 %v1539_v36  ;;  %837 = vmatprep.mubr.bf16.mxu0 %v1540_v37 }
  0x31   : > { %934 = vmatprep.mubr.bf16.mxu1 %v1542_v38  ;;  %1446 = vmatprep.subr.bf16.mxu0 %v1552_v42 }
  0x32   : > { %1469 = vmatprep.subr.bf16.mxu1 %v1552_v42 }
  0x33   : > { %1447 = vmatpush3.bf16.msra.mxu0 %v1552_v42 }
  0x34   : > { %1473 = vmatpush3.bf16.msra.mxu1 %v1552_v42  ;;  %1448 = vmatprep.subr.bf16.mxu0 %v1565_v46 }
  0x35   : > { %1470 = vmatprep.subr.bf16.mxu1 %v1565_v46 }
  0x36   : > { %838 = vmatmul.mubr.bf16.gmra.mxu0 %v1544_v39 }
  0x37   : > { %935 = vmatmul.mubr.bf16.gmra.mxu1 %v1545_v40  ;;  %845 = vmatprep.mubr.bf16.mxu0 %v1546_v41 }
  0x38   : > { %942 = vmatprep.mubr.bf16.mxu1 %v1548_v43  ;;  %1449 = vmatpush3.bf16.msra.mxu0 %v1565_v46 }
  0x39   : > { %1474 = vmatpush3.bf16.msra.mxu1 %v1565_v46  ;;  %1450 = vmatprep.subr.bf16.mxu0 %v1578_v49 }
  0x3a   : > { %1471 = vmatprep.subr.bf16.mxu1 %v1578_v49 }
  0x3c   : > { %1451 = vmatpush3.bf16.msra.mxu0 %v1578_v49 }
  0x3d   : > { %1475 = vmatpush3.bf16.msra.mxu1 %v1578_v49 }
  0x3e   : > { %846 = vmatmul.mubr.bf16.gmra.mxu0 %v1550_v44 }
  0x3f   : > { %943 = vmatmul.mubr.bf16.gmra.mxu1 %v1551_v45  ;;  %853 = vmatprep.mubr.bf16.mxu0 %v1553_v47 }
  0x40   : > { %950 = vmatprep.mubr.bf16.mxu1 %v1555_v48 }
  0x46   : > { %854 = vmatmul.mubr.bf16.gmra.mxu0 %v1557_v50 }
  0x47   : > { %951 = vmatmul.mubr.bf16.gmra.mxu1 %v1558_v51  ;;  %861 = vmatprep.mubr.bf16.mxu0 %v1559_v52 }
  0x48   : > { %958 = vmatprep.mubr.bf16.mxu1 %v1561_v53 }
  0x4e   : > { %862 = vmatmul.mubr.bf16.gmra.mxu0 %v1563_v54 }
  0x4f   : > { %959 = vmatmul.mubr.bf16.gmra.mxu1 %v1564_v55  ;;  %869 = vmatprep.mubr.bf16.mxu0 %v1566_v56 }
  0x50   : > { %966 = vmatprep.mubr.bf16.mxu1 %v1568_v57 }
  0x56   : > { %870 = vmatmul.mubr.bf16.gmra.mxu0 %v1570_v58 }
  0x57   : > { %967 = vmatmul.mubr.bf16.gmra.mxu1 %v1571_v59  ;;  %877 = vmatprep.mubr.bf16.mxu0 %v1572_v60 }
  0x58   : > { %974 = vmatprep.mubr.bf16.mxu1 %v1574_v61 }
  0x5e   : > { %878 = vmatmul.mubr.bf16.gmra.mxu0 %v1576_v62 }
  0x5f   : > { %975 = vmatmul.mubr.bf16.gmra.mxu1 %v1577_v63  ;;  %885 = vmatprep.mubr.bf16.mxu0 %v1579_v0 }
  0x60   : > { %982 = vmatprep.mubr.bf16.mxu1 %v1581_v1 }
  0x66   : > { %886 = vmatmul.mubr.bf16.gmra.mxu0 %v1583_v2 }
  0x67   : > { %983 = vmatmul.mubr.bf16.gmra.mxu1 %v1584_v3  ;;  %1452 = vmatprep.mubr.msk.bf16.mxu0 %vm772_vm0, %v1585_v4  ;;  %v1879_v4 = vld [vmem:[%s1966_s2] ss:$0 sm:$0xff] }
  0x68   : > { %1460 = vmatprep.mubr.msk.bf16.mxu1 %vm772_vm0, %v1586_v5 }
  0x6e   : > { %1453 = vmatmul.mubr.msk.bf16.vlgmr.msra.gmra.mxu0 %vm772_vm0, %v1587_v6 }
  0x6f   : > { %1461 = vmatmul.mubr.msk.bf16.vlgmr.msra.gmra.mxu1 %vm772_vm0, %v1588_v7  ;;  %1456 = vmatprep.mubr.msk.bf16.mxu0 %vm772_vm0, %v1589_v8 }
  0x70   : > { %1464 = vmatprep.mubr.msk.bf16.mxu1 %vm772_vm0, %v1590_v9 }
  0x76   : > { %1457 = vmatmul.mubr.msk.bf16.gmra.mxu0 %vm772_vm0, %v1591_v10 }
  0x77   : > { %1465 = vmatmul.mubr.msk.bf16.gmra.mxu1 %vm772_vm0, %v1592_v11 }
  0xee   : > { %v1320_v12 = vpop.f32.mrf.mxu0 }
  0xef   : > { %v1822_v13 = vpop.f32.mrf.mxu1 }
  0xf0   : > { %v1321_v14 = vpop.f32.mrf.mxu0 }
  0xf1   : > { %v1824_v15 = vpop.f32.mrf.mxu1  ;;  %v1322_v2 = vadd.f32 %v1321_v14, %v1320_v12 }
  0xf2   : > { %v1323_v16 = vpop.f32.mrf.mxu0 }
  0xf3   : > { %v1826_v17 = vpop.f32.mrf.mxu1 }
  0xf4   : > { %v1324_v18 = vpop.f32.mrf.mxu0 }
  0xf5   : > { %v1828_v19 = vpop.f32.mrf.mxu1  ;;  %v1325_v5 = vadd.f32 %v1324_v18, %v1323_v16  ;;  %v1386_v16 = vadd.f32 %v1824_v15, %v1822_v13 }
  0xf6   : > { %v1326_v20 = vpop.f32.mrf.mxu0  ;;  %v1389_v18 = vadd.f32 %v1828_v19, %v1826_v17 }
  0xf7   : > { %v1830_v21 = vpop.f32.mrf.mxu1 }
  0xf8   : > { %v1327_v22 = vpop.f32.mrf.mxu0 }
  0xf9   : > { %v1832_v23 = vpop.f32.mrf.mxu1  ;;  %v1328_v6 = vadd.f32 %v1327_v22, %v1326_v20 }
  0xfa   : > { %v1329_v24 = vpop.f32.mrf.mxu0 }
  0xfb   : > { %v1834_v25 = vpop.f32.mrf.mxu1 }
  0xfc   : > { %v1330_v26 = vpop.f32.mrf.mxu0 }
  0xfd   : > { %v1836_v27 = vpop.f32.mrf.mxu1  ;;  %v1331_v10 = vadd.f32 %v1330_v26, %v1329_v24  ;;  %v1392_v26 = vadd.f32 %v1832_v23, %v1830_v21 }
  0xfe   : > { %v1332_v28 = vpop.f32.mrf.mxu0  ;;  %v1395_v17 = vadd.f32 %v1836_v27, %v1834_v25 }
  0xff   : > { %v1838_v29 = vpop.f32.mrf.mxu1 }
 0x100   : > { %v1333_v30 = vpop.f32.mrf.mxu0 }
 0x101   : > { %v1840_v31 = vpop.f32.mrf.mxu1 }
 0x102   : > { %v1842_v32 = vpop.f32.mrf.mxu0 }
 0x103   : > { %v1844_v33 = vpop.f32.mrf.mxu1 }
 0x104   : > { %1968 = vst [vmem:[#allocation2_spill] sm:$0xff] %v1844_v33  ;;  %v1846_v34 = vpop.f32.mrf.mxu0  ;;  %v840_v33 = vadd.f32 %v1328_v6, %v1879_v4 }
 0x105   : > { %v1848_v35 = vpop.f32.mrf.mxu1 }
 0x106   : > { %1969 = vst [vmem:[#allocation3_spill] sm:$0xff] %v1848_v35  ;;  %v1338_v36 = vpop.f32.mrf.mxu0  ;;  %v832_v35 = vadd.f32 %v1322_v2, %v1879_v4 }
 0x107   : > { %v1850_v37 = vpop.f32.mrf.mxu1 }
 0x108   : > { %v1339_v38 = vpop.f32.mrf.mxu0 }
 0x109   : > { %v1852_v39 = vpop.f32.mrf.mxu1  ;;  %v1340_v19 = vadd.f32 %v1339_v38, %v1338_v36 }
 0x10a   : > { %v1854_v40 = vpop.f32.mrf.mxu0 }
 0x10b   : > { %v1856_v41 = vpop.f32.mrf.mxu1 }
 0x10c   : > { %v1858_v42 = vpop.f32.mrf.mxu0 }
 0x10d   : > { %v1860_v43 = vpop.f32.mrf.mxu1 }
 0x10e   : > { %1970 = vst [vmem:[#allocation4_spill] sm:$0xff] %v1860_v43  ;;  %v1344_v44 = vpop.f32.mrf.mxu0 }
 0x10f   : > { %v1408_v45 = vpop.f32.mrf.mxu1 }
 0x110   : > { %v1345_v46 = vpop.f32.mrf.mxu0 }
 0x111   : > { %v1409_v47 = vpop.f32.mrf.mxu1  ;;  %v1346_v12 = vadd.f32 %v1345_v46, %v1344_v44  ;;  %v843_v44 = vadd.f32 %v1331_v10, %v1879_v4  ;;  %v1334_v46 = vadd.f32 %v1333_v30, %v1332_v28 }
 0x112   : > { %v1347_v48 = vpop.f32.mrf.mxu0  ;;  %v1410_v21 = vadd.f32 %v1409_v47, %v1408_v45 }
 0x113   : > { %v1862_v49 = vpop.f32.mrf.mxu1  ;;  %v864_v2 = vadd.f32 %v1346_v12, %v1879_v4  ;;  %v940_v36 = vadd.f32 %v1395_v17, %v843_v44 }
 0x114   : > { %v1348_v50 = vpop.f32.mrf.mxu0 }
 0x115   : > { %v1864_v51 = vpop.f32.mrf.mxu1 }
 0x116   : > { %v1350_v52 = vpop.f32.mrf.mxu0 }
 0x117   : > { %v1414_v53 = vpop.f32.mrf.mxu1 }
 0x118   : > { %v1351_v54 = vpop.f32.mrf.mxu0 }
 0x119   : > { %v1415_v55 = vpop.f32.mrf.mxu1  ;;  %v1352_v8 = vadd.f32 %v1351_v54, %v1350_v52  ;;  %v1349_v52 = vadd.f32 %v1348_v50, %v1347_v48 }
 0x11a   : > { %v1353_v56 = vpop.f32.mrf.mxu0  ;;  %v1416_v13 = vadd.f32 %v1415_v55, %v1414_v53  ;;  %v961_v53 = vadd.f32 %v1410_v21, %v864_v2  ;;  %v856_v55 = vadd.f32 %v1340_v19, %v1879_v4  ;;  %v1973_v19 = vld [vmem:[#allocation2_spill] sm:$0xff] }
 0x11b   : > { %v1417_v57 = vpop.f32.mrf.mxu1  ;;  %v872_v20 = vadd.f32 %v1352_v8, %v1879_v4  ;;  %v867_v25 = vadd.f32 %v1349_v52, %v1879_v4  ;;  %v1413_v8 = vadd.f32 %v1864_v51, %v1862_v49 }
 0x11c   : > { %v1354_v58 = vpop.f32.mrf.mxu0 }
 0x11d   : > { %v1418_v59 = vpop.f32.mrf.mxu1  ;;  %v1355_v22 = vadd.f32 %v1354_v58, %v1353_v56  ;;  %v937_v58 = vadd.f32 %v1392_v26, %v840_v33  ;;  %v969_v48 = vadd.f32 %v1416_v13, %v872_v20  ;;  %v964_v51 = vadd.f32 %v1413_v8, %v867_v25 }
 0x11e   : > { %v1356_v60 = vpop.f32.mrf.mxu0  ;;  %v1419_v38 = vadd.f32 %v1418_v59, %v1417_v57 }
 0x11f   : > { %v1866_v61 = vpop.f32.mrf.mxu1  ;;  %v875_v23 = vadd.f32 %v1355_v22, %v1879_v4 }
 0x120   : > { %v1357_v62 = vpop.f32.mrf.mxu0 }
 0x121   : > { %v1868_v63 = vpop.f32.mrf.mxu1  ;;  %v1358_v45 = vadd.f32 %v1357_v62, %v1356_v60  ;;  %v972_v62 = vadd.f32 %v1419_v38, %v875_v23 }
 0x122   : > { %v1870_v0 = vpop.f32.mrf.mxu0  ;;  %v1422_v44 = vadd.f32 %v1868_v63, %v1866_v61 }
 0x123   : > { %v1872_v1 = vpop.f32.mrf.mxu1 }
 0x124   : > { %1971 = vst [vmem:[#allocation5_spill] sm:$0xff] %v1872_v1  ;;  %v1874_v3 = vpop.f32.mrf.mxu0  ;;  %v835_v1 = vadd.f32 %v1325_v5, %v1879_v4  ;;  %v929_v5 = vadd.f32 %v1386_v16, %v832_v35  ;;  %v848_v35 = vadd.f32 %v1334_v46, %v1879_v4  ;;  %v880_v16 = vadd.f32 %v1358_v45, %v1879_v4 }
 0x125   : > { %v1881_v7 = vpop.f32.mrf.mxu1 }
 0x126   : > { %v1362_v9 = vpop.f32.mrf.mxu0  ;;  %v932_v6 = vadd.f32 %v1389_v18, %v835_v1  ;;  %v1343_v1 = vadd.f32 %v1858_v42, %v1854_v40  ;;  %v1404_v40 = vadd.f32 %v1852_v39, %v1850_v37  ;;  %v1361_v18 = vadd.f32 %v1874_v3, %v1870_v0 }
 0x127   : > { %v1883_v11 = vpop.f32.mrf.mxu1  ;;  %v977_v17 = vadd.f32 %v1422_v44, %v880_v16 }
 0x128   : > { %v1363_v14 = vpop.f32.mrf.mxu0  ;;  %v953_v26 = vadd.f32 %v1404_v40, %v856_v55 }
 0x129   : > { %v1427_v43 = vpop.f32.mrf.mxu1  ;;  %v1364_v28 = vadd.f32 %v1363_v14, %v1362_v9  ;;  %v1337_v14 = vadd.f32 %v1846_v34, %v1842_v32  ;;  %v1398_v32 = vadd.f32 %v1840_v31, %v1838_v29  ;;  %v859_v34 = vadd.f32 %v1343_v1, %v1879_v4  ;;  %v1972_v29 = vld [vmem:[#allocation4_spill] sm:$0xff] }
 0x12a   : > { %v1365_v24 = vpop.f32.mrf.mxu0  ;;  %v1428_v20 = vadd.f32 %v1427_v43, %v1883_v11  ;;  %v1407_v31 = vadd.f32 %v1972_v29, %v1856_v41 }
 0x12b   : > { %v1896_v54 = vpop.f32.mrf.mxu1  ;;  %v888_v12 = vadd.f32 %v1364_v28, %v1879_v4  ;;  %v851_v46 = vadd.f32 %v1337_v14, %v1879_v4  ;;  %v945_v13 = vadd.f32 %v1398_v32, %v848_v35  ;;  %v1975_v28 = vld [vmem:[#allocation5_spill] sm:$0xff] }
 0x12c   : > { %v1366_v15 = vpop.f32.mrf.mxu0  ;;  %v956_v23 = vadd.f32 %v1407_v31, %v859_v34 }
 0x12d   : > { %v1430_v56 = vpop.f32.mrf.mxu1  ;;  %v1367_v57 = vadd.f32 %v1366_v15, %v1365_v24  ;;  %v985_v11 = vadd.f32 %v1428_v20, %v888_v12  ;;  %v883_v15 = vadd.f32 %v1361_v18, %v1879_v4 }
 0x12e   : > { %v1454_v30 = vpop.f32.mrf.mxu0  ;;  %v1431_v61 = vadd.f32 %v1430_v56, %v1896_v54 }
 0x12f   : > { %v1034_v27 = vadd.f32 %v1454_v30, %v937_v58  ;;  %v1462_v33 = vpop.f32.mrf.mxu1  ;;  %v891_v0 = vadd.f32 %v1367_v57, %v1879_v4  ;;  %v1974_v58 = vld [vmem:[#allocation3_spill] sm:$0xff]  ;;  %v1425_v30 = vadd.f32 %v1881_v7, %v1975_v28 }
 0x130   : > { %v1066_v47 = vadd.f32 %v1462_v33, %v969_v48  ;;  %v1025_v50 = vpop.f32.mrf.mxu0 }
 0x131   : > { %1090 = vst [vmem:[%s1906_s23 + $0x10] sm:$0xff] %v1034_v27  ;;  %v1026_v9 = vadd.f32 %v1025_v50, %v929_v5  ;;  %v1057_v10 = vpop.f32.mrf.mxu1  ;;  %v988_v56 = vadd.f32 %v1431_v61, %v891_v0 }
 0x132   : > { %1098 = vst [vmem:[%s1906_s23 + $0x50] sm:$0xff] %v1066_v47  ;;  %v1058_v59 = vadd.f32 %v1057_v10, %v961_v53  ;;  %v1455_v60 = vpop.f32.mrf.mxu0 }
 0x133   : > { %1088 = vst [vmem:[%s1906_s23] sm:$0xff] %v1026_v9  ;;  %v1037_v42 = vadd.f32 %v1455_v60, %v940_v36  ;;  %v1463_v49 = vpop.f32.mrf.mxu1  ;;  %v980_v36 = vadd.f32 %v1425_v30, %v883_v15 }
 0x134   : > { %1096 = vst [vmem:[%s1906_s23 + $0x40] sm:$0xff] %v1058_v59  ;;  %v1069_v22 = vadd.f32 %v1463_v49, %v972_v62  ;;  %v1028_v24 = vpop.f32.mrf.mxu0 }
 0x135   : > { %1091 = vst [vmem:[%s1906_s23 + $0x18] sm:$0xff] %v1037_v42  ;;  %v1029_v37 = vadd.f32 %v1028_v24, %v932_v6  ;;  %v1060_v39 = vpop.f32.mrf.mxu1  ;;  %v1401_v6 = vadd.f32 %v1974_v58, %v1973_v19 }
 0x136   : > { %1099 = vst [vmem:[%s1906_s23 + $0x58] sm:$0xff] %v1069_v22  ;;  %v1061_v43 = vadd.f32 %v1060_v39, %v964_v51  ;;  %v1458_v3 = vpop.f32.mrf.mxu0 }
 0x137   : > { %1089 = vst [vmem:[%s1906_s23 + $0x8] sm:$0xff] %v1029_v37  ;;  %v1050_v52 = vadd.f32 %v1458_v3, %v953_v26  ;;  %v1466_v2 = vpop.f32.mrf.mxu1  ;;  %v948_v25 = vadd.f32 %v1401_v6, %v851_v46 }
 0x138   : > { %1097 = vst [vmem:[%s1906_s23 + $0x48] sm:$0xff] %v1061_v43  ;;  %v1082_v63 = vadd.f32 %v1466_v2, %v985_v11  ;;  %v1041_v5 = vpop.f32.mrf.mxu0 }
 0x139   : > { %1094 = vst [vmem:[%s1906_s23 + $0x30] sm:$0xff] %v1050_v52  ;;  %v1042_v41 = vadd.f32 %v1041_v5, %v945_v13  ;;  %v1073_v21 = vpop.f32.mrf.mxu1 }
 0x13a   : > { %1102 = vst [vmem:[%s1906_s23 + $0x70] sm:$0xff] %v1082_v63  ;;  %v1074_v4 = vadd.f32 %v1073_v21, %v977_v17  ;;  %v1459_v54 = vpop.f32.mrf.mxu0 }
 0x13b   : > { %1092 = vst [vmem:[%s1906_s23 + $0x20] sm:$0xff] %v1042_v41  ;;  %v1053_v48 = vadd.f32 %v1459_v54, %v956_v23  ;;  %v1467_v35 = vpop.f32.mrf.mxu1 }
 0x13c   : > { %1100 = vst [vmem:[%s1906_s23 + $0x60] sm:$0xff] %v1074_v4  ;;  %v1085_v27 = vadd.f32 %v1467_v35, %v988_v56  ;;  %v1044_v33 = vpop.f32.mrf.mxu0 }
 0x13d   : > { %1095 = vst [vmem:[%s1906_s23 + $0x38] sm:$0xff] %v1053_v48  ;;  %v1045_v38 = vadd.f32 %v1044_v33, %v948_v25  ;;  %v1076_v45 = vpop.f32.mrf.mxu1 }
 0x13e   : > { %1103 = vst [vmem:[%s1906_s23 + $0x78] sm:$0xff] %v1085_v27  ;;  %v1077_v7 = vadd.f32 %v1076_v45, %v980_v36 }
 0x13f   : > { %1093 = vst [vmem:[%s1906_s23 + $0x28] sm:$0xff] %v1045_v38 }
 0x140   : > { %1101 = vst [vmem:[%s1906_s23 + $0x68] sm:$0xff] %v1077_v7 }
 0x141 PF: > { %s13_s14 = sadd.s32 1, %s1615_s14   ;;  %s1976_s12 = smov %s1611_s13 }
 0x142   : > { %p10_p5 = scmp.ge.s32.totalorder %s13_s14, 6   ;;  %s1977_s13 = smov %s1979_s15 }
 0x144   :  { %12 = sbr.rel (!%p10_p5) target bundleno = 2 (0x2), region = 68 }

// kernel: inception_a_forward.5
= control target key start
LH: loop header
LB: loop body
LE: loop exit
PB: predicated region body
PF: predicated region fallthrough
CT: control target
= control target key end

     0   :  { %8 = vsyncpa [#allocation3], 0  ;;  %s6563_s0 = inlined_call_operand.vmem [shape: bf16[512,2072], index: 0, kind: input, shape index: {}]   ;;  %s6564_s1 = inlined_call_operand.vmem [shape: bf16[2072,256], index: 1, kind: input, shape index: {}]   ;;  %s6565_s2 = inlined_call_operand.vmem [shape: f32[1,256], index: 2, kind: input, shape index: {}]   ;;  %s6566_s3 = inlined_call_operand.hbm [shape: f32[512,256], index: 3, kind: output, shape index: {}]  }
   0x1   :  { %10 = vsyncpa [#allocation3 + $0x1], 0  ;;  %s4997_s12 = smov 0   ;;  %s4999_s13 = smov 0  }
   0x2   :  { %s5001_s14 = smov 0   ;;  %s5003_s15 = smov 0  }
   0x3   :  { %s5005_s16 = smov 0   ;;  %s5007_s17 = smov 0  }
   0x4 LB: > { %s3820_s18 = sadd.s32 4294967295, %s4971_s17   ;;  %s3821_s19 = sadd.s32 4294967294, %s4971_s17   ;;  %s4971_s17 = sphi %s5007_s17, %s16_s17   ;;  %s4967_s16 = sphi %s5005_s16, %s6651_s16   ;;  %s4963_s15 = sphi %s5003_s15, %s6650_s15   ;;  %s4959_s14 = sphi %s5001_s14, %s6649_s14   ;;  %s4955_s13 = sphi %s4999_s13, %s6648_s13   ;;  %s4951_s12 = sphi %s4997_s12, %s6647_s12  }
   0x5   : > { %s28_s20 = sadd.s32 1, %s4967_s16  ;;  %s115_s21 = sadd.s32 1, %s4959_s14 }
   0x6   : > { %p30_p0 = scmp.ge.s32.totalorder %s28_s20, 4  ;;  %p125_p1 = scmp.ne.s32.totalorder %s4959_s14, %s4955_s13 }
   0x7   : > { %p126_p2 = scmp.eq.s32.totalorder %s3820_s18, 3  ;;  %p131_p3 = scmp.ne.s32.totalorder %s4955_s13, %s4951_s12 }
   0x8   : > { %s6653_s20 = smov (%p30_p0, %s28_s20), 0  ;;  %p132_p5 = scmp.eq.s32.totalorder %s3821_s19, 3 }
   0x9   : > { %p5037_p4 = por %p126_p2, %p125_p1  ;;  %s110_s23 = ssub.s32 %s4967_s16, %s6653_s20 }
   0xa   : > { %p3826_p6 = scmp.ge.s32.totalorder %s4971_s17, 1  ;;  %p113_p7 = scmp.eq.s32.totalorder %s110_s23, 0 }
   0xb   : > { %p5044_p8 = por %p132_p5, %p131_p3  ;;  %p177_p9 = scmp.lt.s32.totalorder %s4971_s17, 5 }
   0xc   : > { %s5050_s25 = scalar_select %p113_p7, %s4959_s14, %s115_s21  }
   0xd   : > { %p178_p10 = pnand %p3826_p6, %p177_p9 }
   0xf   : > { %181 = sbr.rel (%p178_p10) target bundleno = 581 (0x245), region = 32 }
  0x14   : > { %v4306_v0 = vld [vmem:[%s6564_s1 + $0x74] ss:$8 sps:$4 sm:$0xff]   ;;  %v4310_v2 = vld [vmem:[%s6564_s1 + $0x70] ss:$8 sps:$4 sm:$0xff]   ;;  %v4312_v4 = vld [vmem:[%s6564_s1 + $0x64] ss:$8 sps:$4 sm:$0xff]  }
  0x15   : > { %v4308_v1 = vld [vmem:[%s6564_s1 + $0x174] ss:$8 sps:$4 sm:$0xff]   ;;  %2654 = vmatprep.subr.bf16.mxu0 %v4306_v0  ;;  %v4311_v3 = vld [vmem:[%s6564_s1 + $0x170] ss:$8 sps:$4 sm:$0xff]   ;;  %v4314_v5 = vld [vmem:[%s6564_s1 + $0x164] ss:$8 sps:$4 sm:$0xff]  }
  0x16   : > { %2767 = vmatprep.subr.bf16.mxu1 %v4308_v1  ;;  %2655 = vmatpush1.bf16.msra.mxu0 %v4310_v2  ;;  %v4316_v6 = vld [vmem:[%s6564_s1 + $0x60] ss:$8 sps:$4 sm:$0xff]   ;;  %v4318_v8 = vld [vmem:[%s6564_s1 + $0x54] ss:$8 sps:$4 sm:$0xff]   ;;  %v4322_v10 = vld [vmem:[%s6564_s1 + $0x50] ss:$8 sps:$4 sm:$0xff]  }
  0x17   : > { %2768 = vmatpush1.bf16.msra.mxu1 %v4311_v3  ;;  %2656 = vmatprep.subr.bf16.mxu0 %v4312_v4  ;;  %v4317_v7 = vld [vmem:[%s6564_s1 + $0x160] ss:$8 sps:$4 sm:$0xff]   ;;  %v4320_v9 = vld [vmem:[%s6564_s1 + $0x154] ss:$8 sps:$4 sm:$0xff]   ;;  %v4323_v11 = vld [vmem:[%s6564_s1 + $0x150] ss:$8 sps:$4 sm:$0xff]  }
  0x18   : > { %2769 = vmatprep.subr.bf16.mxu1 %v4314_v5  ;;  %v4324_v12 = vld [vmem:[%s6564_s1 + $0x44] ss:$8 sps:$4 sm:$0xff]   ;;  %v4328_v14 = vld [vmem:[%s6564_s1 + $0x40] ss:$8 sps:$4 sm:$0xff]   ;;  %v4330_v16 = vld [vmem:[%s6564_s1 + $0x34] ss:$8 sps:$4 sm:$0xff]  }
  0x19   : > { %v4326_v13 = vld [vmem:[%s6564_s1 + $0x144] ss:$8 sps:$4 sm:$0xff]   ;;  %v4329_v15 = vld [vmem:[%s6564_s1 + $0x140] ss:$8 sps:$4 sm:$0xff]   ;;  %v4332_v17 = vld [vmem:[%s6564_s1 + $0x134] ss:$8 sps:$4 sm:$0xff]  }
  0x1a   : > { %2657 = vmatpush1.bf16.msra.mxu0 %v4316_v6  ;;  %v4334_v18 = vld [vmem:[%s6564_s1 + $0x30] ss:$8 sps:$4 sm:$0xff]   ;;  %v4336_v20 = vld [vmem:[%s6564_s1 + $0x24] ss:$8 sps:$4 sm:$0xff]   ;;  %v4340_v22 = vld [vmem:[%s6564_s1 + $0x20] ss:$8 sps:$4 sm:$0xff]  }
  0x1b   : > { %2770 = vmatpush1.bf16.msra.mxu1 %v4317_v7  ;;  %2658 = vmatprep.subr.bf16.mxu0 %v4318_v8  ;;  %v4335_v19 = vld [vmem:[%s6564_s1 + $0x130] ss:$8 sps:$4 sm:$0xff]   ;;  %v4338_v21 = vld [vmem:[%s6564_s1 + $0x124] ss:$8 sps:$4 sm:$0xff]   ;;  %v4341_v23 = vld [vmem:[%s6564_s1 + $0x120] ss:$8 sps:$4 sm:$0xff]  }
  0x1c   : > { %2771 = vmatprep.subr.bf16.mxu1 %v4320_v9  ;;  %v4342_v24 = vld [vmem:[%s6564_s1 + $0x14] ss:$8 sps:$4 sm:$0xff]   ;;  %v4346_v26 = vld [vmem:[%s6564_s1 + $0x10] ss:$8 sps:$4 sm:$0xff]   ;;  %v4348_v28 = vld [vmem:[%s6564_s1 + $0x4] ss:$8 sps:$4 sm:$0xff]  }
  0x1d   : > { %v4344_v25 = vld [vmem:[%s6564_s1 + $0x114] ss:$8 sps:$4 sm:$0xff]   ;;  %v4347_v27 = vld [vmem:[%s6564_s1 + $0x110] ss:$8 sps:$4 sm:$0xff]   ;;  %v4350_v29 = vld [vmem:[%s6564_s1 + $0x104] ss:$8 sps:$4 sm:$0xff]  }
  0x1e   : > { %2659 = vmatpush1.bf16.msra.mxu0 %v4322_v10  ;;  %s3828_s8 = sshll.u32 %s4963_s15, 4  ;;  %v4352_v30 = vld [vmem:[%s6564_s1] ss:$8 sps:$4 sm:$0xff]   ;;  %v4354_v32 = vld [vmem:[%s6564_s1 + $0xf4] ss:$8 sps:$4 sm:$0xff]   ;;  %vm2647_vm0 = vcmask 1043456  }
  0x1f   : > { %2772 = vmatpush1.bf16.msra.mxu1 %v4323_v11  ;;  %2660 = vmatprep.subr.bf16.mxu0 %v4324_v12  ;;  %v4353_v31 = vld [vmem:[%s6564_s1 + $0x100] ss:$8 sps:$4 sm:$0xff]   ;;  %p212_p11 = scmp.lt.s32.totalorder %s3828_s8, 63  ;;  %v4356_v33 = vld [vmem:[%s6564_s1 + $0x1f4] ss:$8 sps:$4 sm:$0xff]   ;;  %vm2622_vm1 = vcmask 195584  }
  0x20   : > { %2773 = vmatprep.subr.bf16.mxu1 %v4326_v13  ;;  %v4358_v34 = vld [vmem:[%s6564_s1 + $0xf0] ss:$8 sps:$4 sm:$0xff]   ;;  %v4360_v36 = vld [vmem:[%s6564_s1 + $0xe4] ss:$8 sps:$4 sm:$0xff]   ;;  %v4364_v38 = vld [vmem:[%s6564_s1 + $0xe0] ss:$8 sps:$4 sm:$0xff]  }
  0x21   : > { %v4359_v35 = vld [vmem:[%s6564_s1 + $0x1f0] ss:$8 sps:$4 sm:$0xff]   ;;  %s6655_s8 = smov (!%p212_p11, %s3828_s8), 63  ;;  %v4362_v37 = vld [vmem:[%s6564_s1 + $0x1e4] ss:$8 sps:$4 sm:$0xff]   ;;  %s4242_s10 = sshll.u32 %s4963_s15, 12 }
  0x22   : > { %2661 = vmatpush1.bf16.msra.mxu0 %v4328_v14  ;;  %v4365_v39 = vld [vmem:[%s6564_s1 + $0x1e0] ss:$8 sps:$4 sm:$0xff]   ;;  %v4366_v40 = vld [vmem:[%s6564_s1 + $0xd4] ss:$8 sps:$4 sm:$0xff]   ;;  %s4247_s23 = smul.u32 68, %s6655_s8  ;;  %s6508_s15 = scalar_lea.hbm %s6566_s3, %s4242_s10 }
  0x23   : > { %2774 = vmatpush1.bf16.msra.mxu1 %v4329_v15  ;;  %2662 = vmatprep.subr.bf16.mxu0 %v4330_v16  ;;  %v4368_v41 = vld [vmem:[%s6564_s1 + $0x1d4] ss:$8 sps:$4 sm:$0xff]   ;;  %v4370_v42 = vld [vmem:[%s6564_s1 + $0xd0] ss:$8 sps:$4 sm:$0xff]   ;;  %v4372_v44 = vld [vmem:[%s6564_s1 + $0xc4] ss:$8 sps:$4 sm:$0xff]  }
  0x24   : > { %2775 = vmatprep.subr.bf16.mxu1 %v4332_v17  ;;  %v4371_v43 = vld [vmem:[%s6564_s1 + $0x1d0] ss:$8 sps:$4 sm:$0xff]   ;;  %s5191_s9 = scalar_lea.vmem %s6563_s0, %s4247_s23  ;;  %v4374_v45 = vld [vmem:[%s6564_s1 + $0x1c4] ss:$8 sps:$4 sm:$0xff]   ;;  %v4376_v46 = vld [vmem:[%s6564_s1 + $0xc0] ss:$8 sps:$4 sm:$0xff]  }
  0x25   : > { %v4377_v47 = vld [vmem:[%s6564_s1 + $0x1c0] ss:$8 sps:$4 sm:$0xff]   ;;  %v4378_v48 = vld [vmem:[%s6564_s1 + $0xb4] ss:$8 sps:$4 sm:$0xff]   ;;  %v4407_v51 = vld [vmem:[%s5191_s9 + $0xc] ss:$68 sps:$4 sm:$0xff]  }
  0x26   : > { %2663 = vmatpush1.bf16.msra.mxu0 %v4334_v18  ;;  %v4404_v49 = vld [vmem:[%s5191_s9 + $0x4] ss:$68 sps:$4 sm:$0xff]   ;;  %v4380_v50 = vld [vmem:[%s6564_s1 + $0x1b4] ss:$8 sps:$4 sm:$0xff]   ;;  %v4382_v52 = vld [vmem:[%s6564_s1 + $0xb0] ss:$8 sps:$4 sm:$0xff]   ;;  %2799 = vmatprep.mubr.bf16.mxu1 %v4407_v51 }
  0x27   : > { %2776 = vmatpush1.bf16.msra.mxu1 %v4335_v19  ;;  %2664 = vmatprep.subr.bf16.mxu0 %v4336_v20  ;;  %v4383_v53 = vld [vmem:[%s6564_s1 + $0x1b0] ss:$8 sps:$4 sm:$0xff]   ;;  %v4384_v54 = vld [vmem:[%s6564_s1 + $0xa4] ss:$8 sps:$4 sm:$0xff]   ;;  %v4388_v56 = vld [vmem:[%s6564_s1 + $0xa0] ss:$8 sps:$4 sm:$0xff]  }
  0x28   : > { %2777 = vmatprep.subr.bf16.mxu1 %v4338_v21  ;;  %2686 = vmatprep.mubr.bf16.mxu0 %v4404_v49  ;;  %v4386_v55 = vld [vmem:[%s6564_s1 + $0x1a4] ss:$8 sps:$4 sm:$0xff]   ;;  %v4389_v57 = vld [vmem:[%s6564_s1 + $0x1a0] ss:$8 sps:$4 sm:$0xff]   ;;  %v4390_v58 = vld [vmem:[%s6564_s1 + $0x94] ss:$8 sps:$4 sm:$0xff]  }
  0x29   : > { %v4392_v59 = vld [vmem:[%s6564_s1 + $0x194] ss:$8 sps:$4 sm:$0xff]   ;;  %v4394_v60 = vld [vmem:[%s6564_s1 + $0x90] ss:$8 sps:$4 sm:$0xff]   ;;  %v4396_v62 = vld [vmem:[%s6564_s1 + $0x84] ss:$8 sps:$4 sm:$0xff]  }
  0x2a   : > { %2665 = vmatpush1.bf16.msra.mxu0 %v4340_v22  ;;  %v4395_v61 = vld [vmem:[%s6564_s1 + $0x190] ss:$8 sps:$4 sm:$0xff]   ;;  %v4398_v63 = vld [vmem:[%s6564_s1 + $0x184] ss:$8 sps:$4 sm:$0xff]   ;;  %v4400_v0 = vld [vmem:[%s6564_s1 + $0x80] ss:$8 sps:$4 sm:$0xff]  }
  0x2b   : > { %2778 = vmatpush1.bf16.msra.mxu1 %v4341_v23  ;;  %2666 = vmatprep.subr.bf16.mxu0 %v4342_v24  ;;  %v4401_v1 = vld [vmem:[%s6564_s1 + $0x180] ss:$8 sps:$4 sm:$0xff]   ;;  %v4410_v2 = vld [vmem:[%s6564_s1 + $0x274] ss:$8 sps:$4 sm:$0xff]   ;;  %v4408_v6 = vld [vmem:[%s6564_s1 + $0x270] ss:$8 sps:$4 sm:$0xff]  }
  0x2c   : > { %2779 = vmatprep.subr.bf16.mxu1 %v4344_v25  ;;  %v4413_v3 = vld [vmem:[%s6564_s1 + $0x374] ss:$8 sps:$4 sm:$0xff]   ;;  %v4402_v4 = vld [vmem:[%s5191_s9] ss:$68 sps:$4 sm:$0xff]   ;;  %v4405_v5 = vld [vmem:[%s5191_s9 + $0x8] ss:$68 sps:$4 sm:$0xff]  }
  0x2d   : > { %v4411_v7 = vld [vmem:[%s6564_s1 + $0x370] ss:$8 sps:$4 sm:$0xff]   ;;  %v4416_v8 = vld [vmem:[%s6564_s1 + $0x264] ss:$8 sps:$4 sm:$0xff]   ;;  %v4414_v12 = vld [vmem:[%s6564_s1 + $0x260] ss:$8 sps:$4 sm:$0xff]  }
  0x2e   : > { %2667 = vmatpush1.bf16.msra.mxu0 %v4346_v26  ;;  %v4419_v9 = vld [vmem:[%s6564_s1 + $0x364] ss:$8 sps:$4 sm:$0xff]   ;;  %v4422_v11 = vld [vmem:[%s5191_s9 + $0x94] ss:$68 sps:$4 sm:$0xff]   ;;  %v4417_v13 = vld [vmem:[%s6564_s1 + $0x360] ss:$8 sps:$4 sm:$0xff]  }
  0x2f   : > { %2780 = vmatpush1.bf16.msra.mxu1 %v4347_v27  ;;  %2668 = vmatprep.subr.bf16.mxu0 %v4348_v28  ;;  %v4420_v10 = vld [vmem:[%s5191_s9 + $0x8c] ss:$68 sps:$4 sm:$0xff]   ;;  %v4428_v14 = vld [vmem:[%s6564_s1 + $0x254] ss:$8 sps:$4 sm:$0xff]   ;;  %v4432_v24 = vld [vmem:[%s6564_s1 + $0x240] ss:$8 sps:$4 sm:$0xff]  }
  0x30   : > { %2781 = vmatprep.subr.bf16.mxu1 %v4350_v29  ;;  %v4431_v15 = vld [vmem:[%s6564_s1 + $0x354] ss:$8 sps:$4 sm:$0xff]   ;;  %v4424_v16 = vld [vmem:[%s5191_s9 + $0x88] ss:$68 sps:$4 sm:$0xff]   ;;  %v4426_v18 = vld [vmem:[%s6564_s1 + $0x250] ss:$8 sps:$4 sm:$0xff]  }
  0x31   : > { %v4425_v17 = vld [vmem:[%s5191_s9 + $0x90] ss:$68 sps:$4 sm:$0xff]   ;;  %v4434_v20 = vld [vmem:[%s6564_s1 + $0x244] ss:$8 sps:$4 sm:$0xff]   ;;  %v4440_v23 = vld [vmem:[%s5191_s9 + $0x11c] ss:$68 sps:$4 sm:$0xff]  }
  0x32   : > { %2669 = vmatpush1.bf16.msra.mxu0 %v4352_v30  ;;  %v4429_v19 = vld [vmem:[%s6564_s1 + $0x350] ss:$8 sps:$4 sm:$0xff]   ;;  %v4437_v21 = vld [vmem:[%s6564_s1 + $0x344] ss:$8 sps:$4 sm:$0xff]   ;;  %v4435_v25 = vld [vmem:[%s6564_s1 + $0x340] ss:$8 sps:$4 sm:$0xff]  }
  0x33   : > { %2782 = vmatpush1.bf16.msra.mxu1 %v4353_v31  ;;  %2670 = vmatprep.subr.bf16.mxu0 %v4354_v32  ;;  %v4438_v22 = vld [vmem:[%s5191_s9 + $0x114] ss:$68 sps:$4 sm:$0xff]   ;;  %v4452_v32 = vld [vmem:[%s6564_s1 + $0x224] ss:$8 sps:$4 sm:$0xff]   ;;  %v4471_v49 = vld [vmem:[%s6564_s1 + $0x300] ss:$8 sps:$4 sm:$0xff]  }
  0x34   : > { %2783 = vmatprep.subr.bf16.mxu1 %v4356_v33  ;;  %v4446_v26 = vld [vmem:[%s6564_s1 + $0x234] ss:$8 sps:$4 sm:$0xff]   ;;  %v4444_v30 = vld [vmem:[%s6564_s1 + $0x230] ss:$8 sps:$4 sm:$0xff]   ;;  %v4455_v33 = vld [vmem:[%s6564_s1 + $0x324] ss:$8 sps:$4 sm:$0xff]  }
  0x35   : > { %v4449_v27 = vld [vmem:[%s6564_s1 + $0x334] ss:$8 sps:$4 sm:$0xff]   ;;  %v4447_v31 = vld [vmem:[%s6564_s1 + $0x330] ss:$8 sps:$4 sm:$0xff]   ;;  %s4974_s27 = smov [#allocation2]  }
  0x36   : > { %2671 = vmatpush2.bf16.msra.mxu0 %v4358_v34  ;;  %v4442_v28 = vld [vmem:[%s5191_s9 + $0x110] ss:$68 sps:$4 sm:$0xff]   ;;  %v4443_v29 = vld [vmem:[%s5191_s9 + $0x118] ss:$68 sps:$4 sm:$0xff]   ;;  %s4899_s28 = sshll.u32 %s4974_s27, 4  ;;  %s4900_s28 = int_to_ptr.vmem [resolvable:$false] %s4899_s28 }
  0x37   : > { %2784 = vmatpush2.bf16.msra.mxu1 %v4359_v35  ;;  %2672 = vmatprep.subr.bf16.mxu0 %v4360_v36  ;;  %v4456_v34 = vld [vmem:[%s5191_s9 + $0x19c] ss:$68 sps:$4 sm:$0xff]   ;;  %v4458_v35 = vld [vmem:[%s5191_s9 + $0x1a4] ss:$68 sps:$4 sm:$0xff]   ;;  %s4901_s23 = scalar_lea.vmem %s4900_s28, 8192 }
  0x38   : > { %2785 = vmatprep.subr.bf16.mxu1 %v4362_v37  ;;  %v4450_v36 = vld [vmem:[%s6564_s1 + $0x220] ss:$8 sps:$4 sm:$0xff]   ;;  %v4485_v51 = vld [vmem:[%s6564_s1 + $0x3f4] ss:$8 sps:$4 sm:$0xff]  }
  0x39   : > { %v4453_v37 = vld [vmem:[%s6564_s1 + $0x320] ss:$8 sps:$4 sm:$0xff]  }
  0x3a   : > { %2673 = vmatpush2.bf16.msra.mxu0 %v4364_v38  ;;  %v4464_v38 = vld [vmem:[%s6564_s1 + $0x214] ss:$8 sps:$4 sm:$0xff]  }
  0x3b   : > { %2786 = vmatpush2.bf16.msra.mxu1 %v4365_v39  ;;  %2674 = vmatprep.subr.bf16.mxu0 %v4366_v40  ;;  %v4467_v39 = vld [vmem:[%s6564_s1 + $0x314] ss:$8 sps:$4 sm:$0xff]  }
  0x3c   : > { %2787 = vmatprep.subr.bf16.mxu1 %v4368_v41  ;;  %v4460_v40 = vld [vmem:[%s5191_s9 + $0x198] ss:$68 sps:$4 sm:$0xff]   ;;  %v4461_v41 = vld [vmem:[%s5191_s9 + $0x1a0] ss:$68 sps:$4 sm:$0xff]  }
  0x3e   : > { %2675 = vmatpush2.bf16.msra.mxu0 %v4370_v42  ;;  %v4462_v42 = vld [vmem:[%s6564_s1 + $0x210] ss:$8 sps:$4 sm:$0xff]  }
  0x3f   : > { %2788 = vmatpush2.bf16.msra.mxu1 %v4371_v43  ;;  %2676 = vmatprep.subr.bf16.mxu0 %v4372_v44  ;;  %v4465_v43 = vld [vmem:[%s6564_s1 + $0x310] ss:$8 sps:$4 sm:$0xff]   ;;  %v4470_v44 = vld [vmem:[%s6564_s1 + $0x204] ss:$8 sps:$4 sm:$0xff]  }
  0x40   : > { %2789 = vmatprep.subr.bf16.mxu1 %v4374_v45  ;;  %v4473_v45 = vld [vmem:[%s6564_s1 + $0x304] ss:$8 sps:$4 sm:$0xff]  }
  0x42   : > { %2677 = vmatpush2.bf16.msra.mxu0 %v4376_v46  ;;  %v4474_v46 = vld [vmem:[%s5191_s9 + $0x224] ss:$68 sps:$4 sm:$0xff]  }
  0x43   : > { %2790 = vmatpush2.bf16.msra.mxu1 %v4377_v47  ;;  %2678 = vmatprep.subr.bf16.mxu0 %v4378_v48  ;;  %v4476_v47 = vld [vmem:[%s5191_s9 + $0x22c] ss:$68 sps:$4 sm:$0xff]   ;;  %v4468_v48 = vld [vmem:[%s6564_s1 + $0x200] ss:$8 sps:$4 sm:$0xff]  }
  0x44   : > { %2791 = vmatprep.subr.bf16.mxu1 %v4380_v50  ;;  %v4482_v50 = vld [vmem:[%s6564_s1 + $0x2f4] ss:$8 sps:$4 sm:$0xff]  }
  0x46   : > { %2679 = vmatpush2.bf16.msra.mxu0 %v4382_v52  ;;  %v4478_v52 = vld [vmem:[%s5191_s9 + $0x220] ss:$68 sps:$4 sm:$0xff]  }
  0x47   : > { %2792 = vmatpush2.bf16.msra.mxu1 %v4383_v53  ;;  %2680 = vmatprep.subr.bf16.mxu0 %v4384_v54  ;;  %v4479_v53 = vld [vmem:[%s5191_s9 + $0x228] ss:$68 sps:$4 sm:$0xff]   ;;  %v4480_v54 = vld [vmem:[%s6564_s1 + $0x2f0] ss:$8 sps:$4 sm:$0xff]  }
  0x48   : > { %2793 = vmatprep.subr.bf16.mxu1 %v4386_v55  ;;  %v4483_v55 = vld [vmem:[%s6564_s1 + $0x3f0] ss:$8 sps:$4 sm:$0xff]  }
  0x4a   : > { %2681 = vmatpush2.bf16.msra.mxu0 %v4388_v56  ;;  %v4488_v56 = vld [vmem:[%s6564_s1 + $0x2e4] ss:$8 sps:$4 sm:$0xff]  }
  0x4b   : > { %2794 = vmatpush2.bf16.msra.mxu1 %v4389_v57  ;;  %2682 = vmatprep.subr.bf16.mxu0 %v4390_v58  ;;  %v4491_v57 = vld [vmem:[%s6564_s1 + $0x3e4] ss:$8 sps:$4 sm:$0xff]  }
  0x4c   : > { %2795 = vmatprep.subr.bf16.mxu1 %v4392_v59  ;;  %v4492_v58 = vld [vmem:[%s5191_s9 + $0x2ac] ss:$68 sps:$4 sm:$0xff]   ;;  %v4494_v59 = vld [vmem:[%s5191_s9 + $0x2b4] ss:$68 sps:$4 sm:$0xff]  }
  0x4e   : > { %2683 = vmatpush2.bf16.msra.mxu0 %v4394_v60  ;;  %v4486_v60 = vld [vmem:[%s6564_s1 + $0x2e0] ss:$8 sps:$4 sm:$0xff]  }
  0x4f   : > { %2796 = vmatpush2.bf16.msra.mxu1 %v4395_v61  ;;  %2684 = vmatprep.subr.bf16.mxu0 %v4396_v62  ;;  %v4489_v61 = vld [vmem:[%s6564_s1 + $0x3e0] ss:$8 sps:$4 sm:$0xff]   ;;  %v4500_v62 = vld [vmem:[%s6564_s1 + $0x2d4] ss:$8 sps:$4 sm:$0xff]  }
  0x50   : > { %2797 = vmatprep.subr.bf16.mxu1 %v4398_v63  ;;  %v4503_v63 = vld [vmem:[%s6564_s1 + $0x3d4] ss:$8 sps:$4 sm:$0xff]  }
  0x52   : > { %2685 = vmatpush2.bf16.msra.mxu0 %v4400_v0  ;;  %v4496_v0 = vld [vmem:[%s5191_s9 + $0x2a8] ss:$68 sps:$4 sm:$0xff]  }
  0x53   : > { %2798 = vmatpush2.bf16.msra.mxu1 %v4401_v1  ;;  %2880 = vmatprep.subr.bf16.mxu0 %v4410_v2  ;;  %v4497_v1 = vld [vmem:[%s5191_s9 + $0x2b0] ss:$68 sps:$4 sm:$0xff]  }
  0x54   : > { %2993 = vmatprep.subr.bf16.mxu1 %v4413_v3  ;;  %v4498_v2 = vld [vmem:[%s6564_s1 + $0x2d0] ss:$8 sps:$4 sm:$0xff]  }
  0x55   : > { %2687 = vmatmul.mubr.bf16.vlgmr.msra.gmra.mxu0 %v4402_v4  ;;  %v4501_v3 = vld [vmem:[%s6564_s1 + $0x3d0] ss:$8 sps:$4 sm:$0xff]   ;;  %v4506_v4 = vld [vmem:[%s6564_s1 + $0x2c4] ss:$8 sps:$4 sm:$0xff]  }
  0x56   : > { %2800 = vmatmul.mubr.bf16.vlgmr.msra.gmra.mxu1 %v4405_v5  ;;  %2881 = vmatpush1.bf16.msra.mxu0 %v4408_v6  ;;  %v4509_v5 = vld [vmem:[%s6564_s1 + $0x3c4] ss:$8 sps:$4 sm:$0xff]   ;;  %v4510_v6 = vld [vmem:[%s5191_s9 + $0x334] ss:$68 sps:$4 sm:$0xff]  }
  0x57   : > { %2994 = vmatpush1.bf16.msra.mxu1 %v4411_v7  ;;  %2882 = vmatprep.subr.bf16.mxu0 %v4416_v8  ;;  %v4512_v7 = vld [vmem:[%s5191_s9 + $0x33c] ss:$68 sps:$4 sm:$0xff]  }
  0x58   : > { %2995 = vmatprep.subr.bf16.mxu1 %v4419_v9  ;;  %2696 = vmatprep.mubr.bf16.mxu0 %v4420_v10  ;;  %v4504_v8 = vld [vmem:[%s6564_s1 + $0x2c0] ss:$8 sps:$4 sm:$0xff]   ;;  %v4518_v10 = vld [vmem:[%s6564_s1 + $0x2b4] ss:$8 sps:$4 sm:$0xff]  }
  0x59   : > { %2809 = vmatprep.mubr.bf16.mxu1 %v4422_v11  ;;  %v4507_v9 = vld [vmem:[%s6564_s1 + $0x3c0] ss:$8 sps:$4 sm:$0xff]   ;;  %v4521_v11 = vld [vmem:[%s6564_s1 + $0x3b4] ss:$8 sps:$4 sm:$0xff]  }
  0x5a   : > { %2883 = vmatpush1.bf16.msra.mxu0 %v4414_v12  ;;  %v4514_v12 = vld [vmem:[%s5191_s9 + $0x330] ss:$68 sps:$4 sm:$0xff]  }
  0x5b   : > { %2996 = vmatpush1.bf16.msra.mxu1 %v4417_v13  ;;  %2884 = vmatprep.subr.bf16.mxu0 %v4428_v14  ;;  %v4515_v13 = vld [vmem:[%s5191_s9 + $0x338] ss:$68 sps:$4 sm:$0xff]  }
  0x5c   : > { %2997 = vmatprep.subr.bf16.mxu1 %v4431_v15  ;;  %v4516_v14 = vld [vmem:[%s6564_s1 + $0x2b0] ss:$8 sps:$4 sm:$0xff]  }
  0x5d   : > { %2697 = vmatmul.mubr.bf16.gmra.mxu0 %v4424_v16  ;;  %v4519_v15 = vld [vmem:[%s6564_s1 + $0x3b0] ss:$8 sps:$4 sm:$0xff]   ;;  %v4524_v16 = vld [vmem:[%s6564_s1 + $0x2a4] ss:$8 sps:$4 sm:$0xff]  }
  0x5e   : > { %2810 = vmatmul.mubr.bf16.gmra.mxu1 %v4425_v17  ;;  %2885 = vmatpush1.bf16.msra.mxu0 %v4426_v18  ;;  %v4527_v17 = vld [vmem:[%s6564_s1 + $0x3a4] ss:$8 sps:$4 sm:$0xff]   ;;  %v4528_v18 = vld [vmem:[%s5191_s9 + $0x3bc] ss:$68 sps:$4 sm:$0xff]  }
  0x5f   : > { %2998 = vmatpush1.bf16.msra.mxu1 %v4429_v19  ;;  %2886 = vmatprep.subr.bf16.mxu0 %v4434_v20  ;;  %v4530_v19 = vld [vmem:[%s5191_s9 + $0x3c4] ss:$68 sps:$4 sm:$0xff]  }
  0x60   : > { %2999 = vmatprep.subr.bf16.mxu1 %v4437_v21  ;;  %2706 = vmatprep.mubr.bf16.mxu0 %v4438_v22  ;;  %v4522_v20 = vld [vmem:[%s6564_s1 + $0x2a0] ss:$8 sps:$4 sm:$0xff]   ;;  %v4536_v22 = vld [vmem:[%s6564_s1 + $0x294] ss:$8 sps:$4 sm:$0xff]  }
  0x61   : > { %2819 = vmatprep.mubr.bf16.mxu1 %v4440_v23  ;;  %v4525_v21 = vld [vmem:[%s6564_s1 + $0x3a0] ss:$8 sps:$4 sm:$0xff]   ;;  %v4539_v23 = vld [vmem:[%s6564_s1 + $0x394] ss:$8 sps:$4 sm:$0xff]  }
  0x62   : > { %2887 = vmatpush1.bf16.msra.mxu0 %v4432_v24  ;;  %v4532_v24 = vld [vmem:[%s5191_s9 + $0x3b8] ss:$68 sps:$4 sm:$0xff]  }
  0x63   : > { %3000 = vmatpush1.bf16.msra.mxu1 %v4435_v25  ;;  %2888 = vmatprep.subr.bf16.mxu0 %v4446_v26  ;;  %v4533_v25 = vld [vmem:[%s5191_s9 + $0x3c0] ss:$68 sps:$4 sm:$0xff]   ;;  %v4534_v26 = vld [vmem:[%s6564_s1 + $0x290] ss:$8 sps:$4 sm:$0xff]  }
  0x64   : > { %3001 = vmatprep.subr.bf16.mxu1 %v4449_v27  ;;  %v4537_v27 = vld [vmem:[%s6564_s1 + $0x390] ss:$8 sps:$4 sm:$0xff]  }
  0x65   : > { %2707 = vmatmul.mubr.bf16.gmra.mxu0 %v4442_v28  ;;  %v4542_v28 = vld [vmem:[%s6564_s1 + $0x284] ss:$8 sps:$4 sm:$0xff]  }
  0x66   : > { %2820 = vmatmul.mubr.bf16.gmra.mxu1 %v4443_v29  ;;  %2889 = vmatpush1.bf16.msra.mxu0 %v4444_v30  ;;  %v4545_v29 = vld [vmem:[%s6564_s1 + $0x384] ss:$8 sps:$4 sm:$0xff]   ;;  %v4548_v30 = vld [vmem:[%s5191_s9 + $0x14] ss:$68 sps:$4 sm:$0xff]  }
  0x67   : > { %3002 = vmatpush1.bf16.msra.mxu1 %v4447_v31  ;;  %2890 = vmatprep.subr.bf16.mxu0 %v4452_v32  ;;  %v4551_v31 = vld [vmem:[%s5191_s9 + $0x1c] ss:$68 sps:$4 sm:$0xff]  }
  0x68   : > { %3003 = vmatprep.subr.bf16.mxu1 %v4455_v33  ;;  %2716 = vmatprep.mubr.bf16.mxu0 %v4456_v34  ;;  %v4540_v32 = vld [vmem:[%s6564_s1 + $0x280] ss:$8 sps:$4 sm:$0xff]   ;;  %v4554_v34 = vld [vmem:[%s6564_s1 + $0x474] ss:$8 sps:$4 sm:$0xff]  }
  0x69   : > { %2829 = vmatprep.mubr.bf16.mxu1 %v4458_v35  ;;  %v4543_v33 = vld [vmem:[%s6564_s1 + $0x380] ss:$8 sps:$4 sm:$0xff]   ;;  %v4557_v35 = vld [vmem:[%s6564_s1 + $0x574] ss:$8 sps:$4 sm:$0xff]  }
  0x6a   : > { %2891 = vmatpush1.bf16.msra.mxu0 %v4450_v36  ;;  %v4546_v36 = vld [vmem:[%s5191_s9 + $0x10] ss:$68 sps:$4 sm:$0xff]  }
  0x6b   : > { %3004 = vmatpush1.bf16.msra.mxu1 %v4453_v37  ;;  %2892 = vmatprep.subr.bf16.mxu0 %v4464_v38  ;;  %v4549_v37 = vld [vmem:[%s5191_s9 + $0x18] ss:$68 sps:$4 sm:$0xff]  }
  0x6c   : > { %3005 = vmatprep.subr.bf16.mxu1 %v4467_v39  ;;  %v4552_v38 = vld [vmem:[%s6564_s1 + $0x470] ss:$8 sps:$4 sm:$0xff]  }
  0x6d   : > { %2717 = vmatmul.mubr.bf16.gmra.mxu0 %v4460_v40  ;;  %v4555_v39 = vld [vmem:[%s6564_s1 + $0x570] ss:$8 sps:$4 sm:$0xff]   ;;  %v4560_v40 = vld [vmem:[%s6564_s1 + $0x464] ss:$8 sps:$4 sm:$0xff]  }
  0x6e   : > { %2830 = vmatmul.mubr.bf16.gmra.mxu1 %v4461_v41  ;;  %2893 = vmatpush1.bf16.msra.mxu0 %v4462_v42  ;;  %v4563_v41 = vld [vmem:[%s6564_s1 + $0x564] ss:$8 sps:$4 sm:$0xff]   ;;  %v4564_v42 = vld [vmem:[%s5191_s9 + $0x9c] ss:$68 sps:$4 sm:$0xff]  }
  0x6f   : > { %3006 = vmatpush1.bf16.msra.mxu1 %v4465_v43  ;;  %2894 = vmatprep.subr.bf16.mxu0 %v4470_v44  ;;  %v4566_v43 = vld [vmem:[%s5191_s9 + $0xa4] ss:$68 sps:$4 sm:$0xff]  }
  0x70   : > { %3007 = vmatprep.subr.bf16.mxu1 %v4473_v45  ;;  %2726 = vmatprep.mubr.bf16.mxu0 %v4474_v46  ;;  %v4558_v44 = vld [vmem:[%s6564_s1 + $0x460] ss:$8 sps:$4 sm:$0xff]   ;;  %v4572_v46 = vld [vmem:[%s6564_s1 + $0x454] ss:$8 sps:$4 sm:$0xff]  }
  0x71   : > { %2839 = vmatprep.mubr.bf16.mxu1 %v4476_v47  ;;  %v4561_v45 = vld [vmem:[%s6564_s1 + $0x560] ss:$8 sps:$4 sm:$0xff]   ;;  %v4575_v47 = vld [vmem:[%s6564_s1 + $0x554] ss:$8 sps:$4 sm:$0xff]  }
  0x72   : > { %2895 = vmatpush1.bf16.msra.mxu0 %v4468_v48  ;;  %v4568_v48 = vld [vmem:[%s5191_s9 + $0x98] ss:$68 sps:$4 sm:$0xff]  }
  0x73   : > { %3008 = vmatpush1.bf16.msra.mxu1 %v4471_v49  ;;  %2896 = vmatprep.subr.bf16.mxu0 %v4482_v50  ;;  %v4569_v49 = vld [vmem:[%s5191_s9 + $0xa0] ss:$68 sps:$4 sm:$0xff]   ;;  %v4570_v50 = vld [vmem:[%s6564_s1 + $0x450] ss:$8 sps:$4 sm:$0xff]  }
  0x74   : > { %3009 = vmatprep.subr.bf16.mxu1 %v4485_v51  ;;  %v4573_v51 = vld [vmem:[%s6564_s1 + $0x550] ss:$8 sps:$4 sm:$0xff]  }
  0x75   : > { %2727 = vmatmul.mubr.bf16.gmra.mxu0 %v4478_v52  ;;  %v4578_v52 = vld [vmem:[%s6564_s1 + $0x444] ss:$8 sps:$4 sm:$0xff]  }
  0x76   : > { %2840 = vmatmul.mubr.bf16.gmra.mxu1 %v4479_v53  ;;  %2897 = vmatpush2.bf16.msra.mxu0 %v4480_v54  ;;  %v4581_v53 = vld [vmem:[%s6564_s1 + $0x544] ss:$8 sps:$4 sm:$0xff]  }
  0x77   : > { %3010 = vmatpush2.bf16.msra.mxu1 %v4483_v55  ;;  %2898 = vmatprep.subr.bf16.mxu0 %v4488_v56  ;;  %v4582_v54 = vld [vmem:[%s5191_s9 + $0x124] ss:$68 sps:$4 sm:$0xff]   ;;  %v4584_v55 = vld [vmem:[%s5191_s9 + $0x12c] ss:$68 sps:$4 sm:$0xff]  }
  0x78   : > { %3011 = vmatprep.subr.bf16.mxu1 %v4491_v57  ;;  %2736 = vmatprep.mubr.bf16.mxu0 %v4492_v58  ;;  %v4576_v56 = vld [vmem:[%s6564_s1 + $0x440] ss:$8 sps:$4 sm:$0xff]   ;;  %v4590_v58 = vld [vmem:[%s6564_s1 + $0x434] ss:$8 sps:$4 sm:$0xff]  }
  0x79   : > { %2849 = vmatprep.mubr.bf16.mxu1 %v4494_v59  ;;  %v4579_v57 = vld [vmem:[%s6564_s1 + $0x540] ss:$8 sps:$4 sm:$0xff]   ;;  %v4593_v59 = vld [vmem:[%s6564_s1 + $0x534] ss:$8 sps:$4 sm:$0xff]  }
  0x7a   : > { %2899 = vmatpush2.bf16.msra.mxu0 %v4486_v60  ;;  %v4586_v60 = vld [vmem:[%s5191_s9 + $0x120] ss:$68 sps:$4 sm:$0xff]  }
  0x7b   : > { %3012 = vmatpush2.bf16.msra.mxu1 %v4489_v61  ;;  %2900 = vmatprep.subr.bf16.mxu0 %v4500_v62  ;;  %v4587_v61 = vld [vmem:[%s5191_s9 + $0x128] ss:$68 sps:$4 sm:$0xff]   ;;  %v4588_v62 = vld [vmem:[%s6564_s1 + $0x430] ss:$8 sps:$4 sm:$0xff]  }
  0x7c   : > { %3013 = vmatprep.subr.bf16.mxu1 %v4503_v63  ;;  %v4591_v63 = vld [vmem:[%s6564_s1 + $0x530] ss:$8 sps:$4 sm:$0xff]  }
  0x7d   : > { %2737 = vmatmul.mubr.bf16.gmra.mxu0 %v4496_v0  ;;  %v4596_v0 = vld [vmem:[%s6564_s1 + $0x424] ss:$8 sps:$4 sm:$0xff]  }
  0x7e   : > { %2850 = vmatmul.mubr.bf16.gmra.mxu1 %v4497_v1  ;;  %2901 = vmatpush2.bf16.msra.mxu0 %v4498_v2  ;;  %v4599_v1 = vld [vmem:[%s6564_s1 + $0x524] ss:$8 sps:$4 sm:$0xff]  }
  0x7f   : > { %3014 = vmatpush2.bf16.msra.mxu1 %v4501_v3  ;;  %2902 = vmatprep.subr.bf16.mxu0 %v4506_v4  ;;  %v4600_v2 = vld [vmem:[%s5191_s9 + $0x1ac] ss:$68 sps:$4 sm:$0xff]   ;;  %v4602_v3 = vld [vmem:[%s5191_s9 + $0x1b4] ss:$68 sps:$4 sm:$0xff]   ;;  %v4594_v4 = vld [vmem:[%s6564_s1 + $0x420] ss:$8 sps:$4 sm:$0xff]  }
  0x80   : > { %3015 = vmatprep.subr.bf16.mxu1 %v4509_v5  ;;  %2746 = vmatprep.mubr.bf16.mxu0 %v4510_v6  ;;  %v4597_v5 = vld [vmem:[%s6564_s1 + $0x520] ss:$8 sps:$4 sm:$0xff]   ;;  %v4608_v6 = vld [vmem:[%s6564_s1 + $0x414] ss:$8 sps:$4 sm:$0xff]  }
  0x81   : > { %2859 = vmatprep.mubr.bf16.mxu1 %v4512_v7  ;;  %v4611_v7 = vld [vmem:[%s6564_s1 + $0x514] ss:$8 sps:$4 sm:$0xff]  }
  0x82   : > { %2903 = vmatpush2.bf16.msra.mxu0 %v4504_v8  ;;  %v4604_v8 = vld [vmem:[%s5191_s9 + $0x1a8] ss:$68 sps:$4 sm:$0xff]  }
  0x83   : > { %3016 = vmatpush2.bf16.msra.mxu1 %v4507_v9  ;;  %2904 = vmatprep.subr.bf16.mxu0 %v4518_v10  ;;  %v4605_v9 = vld [vmem:[%s5191_s9 + $0x1b0] ss:$68 sps:$4 sm:$0xff]  }
  0x84   : > { %3017 = vmatprep.subr.bf16.mxu1 %v4521_v11  ;;  %v4606_v10 = vld [vmem:[%s6564_s1 + $0x410] ss:$8 sps:$4 sm:$0xff]  }
  0x85   : > { %2747 = vmatmul.mubr.bf16.gmra.mxu0 %v4514_v12  ;;  %v4609_v11 = vld [vmem:[%s6564_s1 + $0x510] ss:$8 sps:$4 sm:$0xff]   ;;  %v4614_v12 = vld [vmem:[%s6564_s1 + $0x404] ss:$8 sps:$4 sm:$0xff]  }
  0x86   : > { %2860 = vmatmul.mubr.bf16.gmra.mxu1 %v4515_v13  ;;  %2905 = vmatpush2.bf16.msra.mxu0 %v4516_v14  ;;  %v4617_v13 = vld [vmem:[%s6564_s1 + $0x504] ss:$8 sps:$4 sm:$0xff]   ;;  %v4618_v14 = vld [vmem:[%s5191_s9 + $0x234] ss:$68 sps:$4 sm:$0xff]  }
  0x87   : > { %3018 = vmatpush2.bf16.msra.mxu1 %v4519_v15  ;;  %2906 = vmatprep.subr.bf16.mxu0 %v4524_v16  ;;  %v4620_v15 = vld [vmem:[%s5191_s9 + $0x23c] ss:$68 sps:$4 sm:$0xff]  }
  0x88   : > { %3019 = vmatprep.subr.bf16.mxu1 %v4527_v17  ;;  %2756 = vmatprep.mubr.bf16.mxu0 %v4528_v18  ;;  %v4612_v16 = vld [vmem:[%s6564_s1 + $0x400] ss:$8 sps:$4 sm:$0xff]   ;;  %v4626_v18 = vld [vmem:[%s6564_s1 + $0x4f4] ss:$8 sps:$4 sm:$0xff]  }
  0x89   : > { %2869 = vmatprep.mubr.bf16.mxu1 %v4530_v19  ;;  %v4615_v17 = vld [vmem:[%s6564_s1 + $0x500] ss:$8 sps:$4 sm:$0xff]   ;;  %v4629_v19 = vld [vmem:[%s6564_s1 + $0x5f4] ss:$8 sps:$4 sm:$0xff]  }
  0x8a   : > { %2907 = vmatpush2.bf16.msra.mxu0 %v4522_v20  ;;  %v4622_v20 = vld [vmem:[%s5191_s9 + $0x230] ss:$68 sps:$4 sm:$0xff]  }
  0x8b   : > { %3020 = vmatpush2.bf16.msra.mxu1 %v4525_v21  ;;  %2908 = vmatprep.subr.bf16.mxu0 %v4536_v22  ;;  %v4623_v21 = vld [vmem:[%s5191_s9 + $0x238] ss:$68 sps:$4 sm:$0xff]  }
  0x8c   : > { %3021 = vmatprep.subr.bf16.mxu1 %v4539_v23  ;;  %v4624_v22 = vld [vmem:[%s6564_s1 + $0x4f0] ss:$8 sps:$4 sm:$0xff]  }
  0x8d   : > { %2757 = vmatmul.mubr.bf16.gmra.mxu0 %v4532_v24  ;;  %v4627_v23 = vld [vmem:[%s6564_s1 + $0x5f0] ss:$8 sps:$4 sm:$0xff]   ;;  %v4632_v24 = vld [vmem:[%s6564_s1 + $0x4e4] ss:$8 sps:$4 sm:$0xff]  }
  0x8e   : > { %2870 = vmatmul.mubr.bf16.gmra.mxu1 %v4533_v25  ;;  %2909 = vmatpush2.bf16.msra.mxu0 %v4534_v26  ;;  %v4635_v25 = vld [vmem:[%s6564_s1 + $0x5e4] ss:$8 sps:$4 sm:$0xff]   ;;  %v4636_v26 = vld [vmem:[%s5191_s9 + $0x2bc] ss:$68 sps:$4 sm:$0xff]  }
  0x8f   : > { %3022 = vmatpush2.bf16.msra.mxu1 %v4537_v27  ;;  %2910 = vmatprep.subr.bf16.mxu0 %v4542_v28  ;;  %v4638_v27 = vld [vmem:[%s5191_s9 + $0x2c4] ss:$68 sps:$4 sm:$0xff]  }
  0x90   : > { %3023 = vmatprep.subr.bf16.mxu1 %v4545_v29  ;;  %2912 = vmatprep.mubr.bf16.mxu0 %v4548_v30  ;;  %v4630_v28 = vld [vmem:[%s6564_s1 + $0x4e0] ss:$8 sps:$4 sm:$0xff]   ;;  %v4644_v30 = vld [vmem:[%s6564_s1 + $0x4d4] ss:$8 sps:$4 sm:$0xff]  }
  0x91   : > { %3025 = vmatprep.mubr.bf16.mxu1 %v4551_v31  ;;  %v4633_v29 = vld [vmem:[%s6564_s1 + $0x5e0] ss:$8 sps:$4 sm:$0xff]   ;;  %v4647_v31 = vld [vmem:[%s6564_s1 + $0x5d4] ss:$8 sps:$4 sm:$0xff]  }
  0x92   : > { %2911 = vmatpush2.bf16.msra.mxu0 %v4540_v32  ;;  %v4640_v32 = vld [vmem:[%s5191_s9 + $0x2b8] ss:$68 sps:$4 sm:$0xff]  }
  0x93   : > { %3024 = vmatpush2.bf16.msra.mxu1 %v4543_v33  ;;  %3106 = vmatprep.subr.bf16.mxu0 %v4554_v34  ;;  %v4641_v33 = vld [vmem:[%s5191_s9 + $0x2c0] ss:$68 sps:$4 sm:$0xff]   ;;  %v4642_v34 = vld [vmem:[%s6564_s1 + $0x4d0] ss:$8 sps:$4 sm:$0xff]  }
  0x94   : > { %3219 = vmatprep.subr.bf16.mxu1 %v4557_v35  ;;  %v4645_v35 = vld [vmem:[%s6564_s1 + $0x5d0] ss:$8 sps:$4 sm:$0xff]  }
  0x95   : > { %2913 = vmatmul.mubr.bf16.vlgmr.msra.gmra.mxu0 %v4546_v36  ;;  %v4650_v36 = vld [vmem:[%s6564_s1 + $0x4c4] ss:$8 sps:$4 sm:$0xff]  }
  0x96   : > { %3026 = vmatmul.mubr.bf16.vlgmr.msra.gmra.mxu1 %v4549_v37  ;;  %3107 = vmatpush1.bf16.msra.mxu0 %v4552_v38  ;;  %v4653_v37 = vld [vmem:[%s6564_s1 + $0x5c4] ss:$8 sps:$4 sm:$0xff]  }
  0x97   : > { %3220 = vmatpush1.bf16.msra.mxu1 %v4555_v39  ;;  %3108 = vmatprep.subr.bf16.mxu0 %v4560_v40  ;;  %v4654_v38 = vld [vmem:[%s5191_s9 + $0x344] ss:$68 sps:$4 sm:$0xff]   ;;  %v4656_v39 = vld [vmem:[%s5191_s9 + $0x34c] ss:$68 sps:$4 sm:$0xff]  }
  0x98   : > { %3221 = vmatprep.subr.bf16.mxu1 %v4563_v41  ;;  %2922 = vmatprep.mubr.bf16.mxu0 %v4564_v42  ;;  %v4648_v40 = vld [vmem:[%s6564_s1 + $0x4c0] ss:$8 sps:$4 sm:$0xff]   ;;  %v4662_v42 = vld [vmem:[%s6564_s1 + $0x4b4] ss:$8 sps:$4 sm:$0xff]  }
  0x99   : > { %3035 = vmatprep.mubr.bf16.mxu1 %v4566_v43  ;;  %v4651_v41 = vld [vmem:[%s6564_s1 + $0x5c0] ss:$8 sps:$4 sm:$0xff]   ;;  %v4665_v43 = vld [vmem:[%s6564_s1 + $0x5b4] ss:$8 sps:$4 sm:$0xff]  }
  0x9a   : > { %3109 = vmatpush1.bf16.msra.mxu0 %v4558_v44  ;;  %v4658_v44 = vld [vmem:[%s5191_s9 + $0x340] ss:$68 sps:$4 sm:$0xff]  }
  0x9b   : > { %3222 = vmatpush1.bf16.msra.mxu1 %v4561_v45  ;;  %3110 = vmatprep.subr.bf16.mxu0 %v4572_v46  ;;  %v4659_v45 = vld [vmem:[%s5191_s9 + $0x348] ss:$68 sps:$4 sm:$0xff]   ;;  %v4660_v46 = vld [vmem:[%s6564_s1 + $0x4b0] ss:$8 sps:$4 sm:$0xff]  }
  0x9c   : > { %3223 = vmatprep.subr.bf16.mxu1 %v4575_v47  ;;  %v4663_v47 = vld [vmem:[%s6564_s1 + $0x5b0] ss:$8 sps:$4 sm:$0xff]  }
  0x9d   : > { %2923 = vmatmul.mubr.bf16.gmra.mxu0 %v4568_v48  ;;  %v4668_v48 = vld [vmem:[%s6564_s1 + $0x4a4] ss:$8 sps:$4 sm:$0xff]  }
  0x9e   : > { %3036 = vmatmul.mubr.bf16.gmra.mxu1 %v4569_v49  ;;  %3111 = vmatpush1.bf16.msra.mxu0 %v4570_v50  ;;  %v4671_v49 = vld [vmem:[%s6564_s1 + $0x5a4] ss:$8 sps:$4 sm:$0xff]  }
  0x9f   : > { %3224 = vmatpush1.bf16.msra.mxu1 %v4573_v51  ;;  %3112 = vmatprep.subr.bf16.mxu0 %v4578_v52  ;;  %v4672_v50 = vld [vmem:[%s5191_s9 + $0x3cc] ss:$68 sps:$4 sm:$0xff]   ;;  %v4674_v51 = vld [vmem:[%s5191_s9 + $0x3d4] ss:$68 sps:$4 sm:$0xff]   ;;  %v4666_v52 = vld [vmem:[%s6564_s1 + $0x4a0] ss:$8 sps:$4 sm:$0xff]  }
  0xa0   : > { %3225 = vmatprep.subr.bf16.mxu1 %v4581_v53  ;;  %2932 = vmatprep.mubr.bf16.mxu0 %v4582_v54  ;;  %v4669_v53 = vld [vmem:[%s6564_s1 + $0x5a0] ss:$8 sps:$4 sm:$0xff]   ;;  %v4680_v54 = vld [vmem:[%s6564_s1 + $0x494] ss:$8 sps:$4 sm:$0xff]  }
  0xa1   : > { %3045 = vmatprep.mubr.bf16.mxu1 %v4584_v55  ;;  %v4683_v55 = vld [vmem:[%s6564_s1 + $0x594] ss:$8 sps:$4 sm:$0xff]  }
  0xa2   : > { %3113 = vmatpush1.bf16.msra.mxu0 %v4576_v56  ;;  %v4676_v56 = vld [vmem:[%s5191_s9 + $0x3c8] ss:$68 sps:$4 sm:$0xff]  }
  0xa3   : > { %3226 = vmatpush1.bf16.msra.mxu1 %v4579_v57  ;;  %3114 = vmatprep.subr.bf16.mxu0 %v4590_v58  ;;  %v4677_v57 = vld [vmem:[%s5191_s9 + $0x3d0] ss:$68 sps:$4 sm:$0xff]  }
  0xa4   : > { %3227 = vmatprep.subr.bf16.mxu1 %v4593_v59  ;;  %v4678_v58 = vld [vmem:[%s6564_s1 + $0x490] ss:$8 sps:$4 sm:$0xff]  }
  0xa5   : > { %2933 = vmatmul.mubr.bf16.gmra.mxu0 %v4586_v60  ;;  %v4681_v59 = vld [vmem:[%s6564_s1 + $0x590] ss:$8 sps:$4 sm:$0xff]   ;;  %v4686_v60 = vld [vmem:[%s6564_s1 + $0x484] ss:$8 sps:$4 sm:$0xff]  }
  0xa6   : > { %3046 = vmatmul.mubr.bf16.gmra.mxu1 %v4587_v61  ;;  %3115 = vmatpush1.bf16.msra.mxu0 %v4588_v62  ;;  %v4689_v61 = vld [vmem:[%s6564_s1 + $0x584] ss:$8 sps:$4 sm:$0xff]  }
  0xa7   : > { %3228 = vmatpush1.bf16.msra.mxu1 %v4591_v63  ;;  %3116 = vmatprep.subr.bf16.mxu0 %v4596_v0  ;;  %v4692_v62 = vld [vmem:[%s5191_s9 + $0x24] ss:$68 sps:$4 sm:$0xff]   ;;  %v4695_v63 = vld [vmem:[%s5191_s9 + $0x2c] ss:$68 sps:$4 sm:$0xff]  }
  0xa8   : > { %3229 = vmatprep.subr.bf16.mxu1 %v4599_v1  ;;  %2942 = vmatprep.mubr.bf16.mxu0 %v4600_v2  ;;  %v4684_v0 = vld [vmem:[%s6564_s1 + $0x480] ss:$8 sps:$4 sm:$0xff]   ;;  %v4698_v2 = vld [vmem:[%s6564_s1 + $0x674] ss:$8 sps:$4 sm:$0xff]  }
  0xa9   : > { %3055 = vmatprep.mubr.bf16.mxu1 %v4602_v3  ;;  %v4687_v1 = vld [vmem:[%s6564_s1 + $0x580] ss:$8 sps:$4 sm:$0xff]   ;;  %v4701_v3 = vld [vmem:[%s6564_s1 + $0x774] ss:$8 sps:$4 sm:$0xff]  }
  0xaa   : > { %3117 = vmatpush1.bf16.msra.mxu0 %v4594_v4  ;;  %v4690_v4 = vld [vmem:[%s5191_s9 + $0x20] ss:$68 sps:$4 sm:$0xff]  }
  0xab   : > { %3230 = vmatpush1.bf16.msra.mxu1 %v4597_v5  ;;  %3118 = vmatprep.subr.bf16.mxu0 %v4608_v6  ;;  %v4693_v5 = vld [vmem:[%s5191_s9 + $0x28] ss:$68 sps:$4 sm:$0xff]   ;;  %v4696_v6 = vld [vmem:[%s6564_s1 + $0x670] ss:$8 sps:$4 sm:$0xff]  }
  0xac   : > { %3231 = vmatprep.subr.bf16.mxu1 %v4611_v7  ;;  %v4699_v7 = vld [vmem:[%s6564_s1 + $0x770] ss:$8 sps:$4 sm:$0xff]  }
  0xad   : > { %2943 = vmatmul.mubr.bf16.gmra.mxu0 %v4604_v8  ;;  %v4704_v8 = vld [vmem:[%s6564_s1 + $0x664] ss:$8 sps:$4 sm:$0xff]  }
  0xae   : > { %3056 = vmatmul.mubr.bf16.gmra.mxu1 %v4605_v9  ;;  %3119 = vmatpush1.bf16.msra.mxu0 %v4606_v10  ;;  %v4707_v9 = vld [vmem:[%s6564_s1 + $0x764] ss:$8 sps:$4 sm:$0xff]  }
  0xaf   : > { %3232 = vmatpush1.bf16.msra.mxu1 %v4609_v11  ;;  %3120 = vmatprep.subr.bf16.mxu0 %v4614_v12  ;;  %v4708_v10 = vld [vmem:[%s5191_s9 + $0xac] ss:$68 sps:$4 sm:$0xff]   ;;  %v4710_v11 = vld [vmem:[%s5191_s9 + $0xb4] ss:$68 sps:$4 sm:$0xff]   ;;  %v4702_v12 = vld [vmem:[%s6564_s1 + $0x660] ss:$8 sps:$4 sm:$0xff]  }
  0xb0   : > { %3233 = vmatprep.subr.bf16.mxu1 %v4617_v13  ;;  %2952 = vmatprep.mubr.bf16.mxu0 %v4618_v14  ;;  %v4705_v13 = vld [vmem:[%s6564_s1 + $0x760] ss:$8 sps:$4 sm:$0xff]   ;;  %v4716_v14 = vld [vmem:[%s6564_s1 + $0x654] ss:$8 sps:$4 sm:$0xff]  }
  0xb1   : > { %3065 = vmatprep.mubr.bf16.mxu1 %v4620_v15  ;;  %v4719_v15 = vld [vmem:[%s6564_s1 + $0x754] ss:$8 sps:$4 sm:$0xff]  }
  0xb2   : > { %3121 = vmatpush1.bf16.msra.mxu0 %v4612_v16  ;;  %v4712_v16 = vld [vmem:[%s5191_s9 + $0xa8] ss:$68 sps:$4 sm:$0xff]  }
  0xb3   : > { %3234 = vmatpush1.bf16.msra.mxu1 %v4615_v17  ;;  %3122 = vmatprep.subr.bf16.mxu0 %v4626_v18  ;;  %v4713_v17 = vld [vmem:[%s5191_s9 + $0xb0] ss:$68 sps:$4 sm:$0xff]  }
  0xb4   : > { %3235 = vmatprep.subr.bf16.mxu1 %v4629_v19  ;;  %v4714_v18 = vld [vmem:[%s6564_s1 + $0x650] ss:$8 sps:$4 sm:$0xff]  }
  0xb5   : > { %2953 = vmatmul.mubr.bf16.gmra.mxu0 %v4622_v20  ;;  %v4717_v19 = vld [vmem:[%s6564_s1 + $0x750] ss:$8 sps:$4 sm:$0xff]   ;;  %v4722_v20 = vld [vmem:[%s6564_s1 + $0x644] ss:$8 sps:$4 sm:$0xff]  }
  0xb6   : > { %3066 = vmatmul.mubr.bf16.gmra.mxu1 %v4623_v21  ;;  %3123 = vmatpush2.bf16.msra.mxu0 %v4624_v22  ;;  %v4725_v21 = vld [vmem:[%s6564_s1 + $0x744] ss:$8 sps:$4 sm:$0xff]   ;;  %v4726_v22 = vld [vmem:[%s5191_s9 + $0x134] ss:$68 sps:$4 sm:$0xff]  }
  0xb7   : > { %3236 = vmatpush2.bf16.msra.mxu1 %v4627_v23  ;;  %3124 = vmatprep.subr.bf16.mxu0 %v4632_v24  ;;  %v4728_v23 = vld [vmem:[%s5191_s9 + $0x13c] ss:$68 sps:$4 sm:$0xff]  }
  0xb8   : > { %3237 = vmatprep.subr.bf16.mxu1 %v4635_v25  ;;  %2962 = vmatprep.mubr.bf16.mxu0 %v4636_v26  ;;  %v4720_v24 = vld [vmem:[%s6564_s1 + $0x640] ss:$8 sps:$4 sm:$0xff]   ;;  %v4734_v26 = vld [vmem:[%s6564_s1 + $0x634] ss:$8 sps:$4 sm:$0xff]  }
  0xb9   : > { %3075 = vmatprep.mubr.bf16.mxu1 %v4638_v27  ;;  %v4723_v25 = vld [vmem:[%s6564_s1 + $0x740] ss:$8 sps:$4 sm:$0xff]   ;;  %v4737_v27 = vld [vmem:[%s6564_s1 + $0x734] ss:$8 sps:$4 sm:$0xff]  }
  0xba   : > { %3125 = vmatpush2.bf16.msra.mxu0 %v4630_v28  ;;  %v4730_v28 = vld [vmem:[%s5191_s9 + $0x130] ss:$68 sps:$4 sm:$0xff]  }
  0xbb   : > { %3238 = vmatpush2.bf16.msra.mxu1 %v4633_v29  ;;  %3126 = vmatprep.subr.bf16.mxu0 %v4644_v30  ;;  %v4731_v29 = vld [vmem:[%s5191_s9 + $0x138] ss:$68 sps:$4 sm:$0xff]  }
  0xbc   : > { %3239 = vmatprep.subr.bf16.mxu1 %v4647_v31  ;;  %v4732_v30 = vld [vmem:[%s6564_s1 + $0x630] ss:$8 sps:$4 sm:$0xff]  }
  0xbd   : > { %2963 = vmatmul.mubr.bf16.gmra.mxu0 %v4640_v32  ;;  %v4735_v31 = vld [vmem:[%s6564_s1 + $0x730] ss:$8 sps:$4 sm:$0xff]   ;;  %v4740_v32 = vld [vmem:[%s6564_s1 + $0x624] ss:$8 sps:$4 sm:$0xff]  }
  0xbe   : > { %3076 = vmatmul.mubr.bf16.gmra.mxu1 %v4641_v33  ;;  %3127 = vmatpush2.bf16.msra.mxu0 %v4642_v34  ;;  %v4743_v33 = vld [vmem:[%s6564_s1 + $0x724] ss:$8 sps:$4 sm:$0xff]   ;;  %v4744_v34 = vld [vmem:[%s5191_s9 + $0x1bc] ss:$68 sps:$4 sm:$0xff]  }
  0xbf   : > { %3240 = vmatpush2.bf16.msra.mxu1 %v4645_v35  ;;  %3128 = vmatprep.subr.bf16.mxu0 %v4650_v36  ;;  %v4746_v35 = vld [vmem:[%s5191_s9 + $0x1c4] ss:$68 sps:$4 sm:$0xff]  }
  0xc0   : > { %3241 = vmatprep.subr.bf16.mxu1 %v4653_v37  ;;  %2972 = vmatprep.mubr.bf16.mxu0 %v4654_v38  ;;  %v4738_v36 = vld [vmem:[%s6564_s1 + $0x620] ss:$8 sps:$4 sm:$0xff]   ;;  %v4752_v38 = vld [vmem:[%s6564_s1 + $0x614] ss:$8 sps:$4 sm:$0xff]  }
  0xc1   : > { %3085 = vmatprep.mubr.bf16.mxu1 %v4656_v39  ;;  %v4741_v37 = vld [vmem:[%s6564_s1 + $0x720] ss:$8 sps:$4 sm:$0xff]   ;;  %v4755_v39 = vld [vmem:[%s6564_s1 + $0x714] ss:$8 sps:$4 sm:$0xff]  }
  0xc2   : > { %3129 = vmatpush2.bf16.msra.mxu0 %v4648_v40  ;;  %v4748_v40 = vld [vmem:[%s5191_s9 + $0x1b8] ss:$68 sps:$4 sm:$0xff]  }
  0xc3   : > { %3242 = vmatpush2.bf16.msra.mxu1 %v4651_v41  ;;  %3130 = vmatprep.subr.bf16.mxu0 %v4662_v42  ;;  %v4749_v41 = vld [vmem:[%s5191_s9 + $0x1c0] ss:$68 sps:$4 sm:$0xff]   ;;  %v4750_v42 = vld [vmem:[%s6564_s1 + $0x610] ss:$8 sps:$4 sm:$0xff]  }
  0xc4   : > { %3243 = vmatprep.subr.bf16.mxu1 %v4665_v43  ;;  %v4753_v43 = vld [vmem:[%s6564_s1 + $0x710] ss:$8 sps:$4 sm:$0xff]  }
  0xc5   : > { %2973 = vmatmul.mubr.bf16.gmra.mxu0 %v4658_v44  ;;  %v4758_v44 = vld [vmem:[%s6564_s1 + $0x604] ss:$8 sps:$4 sm:$0xff]  }
  0xc6   : > { %3086 = vmatmul.mubr.bf16.gmra.mxu1 %v4659_v45  ;;  %3131 = vmatpush2.bf16.msra.mxu0 %v4660_v46  ;;  %v4761_v45 = vld [vmem:[%s6564_s1 + $0x704] ss:$8 sps:$4 sm:$0xff]  }
  0xc7   : > { %3244 = vmatpush2.bf16.msra.mxu1 %v4663_v47  ;;  %3132 = vmatprep.subr.bf16.mxu0 %v4668_v48  ;;  %v4762_v46 = vld [vmem:[%s5191_s9 + $0x244] ss:$68 sps:$4 sm:$0xff]   ;;  %v4764_v47 = vld [vmem:[%s5191_s9 + $0x24c] ss:$68 sps:$4 sm:$0xff]  }
  0xc8   : > { %3245 = vmatprep.subr.bf16.mxu1 %v4671_v49  ;;  %2982 = vmatprep.mubr.bf16.mxu0 %v4672_v50  ;;  %v4756_v48 = vld [vmem:[%s6564_s1 + $0x600] ss:$8 sps:$4 sm:$0xff]   ;;  %v4770_v50 = vld [vmem:[%s6564_s1 + $0x6f4] ss:$8 sps:$4 sm:$0xff]  }
  0xc9   : > { %3095 = vmatprep.mubr.bf16.mxu1 %v4674_v51  ;;  %v4759_v49 = vld [vmem:[%s6564_s1 + $0x700] ss:$8 sps:$4 sm:$0xff]   ;;  %v4773_v51 = vld [vmem:[%s6564_s1 + $0x7f4] ss:$8 sps:$4 sm:$0xff]  }
  0xca   : > { %3133 = vmatpush2.bf16.msra.mxu0 %v4666_v52  ;;  %v4766_v52 = vld [vmem:[%s5191_s9 + $0x240] ss:$68 sps:$4 sm:$0xff]  }
  0xcb   : > { %3246 = vmatpush2.bf16.msra.mxu1 %v4669_v53  ;;  %3134 = vmatprep.subr.bf16.mxu0 %v4680_v54  ;;  %v4767_v53 = vld [vmem:[%s5191_s9 + $0x248] ss:$68 sps:$4 sm:$0xff]   ;;  %v4768_v54 = vld [vmem:[%s6564_s1 + $0x6f0] ss:$8 sps:$4 sm:$0xff]  }
  0xcc   : > { %3247 = vmatprep.subr.bf16.mxu1 %v4683_v55  ;;  %v4771_v55 = vld [vmem:[%s6564_s1 + $0x7f0] ss:$8 sps:$4 sm:$0xff]  }
  0xcd   : > { %2983 = vmatmul.mubr.bf16.gmra.mxu0 %v4676_v56  ;;  %v4776_v56 = vld [vmem:[%s6564_s1 + $0x6e4] ss:$8 sps:$4 sm:$0xff]  }
  0xce   : > { %3096 = vmatmul.mubr.bf16.gmra.mxu1 %v4677_v57  ;;  %3135 = vmatpush2.bf16.msra.mxu0 %v4678_v58  ;;  %v4779_v57 = vld [vmem:[%s6564_s1 + $0x7e4] ss:$8 sps:$4 sm:$0xff]  }
  0xcf   : > { %3248 = vmatpush2.bf16.msra.mxu1 %v4681_v59  ;;  %3136 = vmatprep.subr.bf16.mxu0 %v4686_v60  ;;  %v4780_v58 = vld [vmem:[%s5191_s9 + $0x2cc] ss:$68 sps:$4 sm:$0xff]   ;;  %v4782_v59 = vld [vmem:[%s5191_s9 + $0x2d4] ss:$68 sps:$4 sm:$0xff]   ;;  %v4774_v60 = vld [vmem:[%s6564_s1 + $0x6e0] ss:$8 sps:$4 sm:$0xff]  }
  0xd0   : > { %3249 = vmatprep.subr.bf16.mxu1 %v4689_v61  ;;  %3138 = vmatprep.mubr.bf16.mxu0 %v4692_v62  ;;  %v4777_v61 = vld [vmem:[%s6564_s1 + $0x7e0] ss:$8 sps:$4 sm:$0xff]   ;;  %v4788_v62 = vld [vmem:[%s6564_s1 + $0x6d4] ss:$8 sps:$4 sm:$0xff]  }
  0xd1   : > { %3251 = vmatprep.mubr.bf16.mxu1 %v4695_v63  ;;  %v4791_v63 = vld [vmem:[%s6564_s1 + $0x7d4] ss:$8 sps:$4 sm:$0xff]  }
  0xd2   : > { %3137 = vmatpush2.bf16.msra.mxu0 %v4684_v0  ;;  %v4784_v0 = vld [vmem:[%s5191_s9 + $0x2c8] ss:$68 sps:$4 sm:$0xff]  }
  0xd3   : > { %3250 = vmatpush2.bf16.msra.mxu1 %v4687_v1  ;;  %3332 = vmatprep.subr.bf16.mxu0 %v4698_v2  ;;  %v4785_v1 = vld [vmem:[%s5191_s9 + $0x2d0] ss:$68 sps:$4 sm:$0xff]  }
  0xd4   : > { %3445 = vmatprep.subr.bf16.mxu1 %v4701_v3  ;;  %v4786_v2 = vld [vmem:[%s6564_s1 + $0x6d0] ss:$8 sps:$4 sm:$0xff]  }
  0xd5   : > { %3139 = vmatmul.mubr.bf16.vlgmr.msra.gmra.mxu0 %v4690_v4  ;;  %v4789_v3 = vld [vmem:[%s6564_s1 + $0x7d0] ss:$8 sps:$4 sm:$0xff]   ;;  %v4794_v4 = vld [vmem:[%s6564_s1 + $0x6c4] ss:$8 sps:$4 sm:$0xff]  }
  0xd6   : > { %3252 = vmatmul.mubr.bf16.vlgmr.msra.gmra.mxu1 %v4693_v5  ;;  %3333 = vmatpush1.bf16.msra.mxu0 %v4696_v6  ;;  %v4797_v5 = vld [vmem:[%s6564_s1 + $0x7c4] ss:$8 sps:$4 sm:$0xff]   ;;  %v4798_v6 = vld [vmem:[%s5191_s9 + $0x354] ss:$68 sps:$4 sm:$0xff]  }
  0xd7   : > { %3446 = vmatpush1.bf16.msra.mxu1 %v4699_v7  ;;  %3334 = vmatprep.subr.bf16.mxu0 %v4704_v8  ;;  %v4800_v7 = vld [vmem:[%s5191_s9 + $0x35c] ss:$68 sps:$4 sm:$0xff]  }
  0xd8   : > { %3447 = vmatprep.subr.bf16.mxu1 %v4707_v9  ;;  %3148 = vmatprep.mubr.bf16.mxu0 %v4708_v10  ;;  %v4792_v8 = vld [vmem:[%s6564_s1 + $0x6c0] ss:$8 sps:$4 sm:$0xff]   ;;  %v4802_v10 = vld [vmem:[%s5191_s9 + $0x350] ss:$68 sps:$4 sm:$0xff]  }
  0xd9   : > { %3261 = vmatprep.mubr.bf16.mxu1 %v4710_v11  ;;  %v4795_v9 = vld [vmem:[%s6564_s1 + $0x7c0] ss:$8 sps:$4 sm:$0xff]   ;;  %v4806_v11 = vld [vmem:[%s6564_s1 + $0x6b4] ss:$8 sps:$4 sm:$0xff]  }
  0xda   : > { %3335 = vmatpush1.bf16.msra.mxu0 %v4702_v12  ;;  %v4809_v12 = vld [vmem:[%s6564_s1 + $0x7b4] ss:$8 sps:$4 sm:$0xff]  }
  0xdb   : > { %3448 = vmatpush1.bf16.msra.mxu1 %v4705_v13  ;;  %3336 = vmatprep.subr.bf16.mxu0 %v4716_v14  ;;  %v4803_v13 = vld [vmem:[%s5191_s9 + $0x358] ss:$68 sps:$4 sm:$0xff]  }
  0xdc   : > { %3449 = vmatprep.subr.bf16.mxu1 %v4719_v15  ;;  %v4804_v14 = vld [vmem:[%s6564_s1 + $0x6b0] ss:$8 sps:$4 sm:$0xff]  }
  0xdd   : > { %3149 = vmatmul.mubr.bf16.gmra.mxu0 %v4712_v16  ;;  %v4807_v15 = vld [vmem:[%s6564_s1 + $0x7b0] ss:$8 sps:$4 sm:$0xff]   ;;  %v4812_v16 = vld [vmem:[%s6564_s1 + $0x6a4] ss:$8 sps:$4 sm:$0xff]  }
  0xde   : > { %3262 = vmatmul.mubr.bf16.gmra.mxu1 %v4713_v17  ;;  %3337 = vmatpush1.bf16.msra.mxu0 %v4714_v18  ;;  %v4815_v17 = vld [vmem:[%s6564_s1 + $0x7a4] ss:$8 sps:$4 sm:$0xff]   ;;  %v4816_v18 = vld [vmem:[%s5191_s9 + $0x3dc] ss:$68 sps:$4 sm:$0xff]  }
  0xdf   : > { %3450 = vmatpush1.bf16.msra.mxu1 %v4717_v19  ;;  %3338 = vmatprep.subr.bf16.mxu0 %v4722_v20  ;;  %v4818_v19 = vld [vmem:[%s5191_s9 + $0x3e4] ss:$68 sps:$4 sm:$0xff]  }
  0xe0   : > { %3451 = vmatprep.subr.bf16.mxu1 %v4725_v21  ;;  %3158 = vmatprep.mubr.bf16.mxu0 %v4726_v22  ;;  %v4810_v20 = vld [vmem:[%s6564_s1 + $0x6a0] ss:$8 sps:$4 sm:$0xff]   ;;  %v637_v22 = vlaneseq }
  0xe1   : > { %3271 = vmatprep.mubr.bf16.mxu1 %v4728_v23  ;;  %v4813_v21 = vld [vmem:[%s6564_s1 + $0x7a0] ss:$8 sps:$4 sm:$0xff]   ;;  %v4820_v23 = vld [vmem:[%s5191_s9 + $0x3d8] ss:$68 sps:$4 sm:$0xff]  }
  0xe2   : > { %3339 = vmatpush1.bf16.msra.mxu0 %v4720_v24  ;;  %v4821_v24 = vld [vmem:[%s5191_s9 + $0x3e0] ss:$68 sps:$4 sm:$0xff]  }
  0xe3   : > { %3452 = vmatpush1.bf16.msra.mxu1 %v4723_v25  ;;  %3340 = vmatprep.subr.bf16.mxu0 %v4734_v26  ;;  %v4824_v25 = vld [vmem:[%s6564_s1 + $0x694] ss:$8 sps:$4 sm:$0xff]  }
  0xe4   : > { %3453 = vmatprep.subr.bf16.mxu1 %v4737_v27  ;;  %v4827_v26 = vld [vmem:[%s6564_s1 + $0x794] ss:$8 sps:$4 sm:$0xff]   ;;  %v4822_v27 = vld [vmem:[%s6564_s1 + $0x690] ss:$8 sps:$4 sm:$0xff]  }
  0xe5   : > { %3159 = vmatmul.mubr.bf16.gmra.mxu0 %v4730_v28  ;;  %v4825_v28 = vld [vmem:[%s6564_s1 + $0x790] ss:$8 sps:$4 sm:$0xff]  }
  0xe6   : > { %3272 = vmatmul.mubr.bf16.gmra.mxu1 %v4731_v29  ;;  %3341 = vmatpush1.bf16.msra.mxu0 %v4732_v30  ;;  %v4830_v29 = vld [vmem:[%s6564_s1 + $0x684] ss:$8 sps:$4 sm:$0xff]  }
  0xe7   : > { %3454 = vmatpush1.bf16.msra.mxu1 %v4735_v31  ;;  %3342 = vmatprep.subr.bf16.mxu0 %v4740_v32  ;;  %v4833_v30 = vld [vmem:[%s6564_s1 + $0x784] ss:$8 sps:$4 sm:$0xff]   ;;  %v638_v31 = vshrl.u32 %v637_v22, 7  ;;  %v4836_v32 = vld [vmem:[%s5191_s9 + $0x34] ss:$68 sps:$4 sm:$0xff]  }
  0xe8   : > { %3455 = vmatprep.subr.bf16.mxu1 %v4743_v33  ;;  %3168 = vmatprep.mubr.bf16.mxu0 %v4744_v34  ;;  %v4839_v33 = vld [vmem:[%s5191_s9 + $0x3c] ss:$68 sps:$4 sm:$0xff]   ;;  %v634_v34 = vld [vmem:[%s6564_s1 + $0x810] sm:$0xff] }
  0xe9   : > { %3281 = vmatprep.mubr.bf16.mxu1 %v4746_v35  ;;  %v4828_v35 = vld [vmem:[%s6564_s1 + $0x680] ss:$8 sps:$4 sm:$0xff]  }
  0xea   : > { %3343 = vmatpush1.bf16.msra.mxu0 %v4738_v36  ;;  %v4831_v36 = vld [vmem:[%s6564_s1 + $0x780] ss:$8 sps:$4 sm:$0xff]  }
  0xeb   : > { %3456 = vmatpush1.bf16.msra.mxu1 %v4741_v37  ;;  %3344 = vmatprep.subr.bf16.mxu0 %v4752_v38  ;;  %v639_v37 = vsub.s32 0, %v638_v31  ;;  %v635_v38 = vld [vmem:[%s6565_s2] sm:$0x3] }
  0xec   : > { %3457 = vmatprep.subr.bf16.mxu1 %v4755_v39  ;;  %v4225_v39 = vcombine.high %v634_v34, %v634_v34 }
  0xed   : > { %3169 = vmatmul.mubr.bf16.gmra.mxu0 %v4748_v40  ;;  %v4224_v40 = vcombine.low %v634_v34, %v634_v34 }
  0xee   : > { %3282 = vmatmul.mubr.bf16.gmra.mxu1 %v4749_v41  ;;  %3345 = vmatpush1.bf16.msra.mxu0 %v4750_v42  ;;  %v4834_v41 = vld [vmem:[%s5191_s9 + $0x30] ss:$68 sps:$4 sm:$0xff]   ;;  %v643_v42 = vsub.s32 1, %v638_v31 }
  0xef   : > { %3458 = vmatpush1.bf16.msra.mxu1 %v4753_v43  ;;  %3346 = vmatprep.subr.bf16.mxu0 %v4758_v44  ;;  %v4837_v43 = vld [vmem:[%s5191_s9 + $0x38] ss:$68 sps:$4 sm:$0xff]   ;;  %v5932_v44 = vrot.slane %v635_v38, %v639_v37  ;;  %v4859_v37 = vld [vmem:[%s5191_s9 + $0x1d0] ss:$68 sps:$4 sm:$0xff]  }
  0xf0   : > { %3459 = vmatprep.subr.bf16.mxu1 %v4761_v45  ;;  %3178 = vmatprep.mubr.bf16.mxu0 %v4762_v46  ;;  %v2649_v45 = vsel %vm2647_vm0, %v4224_v40, 0  ;;  %v4842_v46 = vld [vmem:[%s5191_s9 + $0xbc] ss:$68 sps:$4 sm:$0xff]   ;;  %v4862_v40 = vld [vmem:[%s5191_s9 + $0x254] ss:$68 sps:$4 sm:$0xff]  }
  0xf1   : > { %3291 = vmatprep.mubr.bf16.mxu1 %v4764_v47  ;;  %v4844_v47 = vld [vmem:[%s5191_s9 + $0xc4] ss:$68 sps:$4 sm:$0xff]  }
  0xf2   : > { %3347 = vmatpush1.bf16.msra.mxu0 %v4756_v48  ;;  %v5936_v48 = vrot.slane %v635_v38, %v643_v42 }
  0xf3   : > { %3460 = vmatpush1.bf16.msra.mxu1 %v4759_v49  ;;  %3348 = vmatprep.subr.bf16.mxu0 %v4770_v50  ;;  %v4868_v49 = vld [vmem:[%s6564_s1 + $0x804] ss:$8 sps:$4 sm:$0xff]  }
  0xf4   : > { %3461 = vmatprep.subr.bf16.mxu1 %v4773_v51 }
  0xf5   : > { %3179 = vmatmul.mubr.bf16.gmra.mxu0 %v4766_v52 }
  0xf6   : > { %3292 = vmatmul.mubr.bf16.gmra.mxu1 %v4767_v53  ;;  %3349 = vmatpush2.bf16.msra.mxu0 %v4768_v54  ;;  %v4866_v53 = vld [vmem:[%s6564_s1 + $0x800] ss:$8 sps:$4 sm:$0xff]  }
  0xf7   : > { %3462 = vmatpush2.bf16.msra.mxu1 %v4771_v55  ;;  %3350 = vmatprep.subr.bf16.mxu0 %v4776_v56  ;;  %v4846_v56 = vld [vmem:[%s5191_s9 + $0xb8] ss:$68 sps:$4 sm:$0xff]  }
  0xf8   : > { %3463 = vmatprep.subr.bf16.mxu1 %v4779_v57  ;;  %3188 = vmatprep.mubr.bf16.mxu0 %v4780_v58 }
  0xf9   : > { %3301 = vmatprep.mubr.bf16.mxu1 %v4782_v59  ;;  %v4847_v59 = vld [vmem:[%s5191_s9 + $0xc0] ss:$68 sps:$4 sm:$0xff]  }
  0xfa   : > { %3351 = vmatpush2.bf16.msra.mxu0 %v4774_v60 }
  0xfb   : > { %3464 = vmatpush2.bf16.msra.mxu1 %v4777_v61  ;;  %3352 = vmatprep.subr.bf16.mxu0 %v4788_v62  ;;  %v4848_v62 = vld [vmem:[%s5191_s9 + $0x144] ss:$68 sps:$4 sm:$0xff]  }
  0xfc   : > { %3465 = vmatprep.subr.bf16.mxu1 %v4791_v63 }
  0xfd   : > { %3189 = vmatmul.mubr.bf16.gmra.mxu0 %v4784_v0 }
  0xfe   : > { %3302 = vmatmul.mubr.bf16.gmra.mxu1 %v4785_v1  ;;  %3353 = vmatpush2.bf16.msra.mxu0 %v4786_v2  ;;  %v4850_v1 = vld [vmem:[%s5191_s9 + $0x14c] ss:$68 sps:$4 sm:$0xff]  }
  0xff   : > { %3466 = vmatpush2.bf16.msra.mxu1 %v4789_v3  ;;  %3354 = vmatprep.subr.bf16.mxu0 %v4794_v4 }
 0x100   : > { %3467 = vmatprep.subr.bf16.mxu1 %v4797_v5  ;;  %3198 = vmatprep.mubr.bf16.mxu0 %v4798_v6 }
 0x101   : > { %3311 = vmatprep.mubr.bf16.mxu1 %v4800_v7 }
 0x102   : > { %3355 = vmatpush2.bf16.msra.mxu0 %v4792_v8 }
 0x103   : > { %3468 = vmatpush2.bf16.msra.mxu1 %v4795_v9  ;;  %3356 = vmatprep.subr.bf16.mxu0 %v4806_v11 }
 0x104   : > { %3469 = vmatprep.subr.bf16.mxu1 %v4809_v12 }
 0x105   : > { %3199 = vmatmul.mubr.bf16.gmra.mxu0 %v4802_v10 }
 0x106   : > { %3312 = vmatmul.mubr.bf16.gmra.mxu1 %v4803_v13  ;;  %3357 = vmatpush2.bf16.msra.mxu0 %v4804_v14 }
 0x107   : > { %3470 = vmatpush2.bf16.msra.mxu1 %v4807_v15  ;;  %3358 = vmatprep.subr.bf16.mxu0 %v4812_v16  ;;  %v4852_v16 = vld [vmem:[%s5191_s9 + $0x140] ss:$68 sps:$4 sm:$0xff]  }
 0x108   : > { %3471 = vmatprep.subr.bf16.mxu1 %v4815_v17  ;;  %3208 = vmatprep.mubr.bf16.mxu0 %v4816_v18  ;;  %v4853_v17 = vld [vmem:[%s5191_s9 + $0x148] ss:$68 sps:$4 sm:$0xff]  }
 0x109   : > { %3321 = vmatprep.mubr.bf16.mxu1 %v4818_v19 }
 0x10a   : > { %3359 = vmatpush2.bf16.msra.mxu0 %v4810_v20  ;;  %v4854_v20 = vld [vmem:[%s5191_s9 + $0x1cc] ss:$68 sps:$4 sm:$0xff]  }
 0x10b   : > { %3472 = vmatpush2.bf16.msra.mxu1 %v4813_v21  ;;  %3360 = vmatprep.subr.bf16.mxu0 %v4824_v25  ;;  %v4856_v21 = vld [vmem:[%s5191_s9 + $0x1d4] ss:$68 sps:$4 sm:$0xff]  }
 0x10c   : > { %3473 = vmatprep.subr.bf16.mxu1 %v4827_v26 }
 0x10d   : > { %3209 = vmatmul.mubr.bf16.gmra.mxu0 %v4820_v23 }
 0x10e   : > { %3322 = vmatmul.mubr.bf16.gmra.mxu1 %v4821_v24  ;;  %3361 = vmatpush2.bf16.msra.mxu0 %v4822_v27 }
 0x10f   : > { %3474 = vmatpush2.bf16.msra.mxu1 %v4825_v28  ;;  %3362 = vmatprep.subr.bf16.mxu0 %v4830_v29 }
 0x110   : > { %3475 = vmatprep.subr.bf16.mxu1 %v4833_v30  ;;  %3364 = vmatprep.mubr.bf16.mxu0 %v4836_v32 }
 0x111   : > { %3477 = vmatprep.mubr.bf16.mxu1 %v4839_v33 }
 0x112   : > { %3363 = vmatpush2.bf16.msra.mxu0 %v4828_v35 }
 0x113   : > { %3476 = vmatpush2.bf16.msra.mxu1 %v4831_v36  ;;  %4226 = vmatprep.subr.msk.bf16.mxu0 %vm2647_vm0, %v4225_v39  ;;  %v4858_v36 = vld [vmem:[%s5191_s9 + $0x1c8] ss:$68 sps:$4 sm:$0xff]  }
 0x114   : > { %4243 = vmatprep.subr.msk.bf16.mxu1 %vm2647_vm0, %v4225_v39 }
 0x115   : > { %v2688_v50 = vpop.f32.mrf.mxu0  ;;  %3365 = vmatmul.mubr.bf16.vlgmr.msra.gmra.mxu0 %v4834_v41  ;;  %v4865_v41 = vld [vmem:[%s5191_s9 + $0x25c] ss:$68 sps:$4 sm:$0xff]  }
 0x116   : > { %v2801_v51 = vpop.f32.mrf.mxu1  ;;  %3478 = vmatmul.mubr.bf16.vlgmr.msra.gmra.mxu1 %v4837_v43  ;;  %v2689_v52 = vadd.f32 %v2688_v50, %v5932_v44  ;;  %3571 = vmatpush1.bf16.msra.mxu0 %v2649_v45 }
 0x117   : > { %4245 = vmatpush1.bf16.msra.mxu1 %v2649_v45  ;;  %v2690_v54 = vpop.f32.mrf.mxu0  ;;  %3374 = vmatprep.mubr.bf16.mxu0 %v4842_v46 }
 0x118   : > { %v2803_v55 = vpop.f32.mrf.mxu1  ;;  %3487 = vmatprep.mubr.bf16.mxu1 %v4844_v47  ;;  %v5946_v57 = vadd.f32 %v2801_v51, %v2689_v52  ;;  %v2691_v58 = vadd.f32 %v2690_v54, %v5936_v48  ;;  %3572 = vmatprep.subr.bf16.mxu0 %v4868_v49 }
 0x119   : > { %4244 = vmatprep.subr.bf16.mxu1 %v4868_v49  ;;  %v2692_v60 = vpop.f32.mrf.mxu0 }
 0x11a   : > { %v2805_v61 = vpop.f32.mrf.mxu1  ;;  %v5951_v63 = vadd.f32 %v2803_v55, %v2691_v58  ;;  %v2693_v0 = vadd.f32 %v2692_v60, %v5932_v44  ;;  %3573 = vmatpush1.bf16.msra.mxu0 %v4866_v53  ;;  %v4863_v60 = vld [vmem:[%s5191_s9 + $0x258] ss:$68 sps:$4 sm:$0xff]  }
 0x11b   : > { %4246 = vmatpush1.bf16.msra.mxu1 %v4866_v53  ;;  %v2694_v2 = vpop.f32.mrf.mxu0 }
 0x11c   : > { %v2807_v3 = vpop.f32.mrf.mxu1  ;;  %v5955_v4 = vadd.f32 %v2805_v61, %v2693_v0  ;;  %v2695_v5 = vadd.f32 %v2694_v2, %v5936_v48  ;;  %v4871_v0 = vld [vmem:[%s5191_s9 + $0x2dc] ss:$68 sps:$4 sm:$0xff]  }
 0x11d   : > { %v2698_v6 = vpop.f32.mrf.mxu0  ;;  %3375 = vmatmul.mubr.bf16.gmra.mxu0 %v4846_v56 }
 0x11e   : > { %v2811_v7 = vpop.f32.mrf.mxu1  ;;  %3488 = vmatmul.mubr.bf16.gmra.mxu1 %v4847_v59  ;;  %v5958_v8 = vadd.f32 %v2807_v3, %v2695_v5  ;;  %v2699_v9 = vadd.f32 %v2698_v6, %v5932_v44  ;;  %3384 = vmatprep.mubr.bf16.mxu0 %v4848_v62  ;;  %v4860_v59 = vld [vmem:[%s5191_s9 + $0x250] ss:$68 sps:$4 sm:$0xff]  }
 0x11f   : > { %3497 = vmatprep.mubr.bf16.mxu1 %v4850_v1  ;;  %v2700_v10 = vpop.f32.mrf.mxu0  ;;  %v4874_v1 = vld [vmem:[%s5191_s9 + $0x2e4] ss:$68 sps:$4 sm:$0xff]  }
 0x120   : > { %v2813_v11 = vpop.f32.mrf.mxu1  ;;  %v5961_v12 = vadd.f32 %v2811_v7, %v2699_v9  ;;  %v2701_v13 = vadd.f32 %v2700_v10, %v5936_v48 }
 0x121   : > { %v2702_v14 = vpop.f32.mrf.mxu0 }
 0x122   : > { %v2815_v15 = vpop.f32.mrf.mxu1  ;;  %v5966_v18 = vadd.f32 %v2813_v11, %v2701_v13  ;;  %v2703_v19 = vadd.f32 %v2702_v14, %v5932_v44 }
 0x123   : > { %v2704_v22 = vpop.f32.mrf.mxu0 }
 0x124   : > { %v2817_v23 = vpop.f32.mrf.mxu1  ;;  %v5971_v24 = vadd.f32 %v2815_v15, %v2703_v19  ;;  %v2705_v25 = vadd.f32 %v2704_v22, %v5936_v48 }
 0x125   : > { %v2708_v26 = vpop.f32.mrf.mxu0  ;;  %3385 = vmatmul.mubr.bf16.gmra.mxu0 %v4852_v16 }
 0x126   : > { %v2821_v27 = vpop.f32.mrf.mxu1  ;;  %3498 = vmatmul.mubr.bf16.gmra.mxu1 %v4853_v17  ;;  %v5974_v28 = vadd.f32 %v2817_v23, %v2705_v25  ;;  %v2709_v29 = vadd.f32 %v2708_v26, %v5932_v44  ;;  %3394 = vmatprep.mubr.bf16.mxu0 %v4854_v20  ;;  %v4869_v20 = vld [vmem:[%s5191_s9 + $0x2d8] ss:$68 sps:$4 sm:$0xff]   ;;  %v4877_v25 = vld [vmem:[%s5191_s9 + $0x364] ss:$68 sps:$4 sm:$0xff]   ;;  %v4880_v26 = vld [vmem:[%s5191_s9 + $0x36c] ss:$68 sps:$4 sm:$0xff]  }
 0x127   : > { %3507 = vmatprep.mubr.bf16.mxu1 %v4856_v21  ;;  %v2710_v30 = vpop.f32.mrf.mxu0  ;;  %v4872_v21 = vld [vmem:[%s5191_s9 + $0x2e0] ss:$68 sps:$4 sm:$0xff]  }
 0x128   : > { %v2823_v31 = vpop.f32.mrf.mxu1  ;;  %v5977_v32 = vadd.f32 %v2821_v27, %v2709_v29  ;;  %v2711_v33 = vadd.f32 %v2710_v30, %v5936_v48 }
 0x129   : > { %v2712_v34 = vpop.f32.mrf.mxu0 }
 0x12a   : > { %v2825_v35 = vpop.f32.mrf.mxu1  ;;  %v5982_v38 = vadd.f32 %v2823_v31, %v2711_v33  ;;  %v2713_v39 = vadd.f32 %v2712_v34, %v5932_v44 }
 0x12b   : > { %v2714_v42 = vpop.f32.mrf.mxu0 }
 0x12c   : > { %v2827_v43 = vpop.f32.mrf.mxu1  ;;  %v5987_v45 = vadd.f32 %v2825_v35, %v2713_v39  ;;  %v2715_v46 = vadd.f32 %v2714_v42, %v5936_v48 }
 0x12d   : > { %v2718_v47 = vpop.f32.mrf.mxu0  ;;  %3395 = vmatmul.mubr.bf16.gmra.mxu0 %v4858_v36 }
 0x12e   : > { %v2831_v49 = vpop.f32.mrf.mxu1  ;;  %3508 = vmatmul.mubr.bf16.gmra.mxu1 %v4859_v37  ;;  %v5990_v50 = vadd.f32 %v2827_v43, %v2715_v46  ;;  %v2719_v51 = vadd.f32 %v2718_v47, %v5932_v44  ;;  %3404 = vmatprep.mubr.bf16.mxu0 %v4862_v40  ;;  %v4875_v46 = vld [vmem:[%s5191_s9 + $0x360] ss:$68 sps:$4 sm:$0xff]   ;;  %v4878_v47 = vld [vmem:[%s5191_s9 + $0x368] ss:$68 sps:$4 sm:$0xff]  }
 0x12f   : > { %3517 = vmatprep.mubr.bf16.mxu1 %v4865_v41  ;;  %v2720_v52 = vpop.f32.mrf.mxu0 }
 0x130   : > { %v2833_v53 = vpop.f32.mrf.mxu1  ;;  %v5993_v54 = vadd.f32 %v2831_v49, %v2719_v51  ;;  %v2721_v55 = vadd.f32 %v2720_v52, %v5936_v48  ;;  %v4883_v52 = vld [vmem:[%s5191_s9 + $0x3ec] ss:$68 sps:$4 sm:$0xff]  }
 0x131   : > { %v2722_v56 = vpop.f32.mrf.mxu0 }
 0x132   : > { %v2835_v58 = vpop.f32.mrf.mxu1  ;;  %v5998_v61 = vadd.f32 %v2833_v53, %v2721_v55  ;;  %v2723_v62 = vadd.f32 %v2722_v56, %v5932_v44  ;;  %v4886_v53 = vld [vmem:[%s5191_s9 + $0x3f4] ss:$68 sps:$4 sm:$0xff]  }
 0x133   : > { %v2724_v2 = vpop.f32.mrf.mxu0 }
 0x134   : > { %v2837_v3 = vpop.f32.mrf.mxu1  ;;  %v6003_v5 = vadd.f32 %v2835_v58, %v2723_v62  ;;  %v2725_v6 = vadd.f32 %v2724_v2, %v5936_v48 }
 0x135   : > { %v2728_v7 = vpop.f32.mrf.mxu0  ;;  %3405 = vmatmul.mubr.bf16.gmra.mxu0 %v4860_v59 }
 0x136   : > { %v2841_v9 = vpop.f32.mrf.mxu1  ;;  %3518 = vmatmul.mubr.bf16.gmra.mxu1 %v4863_v60  ;;  %v6006_v10 = vadd.f32 %v2837_v3, %v2725_v6  ;;  %v2729_v11 = vadd.f32 %v2728_v7, %v5932_v44  ;;  %3414 = vmatprep.mubr.bf16.mxu0 %v4871_v0 }
 0x137   : > { %3527 = vmatprep.mubr.bf16.mxu1 %v4874_v1  ;;  %v2730_v13 = vpop.f32.mrf.mxu0 }
 0x138   : > { %v2843_v14 = vpop.f32.mrf.mxu1  ;;  %v6009_v15 = vadd.f32 %v2841_v9, %v2729_v11  ;;  %v2731_v16 = vadd.f32 %v2730_v13, %v5936_v48  ;;  %v4881_v13 = vld [vmem:[%s5191_s9 + $0x3e8] ss:$68 sps:$4 sm:$0xff]  }
 0x139   : > { %v2732_v17 = vpop.f32.mrf.mxu0 }
 0x13a   : > { %v2845_v19 = vpop.f32.mrf.mxu1  ;;  %v6014_v22 = vadd.f32 %v2843_v14, %v2731_v16  ;;  %v2733_v23 = vadd.f32 %v2732_v17, %v5932_v44  ;;  %v4884_v14 = vld [vmem:[%s5191_s9 + $0x3f0] ss:$68 sps:$4 sm:$0xff]  }
 0x13b   : > { %v2734_v27 = vpop.f32.mrf.mxu0 }
 0x13c   : > { %v2847_v29 = vpop.f32.mrf.mxu1  ;;  %v6019_v30 = vadd.f32 %v2845_v19, %v2733_v23  ;;  %v2735_v31 = vadd.f32 %v2734_v27, %v5936_v48 }
 0x13d   : > { %v2738_v33 = vpop.f32.mrf.mxu0  ;;  %3415 = vmatmul.mubr.bf16.gmra.mxu0 %v4869_v20 }
 0x13e   : > { %v2851_v34 = vpop.f32.mrf.mxu1  ;;  %3528 = vmatmul.mubr.bf16.gmra.mxu1 %v4872_v21  ;;  %v6022_v35 = vadd.f32 %v2847_v29, %v2735_v31  ;;  %v2739_v36 = vadd.f32 %v2738_v33, %v5932_v44  ;;  %3424 = vmatprep.mubr.bf16.mxu0 %v4877_v25  ;;  %v4973_v31 = vmov 0  }
 0x13f   : > { %3537 = vmatprep.mubr.bf16.mxu1 %v4880_v26  ;;  %v2740_v37 = vpop.f32.mrf.mxu0 }
 0x140   : > { %v2853_v39 = vpop.f32.mrf.mxu1  ;;  %v6025_v40 = vadd.f32 %v2851_v34, %v2739_v36  ;;  %v2741_v41 = vadd.f32 %v2740_v37, %v5936_v48 }
 0x141   : > { %v2742_v42 = vpop.f32.mrf.mxu0 }
 0x142   : > { %v2855_v43 = vpop.f32.mrf.mxu1  ;;  %v6030_v49 = vadd.f32 %v2853_v39, %v2741_v41  ;;  %v2743_v51 = vadd.f32 %v2742_v42, %v5932_v44  ;;  %v4887_v42 = vld [vmem:[%s5191_s9 + $0x40] ss:$68 sps:$4 sm:$0xff]  }
 0x143   : > { %v2744_v55 = vpop.f32.mrf.mxu0 }
 0x144   : > { %v2857_v56 = vpop.f32.mrf.mxu1  ;;  %v6035_v58 = vadd.f32 %v2855_v43, %v2743_v51  ;;  %v2745_v59 = vadd.f32 %v2744_v55, %v5936_v48  ;;  %v4888_v43 = vld [vmem:[%s5191_s9 + $0x260] ss:$68 sps:$4 sm:$0xff]  }
 0x145   : > { %v2748_v60 = vpop.f32.mrf.mxu0  ;;  %3425 = vmatmul.mubr.bf16.gmra.mxu0 %v4875_v46 }
 0x146   : > { %v2861_v62 = vpop.f32.mrf.mxu1  ;;  %3538 = vmatmul.mubr.bf16.gmra.mxu1 %v4878_v47  ;;  %v6038_v0 = vadd.f32 %v2857_v56, %v2745_v59  ;;  %v2749_v1 = vadd.f32 %v2748_v60, %v5932_v44  ;;  %3434 = vmatprep.mubr.bf16.mxu0 %v4883_v52 }
 0x147   : > { %3547 = vmatprep.mubr.bf16.mxu1 %v4886_v53  ;;  %v2750_v2 = vpop.f32.mrf.mxu0 }
 0x148   : > { %v2863_v3 = vpop.f32.mrf.mxu1  ;;  %v6041_v6 = vadd.f32 %v2861_v62, %v2749_v1  ;;  %v2751_v7 = vadd.f32 %v2750_v2, %v5936_v48 }
 0x149   : > { %v2752_v9 = vpop.f32.mrf.mxu0 }
 0x14a   : > { %v2865_v11 = vpop.f32.mrf.mxu1  ;;  %v6046_v16 = vadd.f32 %v2863_v3, %v2751_v7  ;;  %v2753_v17 = vadd.f32 %v2752_v9, %v5932_v44  ;;  %v4889_v9 = vld [vmem:[%s5191_s9 + $0xc8] ss:$68 sps:$4 sm:$0xff]  }
 0x14b   : > { %v2754_v19 = vpop.f32.mrf.mxu0 }
 0x14c   : > { %v2867_v20 = vpop.f32.mrf.mxu1  ;;  %v6049_v21 = vadd.f32 %v2865_v11, %v2753_v17  ;;  %v2755_v23 = vadd.f32 %v2754_v19, %v5936_v48  ;;  %v4890_v11 = vld [vmem:[%s5191_s9 + $0x2e8] ss:$68 sps:$4 sm:$0xff]  }
 0x14d   : > { %v2758_v25 = vpop.f32.mrf.mxu0  ;;  %3435 = vmatmul.mubr.bf16.gmra.mxu0 %v4881_v13 }
 0x14e   : > { %v2871_v26 = vpop.f32.mrf.mxu1  ;;  %3548 = vmatmul.mubr.bf16.gmra.mxu1 %v4884_v14  ;;  %v6052_v27 = vadd.f32 %v2867_v20, %v2755_v23  ;;  %v2759_v29 = vadd.f32 %v2758_v25, %v5932_v44  ;;  %3590 = vmatprep.mubr.bf16.mxu0 %v4973_v31 }
 0x14f   : > { %3630 = vmatprep.mubr.bf16.mxu1 %v4973_v31  ;;  %v2760_v33 = vpop.f32.mrf.mxu0 }
 0x150   : > { %v2873_v34 = vpop.f32.mrf.mxu1  ;;  %v6057_v36 = vadd.f32 %v2871_v26, %v2759_v29  ;;  %v2761_v37 = vadd.f32 %v2760_v33, %v5936_v48 }
 0x151   : > { %v2762_v39 = vpop.f32.mrf.mxu0 }
 0x152   : > { %v2875_v41 = vpop.f32.mrf.mxu1  ;;  %v6062_v46 = vadd.f32 %v2873_v34, %v2761_v37  ;;  %v2763_v47 = vadd.f32 %v2762_v39, %v5932_v44  ;;  %v4891_v39 = vld [vmem:[%s5191_s9 + $0x150] ss:$68 sps:$4 sm:$0xff]  }
 0x153   : > { %v2764_v51 = vpop.f32.mrf.mxu0 }
 0x154   : > { %v2877_v52 = vpop.f32.mrf.mxu1  ;;  %v6065_v53 = vadd.f32 %v2875_v41, %v2763_v47  ;;  %v2765_v55 = vadd.f32 %v2764_v51, %v5936_v48  ;;  %v4892_v41 = vld [vmem:[%s5191_s9 + $0x370] ss:$68 sps:$4 sm:$0xff]  }
 0x155   : > { %v2914_v56 = vpop.f32.mrf.mxu0  ;;  %4227 = vmatmul.mubr.msk.bf16.vlgmr.msra.gmra.mxu0 %vm2622_vm1, %v4887_v42 }
 0x156   : > { %v3027_v59 = vpop.f32.mrf.mxu1  ;;  %4231 = vmatmul.mubr.msk.bf16.vlgmr.msra.gmra.mxu1 %vm2622_vm1, %v4888_v43  ;;  %v6070_v60 = vadd.f32 %v2877_v52, %v2765_v55  ;;  %v2915_v62 = vadd.f32 %v2914_v56, %v5946_v57  ;;  %3600 = vmatprep.mubr.bf16.mxu0 %v4973_v31 }
 0x157   : > { %3640 = vmatprep.mubr.bf16.mxu1 %v4973_v31  ;;  %v2916_v44 = vpop.f32.mrf.mxu0 }
 0x158   : > { %v3029_v1 = vpop.f32.mrf.mxu1  ;;  %v6075_v2 = vadd.f32 %v3027_v59, %v2915_v62  ;;  %v2917_v48 = vadd.f32 %v2916_v44, %v5951_v63 }
 0x159   : > { %v2918_v3 = vpop.f32.mrf.mxu0 }
 0x15a   : > { %v3031_v7 = vpop.f32.mrf.mxu1  ;;  %v6080_v13 = vadd.f32 %v3029_v1, %v2917_v48  ;;  %v2919_v14 = vadd.f32 %v2918_v3, %v5955_v4  ;;  %v4893_v3 = vld [vmem:[%s5191_s9 + $0x1d8] ss:$68 sps:$4 sm:$0xff]  }
 0x15b   : > { %v2920_v17 = vpop.f32.mrf.mxu0 }
 0x15c   : > { %v3033_v57 = vpop.f32.mrf.mxu1  ;;  %v6083_v19 = vadd.f32 %v3031_v7, %v2919_v14  ;;  %v2921_v20 = vadd.f32 %v2920_v17, %v5958_v8  ;;  %v4894_v7 = vld [vmem:[%s5191_s9 + $0x3f8] ss:$68 sps:$4 sm:$0xff]   ;;  %s208_s9 = sand.u32 1, %s4955_s13  }
 0x15d   : > { %v2924_v23 = vpop.f32.mrf.mxu0  ;;  %4228 = vmatmul.mubr.msk.bf16.gmra.mxu0 %vm2622_vm1, %v4889_v9  ;;  %s3827_s8 = sshll.u32 %s208_s9, 8  ;;  %s6518_s21 = scalar_lea.sflag [#allocation3], %s208_s9 }
 0x15e   : > { %v3037_v25 = vpop.f32.mrf.mxu1  ;;  %4232 = vmatmul.mubr.msk.bf16.gmra.mxu1 %vm2622_vm1, %v4890_v11  ;;  %v6088_v63 = vadd.f32 %v3033_v57, %v2921_v20  ;;  %v2925_v26 = vadd.f32 %v2924_v23, %v5961_v12  ;;  %3610 = vmatprep.mubr.bf16.mxu0 %v4973_v31  ;;  %s6405_s7 = scalar_lea.vmem [#allocation2], %s3827_s8 }
 0x15f   : > { %3650 = vmatprep.mubr.bf16.mxu1 %v4973_v31  ;;  %v2926_v4 = vpop.f32.mrf.mxu0  ;;  %s3720_s11 = sshll.u32 %s6405_s7, 4  ;;  %s6510_s11 = int_to_ptr.vmem [resolvable:$true] %s3720_s11 }
 0x160   : > { %v3039_v29 = vpop.f32.mrf.mxu1  ;;  %v6093_v33 = vadd.f32 %v3037_v25, %v2925_v26  ;;  %v2927_v8 = vadd.f32 %v2926_v4, %v5966_v18  ;;  %s4895_s26 = scalar_lea.vmem %s6510_s11, 4096  ;;  %p4902_p1 = scmp.lt.s32.totalorder %s6510_s11, %s4900_s28 }
 0x161   : > { %v2928_v34 = vpop.f32.mrf.mxu0  ;;  %p4896_p12 = scmp.ne.s32.totalorder %s6510_s11, %s4895_s26  ;;  %p4903_p2 = scmp.lt.s32.totalorder %s4901_s23, %s4895_s26 }
 0x162   : > { %v3041_v37 = vpop.f32.mrf.mxu1  ;;  %v6098_v42 = vadd.f32 %v3039_v29, %v2927_v8  ;;  %v2929_v43 = vadd.f32 %v2928_v34, %v5971_v24 }
 0x163   : > { %v2930_v47 = vpop.f32.mrf.mxu0  ;;  %p4897_p13 = pnand %p4896_p12, %p5037_p4  ;;  %p4904_p3 = por %p4903_p2, %p4902_p1 }
 0x164   : > { %v3043_v12 = vpop.f32.mrf.mxu1  ;;  %v6101_v51 = vadd.f32 %v3041_v37, %v2929_v43  ;;  %v2931_v52 = vadd.f32 %v2930_v47, %v5974_v28 }
 0x165   : > { %v2934_v55 = vpop.f32.mrf.mxu0  ;;  %4229 = vmatmul.mubr.msk.bf16.gmra.mxu0 %vm2622_vm1, %v4891_v39  ;;  %p4898_p0 = pneg %p4897_p13 }
 0x166   : > { %v3047_v56 = vpop.f32.mrf.mxu1  ;;  %4233 = vmatmul.mubr.msk.bf16.gmra.mxu1 %vm2622_vm1, %v4892_v41  ;;  %v6106_v18 = vadd.f32 %v3043_v12, %v2931_v52  ;;  %v2935_v59 = vadd.f32 %v2934_v55, %v5977_v32  ;;  %3620 = vmatprep.mubr.bf16.mxu0 %v4973_v31 }
 0x167   : > { %3660 = vmatprep.mubr.bf16.mxu1 %v4973_v31  ;;  %v2936_v24 = vpop.f32.mrf.mxu0  ;;  %p4905_p5 = pnand %p4904_p3, %p4898_p0 }
 0x168   : > { %v3049_v62 = vpop.f32.mrf.mxu1  ;;  %v6111_v44 = vadd.f32 %v3047_v56, %v2935_v59  ;;  %v2937_v28 = vadd.f32 %v2936_v24, %v5982_v38 }
 0x169   : > { %v2938_v1 = vpop.f32.mrf.mxu0 }
 0x16a   : > { %v3051_v48 = vpop.f32.mrf.mxu1  ;;  %v6116_v9 = vadd.f32 %v3049_v62, %v2937_v28  ;;  %v2939_v11 = vadd.f32 %v2938_v1, %v5987_v45 }
 0x16b   : > { %v2940_v14 = vpop.f32.mrf.mxu0 }
 0x16c   : > { %v3053_v32 = vpop.f32.mrf.mxu1  ;;  %v6119_v17 = vadd.f32 %v3051_v48, %v2939_v11  ;;  %v2941_v31 = vadd.f32 %v2940_v14, %v5990_v50 }
 0x16d   : > { %v2944_v57 = vpop.f32.mrf.mxu0  ;;  %4230 = vmatmul.mubr.msk.bf16.gmra.mxu0 %vm2622_vm1, %v4893_v3 }
 0x16e   : > { %v3057_v20 = vpop.f32.mrf.mxu1  ;;  %4234 = vmatmul.mubr.msk.bf16.gmra.mxu1 %vm2622_vm1, %v4894_v7  ;;  %v6124_v38 = vadd.f32 %v3053_v32, %v2941_v31  ;;  %v2945_v23 = vadd.f32 %v2944_v57, %v5993_v54 }
 0x16f   : > { %v2946_v25 = vpop.f32.mrf.mxu0 }
 0x170   : > { %v3059_v26 = vpop.f32.mrf.mxu1  ;;  %v6127_v4 = vadd.f32 %v3057_v20, %v2945_v23  ;;  %v2947_v45 = vadd.f32 %v2946_v25, %v5998_v61 }
 0x171   : > { %v2948_v29 = vpop.f32.mrf.mxu0 }
 0x172   : > { %v3061_v8 = vpop.f32.mrf.mxu1  ;;  %v6130_v34 = vadd.f32 %v3059_v26, %v2947_v45  ;;  %v2949_v50 = vadd.f32 %v2948_v29, %v6003_v5 }
 0x173   : > { %v2950_v37 = vpop.f32.mrf.mxu0 }
 0x174   : > { %v3063_v39 = vpop.f32.mrf.mxu1  ;;  %v6133_v41 = vadd.f32 %v3061_v8, %v2949_v50  ;;  %v2951_v43 = vadd.f32 %v2950_v37, %v6006_v10 }
 0x175   : > { %v2954_v47 = vpop.f32.mrf.mxu0 }
 0x176   : > { %v3067_v54 = vpop.f32.mrf.mxu1  ;;  %v6136_v12 = vadd.f32 %v3063_v39, %v2951_v43  ;;  %v2955_v52 = vadd.f32 %v2954_v47, %v6009_v15 }
 0x177   : > { %v2956_v55 = vpop.f32.mrf.mxu0 }
 0x178   : > { %v3069_v61 = vpop.f32.mrf.mxu1  ;;  %v6139_v56 = vadd.f32 %v3067_v54, %v2955_v52  ;;  %v2957_v59 = vadd.f32 %v2956_v55, %v6014_v22 }
 0x179   : > { %v2958_v24 = vpop.f32.mrf.mxu0 }
 0x17a   : > { %v3071_v5 = vpop.f32.mrf.mxu1  ;;  %v6142_v62 = vadd.f32 %v3069_v61, %v2957_v59  ;;  %v2959_v28 = vadd.f32 %v2958_v24, %v6019_v30 }
 0x17b   : > { %v2960_v1 = vpop.f32.mrf.mxu0 }
 0x17c   : > { %v3073_v10 = vpop.f32.mrf.mxu1  ;;  %v6145_v48 = vadd.f32 %v3071_v5, %v2959_v28  ;;  %v2961_v3 = vadd.f32 %v2960_v1, %v6022_v35 }
 0x17d   : > { %v2964_v7 = vpop.f32.mrf.mxu0 }
 0x17e   : > { %v3077_v15 = vpop.f32.mrf.mxu1  ;;  %v6148_v11 = vadd.f32 %v3073_v10, %v2961_v3  ;;  %v2965_v14 = vadd.f32 %v2964_v7, %v6025_v40 }
 0x17f   : > { %v2966_v32 = vpop.f32.mrf.mxu0 }
 0x180   : > { %v3079_v22 = vpop.f32.mrf.mxu1  ;;  %v6151_v31 = vadd.f32 %v3077_v15, %v2965_v14  ;;  %v2967_v57 = vadd.f32 %v2966_v32, %v6030_v49 }
 0x181   : > { %v2968_v20 = vpop.f32.mrf.mxu0 }
 0x182   : > { %v3081_v30 = vpop.f32.mrf.mxu1  ;;  %v6154_v23 = vadd.f32 %v3079_v22, %v2967_v57  ;;  %v2969_v25 = vadd.f32 %v2968_v20, %v6035_v58 }
 0x183   : > { %v2970_v26 = vpop.f32.mrf.mxu0 }
 0x184   : > { %v3083_v35 = vpop.f32.mrf.mxu1  ;;  %v6157_v45 = vadd.f32 %v3081_v30, %v2969_v25  ;;  %v2971_v29 = vadd.f32 %v2970_v26, %v6038_v0 }
 0x185   : > { %v2974_v8 = vpop.f32.mrf.mxu0 }
 0x186   : > { %v3087_v40 = vpop.f32.mrf.mxu1  ;;  %v6160_v50 = vadd.f32 %v3083_v35, %v2971_v29  ;;  %v2975_v37 = vadd.f32 %v2974_v8, %v6041_v6 }
 0x187   : > { %v2976_v39 = vpop.f32.mrf.mxu0 }
 0x188   : > { %v3089_v49 = vpop.f32.mrf.mxu1  ;;  %v6163_v43 = vadd.f32 %v3087_v40, %v2975_v37  ;;  %v2977_v47 = vadd.f32 %v2976_v39, %v6046_v16 }
 0x189   : > { %v2978_v54 = vpop.f32.mrf.mxu0 }
 0x18a   : > { %v3091_v58 = vpop.f32.mrf.mxu1  ;;  %v6166_v52 = vadd.f32 %v3089_v49, %v2977_v47  ;;  %v2979_v55 = vadd.f32 %v2978_v54, %v6049_v21 }
 0x18b   : > { %v2980_v61 = vpop.f32.mrf.mxu0 }
 0x18c   : > { %v3093_v0 = vpop.f32.mrf.mxu1  ;;  %v6169_v59 = vadd.f32 %v3091_v58, %v2979_v55  ;;  %v2981_v24 = vadd.f32 %v2980_v61, %v6052_v27 }
 0x18d   : > { %v2984_v5 = vpop.f32.mrf.mxu0 }
 0x18e   : > { %v3097_v6 = vpop.f32.mrf.mxu1  ;;  %v6172_v28 = vadd.f32 %v3093_v0, %v2981_v24  ;;  %v2985_v1 = vadd.f32 %v2984_v5, %v6057_v36 }
 0x18f   : > { %v2986_v10 = vpop.f32.mrf.mxu0 }
 0x190   : > { %v3099_v16 = vpop.f32.mrf.mxu1  ;;  %v6175_v3 = vadd.f32 %v3097_v6, %v2985_v1  ;;  %v2987_v7 = vadd.f32 %v2986_v10, %v6062_v46 }
 0x191   : > { %v2988_v15 = vpop.f32.mrf.mxu0 }
 0x192   : > { %v3101_v21 = vpop.f32.mrf.mxu1  ;;  %v6178_v14 = vadd.f32 %v3099_v16, %v2987_v7  ;;  %v2989_v32 = vadd.f32 %v2988_v15, %v6065_v53 }
 0x193   : > { %v2990_v22 = vpop.f32.mrf.mxu0 }
 0x194   : > { %v3103_v27 = vpop.f32.mrf.mxu1  ;;  %v6181_v57 = vadd.f32 %v3101_v21, %v2989_v32  ;;  %v2991_v20 = vadd.f32 %v2990_v22, %v6070_v60 }
 0x195   : > { %v3140_v30 = vpop.f32.mrf.mxu0 }
 0x196   : > { %v3253_v36 = vpop.f32.mrf.mxu1  ;;  %v6184_v25 = vadd.f32 %v3103_v27, %v2991_v20  ;;  %v3141_v26 = vadd.f32 %v3140_v30, %v6075_v2 }
 0x197   : > { %v3142_v35 = vpop.f32.mrf.mxu0 }
 0x198   : > { %v3255_v46 = vpop.f32.mrf.mxu1  ;;  %v6187_v29 = vadd.f32 %v3253_v36, %v3141_v26  ;;  %v3143_v8 = vadd.f32 %v3142_v35, %v6080_v13 }
 0x199   : > { %v3144_v40 = vpop.f32.mrf.mxu0 }
 0x19a   : > { %v3257_v53 = vpop.f32.mrf.mxu1  ;;  %v6190_v37 = vadd.f32 %v3255_v46, %v3143_v8  ;;  %v3145_v39 = vadd.f32 %v3144_v40, %v6083_v19 }
 0x19b   : > { %v3146_v49 = vpop.f32.mrf.mxu0 }
 0x19c   : > { %v3259_v60 = vpop.f32.mrf.mxu1  ;;  %v6193_v47 = vadd.f32 %v3257_v53, %v3145_v39  ;;  %v3147_v54 = vadd.f32 %v3146_v49, %v6088_v63 }
 0x19d   : > { %v3150_v58 = vpop.f32.mrf.mxu0 }
 0x19e   : > { %v3263_v2 = vpop.f32.mrf.mxu1  ;;  %v6196_v55 = vadd.f32 %v3259_v60, %v3147_v54  ;;  %v3151_v61 = vadd.f32 %v3150_v58, %v6093_v33 }
 0x19f   : > { %v3152_v0 = vpop.f32.mrf.mxu0 }
 0x1a0   : > { %v3265_v13 = vpop.f32.mrf.mxu1  ;;  %v6199_v24 = vadd.f32 %v3263_v2, %v3151_v61  ;;  %v3153_v5 = vadd.f32 %v3152_v0, %v6098_v42 }
 0x1a1   : > { %v3154_v6 = vpop.f32.mrf.mxu0 }
 0x1a2   : > { %v3267_v19 = vpop.f32.mrf.mxu1  ;;  %v6202_v1 = vadd.f32 %v3265_v13, %v3153_v5  ;;  %v3155_v10 = vadd.f32 %v3154_v6, %v6101_v51 }
 0x1a3   : > { %v3156_v16 = vpop.f32.mrf.mxu0 }
 0x1a4   : > { %v3269_v63 = vpop.f32.mrf.mxu1  ;;  %v6205_v7 = vadd.f32 %v3267_v19, %v3155_v10  ;;  %v3157_v15 = vadd.f32 %v3156_v16, %v6106_v18 }
 0x1a5   : > { %v3160_v21 = vpop.f32.mrf.mxu0 }
 0x1a6   : > { %v3273_v33 = vpop.f32.mrf.mxu1  ;;  %v6208_v32 = vadd.f32 %v3269_v63, %v3157_v15  ;;  %v3161_v22 = vadd.f32 %v3160_v21, %v6111_v44 }
 0x1a7   : > { %v3162_v27 = vpop.f32.mrf.mxu0 }
 0x1a8   : > { %v3275_v42 = vpop.f32.mrf.mxu1  ;;  %v6211_v20 = vadd.f32 %v3273_v33, %v3161_v22  ;;  %v3163_v30 = vadd.f32 %v3162_v27, %v6116_v9 }
 0x1a9   : > { %v3164_v36 = vpop.f32.mrf.mxu0 }
 0x1aa   : > { %v3277_v51 = vpop.f32.mrf.mxu1  ;;  %v6214_v26 = vadd.f32 %v3275_v42, %v3163_v30  ;;  %v3165_v35 = vadd.f32 %v3164_v36, %v6119_v17 }
 0x1ab   : > { %v3166_v46 = vpop.f32.mrf.mxu0 }
 0x1ac   : > { %v3279_v18 = vpop.f32.mrf.mxu1  ;;  %v6217_v8 = vadd.f32 %v3277_v51, %v3165_v35  ;;  %v3167_v40 = vadd.f32 %v3166_v46, %v6124_v38 }
 0x1ad   : > { %v3170_v53 = vpop.f32.mrf.mxu0 }
 0x1ae   : > { %6569 = vst [vmem:[#allocation5_spill] sm:$0xff] %v6217_v8  ;;  %v3283_v44 = vpop.f32.mrf.mxu1  ;;  %v6220_v39 = vadd.f32 %v3279_v18, %v3167_v40  ;;  %v3171_v49 = vadd.f32 %v3170_v53, %v6127_v4 }
 0x1af   : > { %v3172_v60 = vpop.f32.mrf.mxu0 }
 0x1b0   : > { %6570 = vst [vmem:[#allocation6_spill] sm:$0xff] %v6220_v39  ;;  %v3285_v9 = vpop.f32.mrf.mxu1  ;;  %v6223_v54 = vadd.f32 %v3283_v44, %v3171_v49  ;;  %v3173_v58 = vadd.f32 %v3172_v60, %v6130_v34 }
 0x1b1   : > { %v3174_v2 = vpop.f32.mrf.mxu0 }
 0x1b2   : > { %6571 = vst [vmem:[#allocation7_spill] sm:$0xff] %v6223_v54  ;;  %v3287_v17 = vpop.f32.mrf.mxu1  ;;  %v6226_v61 = vadd.f32 %v3285_v9, %v3173_v58  ;;  %v3175_v0 = vadd.f32 %v3174_v2, %v6133_v41 }
 0x1b3   : > { %v3176_v13 = vpop.f32.mrf.mxu0 }
 0x1b4   : > { %6572 = vst [vmem:[#allocation8_spill] sm:$0xff] %v6226_v61  ;;  %v3289_v38 = vpop.f32.mrf.mxu1  ;;  %v6229_v5 = vadd.f32 %v3287_v17, %v3175_v0  ;;  %v3177_v6 = vadd.f32 %v3176_v13, %v6136_v12 }
 0x1b5   : > { %v3180_v19 = vpop.f32.mrf.mxu0 }
 0x1b6   : > { %6573 = vst [vmem:[#allocation9_spill] sm:$0xff] %v6229_v5  ;;  %v3293_v4 = vpop.f32.mrf.mxu1  ;;  %v6232_v10 = vadd.f32 %v3289_v38, %v3177_v6  ;;  %v3181_v16 = vadd.f32 %v3180_v19, %v6139_v56 }
 0x1b7   : > { %v3182_v63 = vpop.f32.mrf.mxu0 }
 0x1b8   : > { %6574 = vst [vmem:[#allocation10_spill] sm:$0xff] %v6232_v10  ;;  %v3295_v34 = vpop.f32.mrf.mxu1  ;;  %v6235_v15 = vadd.f32 %v3293_v4, %v3181_v16  ;;  %v3183_v21 = vadd.f32 %v3182_v63, %v6142_v62 }
 0x1b9   : > { %v3184_v33 = vpop.f32.mrf.mxu0 }
 0x1ba   : > { %v3297_v41 = vpop.f32.mrf.mxu1  ;;  %v6238_v22 = vadd.f32 %v3295_v34, %v3183_v21  ;;  %v3185_v27 = vadd.f32 %v3184_v33, %v6145_v48 }
 0x1bb   : > { %v3186_v42 = vpop.f32.mrf.mxu0 }
 0x1bc   : > { %v3299_v12 = vpop.f32.mrf.mxu1  ;;  %v6241_v30 = vadd.f32 %v3297_v41, %v3185_v27  ;;  %v3187_v36 = vadd.f32 %v3186_v42, %v6148_v11 }
 0x1bd   : > { %v3190_v51 = vpop.f32.mrf.mxu0 }
 0x1be   : > { %v3303_v56 = vpop.f32.mrf.mxu1  ;;  %v6244_v35 = vadd.f32 %v3299_v12, %v3187_v36  ;;  %v3191_v46 = vadd.f32 %v3190_v51, %v6151_v31 }
 0x1bf   : > { %v3192_v18 = vpop.f32.mrf.mxu0 }
 0x1c0   : > { %v3305_v62 = vpop.f32.mrf.mxu1  ;;  %v6247_v40 = vadd.f32 %v3303_v56, %v3191_v46  ;;  %v3193_v53 = vadd.f32 %v3192_v18, %v6154_v23 }
 0x1c1   : > { %v3194_v44 = vpop.f32.mrf.mxu0 }
 0x1c2   : > { %v3307_v48 = vpop.f32.mrf.mxu1  ;;  %v6250_v49 = vadd.f32 %v3305_v62, %v3193_v53  ;;  %v3195_v60 = vadd.f32 %v3194_v44, %v6157_v45 }
 0x1c3   : > { %v3196_v9 = vpop.f32.mrf.mxu0 }
 0x1c4   : > { %v3309_v11 = vpop.f32.mrf.mxu1  ;;  %v6253_v58 = vadd.f32 %v3307_v48, %v3195_v60  ;;  %v3197_v2 = vadd.f32 %v3196_v9, %v6160_v50 }
 0x1c5   : > { %v3200_v17 = vpop.f32.mrf.mxu0 }
 0x1c6   : > { %v3313_v31 = vpop.f32.mrf.mxu1  ;;  %v6256_v0 = vadd.f32 %v3309_v11, %v3197_v2  ;;  %v3201_v13 = vadd.f32 %v3200_v17, %v6163_v43 }
 0x1c7   : > { %v3202_v38 = vpop.f32.mrf.mxu0 }
 0x1c8   : > { %v3315_v23 = vpop.f32.mrf.mxu1  ;;  %v6259_v6 = vadd.f32 %v3313_v31, %v3201_v13  ;;  %v3203_v19 = vadd.f32 %v3202_v38, %v6166_v52 }
 0x1c9   : > { %v3204_v4 = vpop.f32.mrf.mxu0 }
 0x1ca   : > { %v3317_v45 = vpop.f32.mrf.mxu1  ;;  %v6262_v16 = vadd.f32 %v3315_v23, %v3203_v19  ;;  %v3205_v63 = vadd.f32 %v3204_v4, %v6169_v59 }
 0x1cb   : > { %v3206_v34 = vpop.f32.mrf.mxu0 }
 0x1cc   : > { %6575 = vst [vmem:[#allocation11_spill] sm:$0xff] %v6262_v16  ;;  %v3319_v50 = vpop.f32.mrf.mxu1  ;;  %v6265_v21 = vadd.f32 %v3317_v45, %v3205_v63  ;;  %v3207_v33 = vadd.f32 %v3206_v34, %v6172_v28 }
 0x1cd   : > { %v3210_v41 = vpop.f32.mrf.mxu0 }
 0x1ce   : > { %6576 = vst [vmem:[#allocation12_spill] sm:$0xff] %v6265_v21  ;;  %v3323_v43 = vpop.f32.mrf.mxu1  ;;  %v6268_v27 = vadd.f32 %v3319_v50, %v3207_v33  ;;  %v3211_v42 = vadd.f32 %v3210_v41, %v6175_v3 }
 0x1cf   : > { %v3212_v12 = vpop.f32.mrf.mxu0 }
 0x1d0   : > { %6577 = vst [vmem:[#allocation13_spill] sm:$0xff] %v6268_v27  ;;  %v3325_v52 = vpop.f32.mrf.mxu1  ;;  %v6271_v36 = vadd.f32 %v3323_v43, %v3211_v42  ;;  %v3213_v51 = vadd.f32 %v3212_v12, %v6178_v14 }
 0x1d1   : > { %v3214_v56 = vpop.f32.mrf.mxu0 }
 0x1d2   : > { %6578 = vst [vmem:[#allocation14_spill] sm:$0xff] %v6271_v36  ;;  %v3327_v59 = vpop.f32.mrf.mxu1  ;;  %v6274_v46 = vadd.f32 %v3325_v52, %v3213_v51  ;;  %v3215_v18 = vadd.f32 %v3214_v56, %v6181_v57 }
 0x1d3   : > { %v3216_v62 = vpop.f32.mrf.mxu0 }
 0x1d4   : > { %6579 = vst [vmem:[#allocation15_spill] sm:$0xff] %v6274_v46  ;;  %v3329_v28 = vpop.f32.mrf.mxu1  ;;  %v6277_v53 = vadd.f32 %v3327_v59, %v3215_v18  ;;  %v3217_v44 = vadd.f32 %v3216_v62, %v6184_v25 }
 0x1d5   : > { %v3366_v48 = vpop.f32.mrf.mxu0 }
 0x1d6   : > { %6580 = vst [vmem:[#allocation16_spill] sm:$0xff] %v6277_v53  ;;  %v6280_v3 = vpop.f32.mrf.mxu1  ;;  %v6282_v60 = vadd.f32 %v3329_v28, %v3217_v44 }
 0x1d7   : > { %v3368_v9 = vpop.f32.mrf.mxu0 }
 0x1d8   : > { %6581 = vst [vmem:[#allocation17_spill] sm:$0xff] %v6282_v60  ;;  %v6284_v11 = vpop.f32.mrf.mxu1 }
 0x1d9   : > { %v6286_v14 = vpop.f32.mrf.mxu0 }
 0x1da   : > { %v6288_v2 = vpop.f32.mrf.mxu1 }
 0x1db   : > { %v6290_v17 = vpop.f32.mrf.mxu0 }
 0x1dc   : > { %v6292_v57 = vpop.f32.mrf.mxu1 }
 0x1dd   : > { %v6294_v31 = vpop.f32.mrf.mxu0 }
 0x1de   : > { %v6296_v13 = vpop.f32.mrf.mxu1 }
 0x1df   : > { %v6298_v25 = vpop.f32.mrf.mxu0 }
 0x1e0   : > { %v6300_v38 = vpop.f32.mrf.mxu1 }
 0x1e1   : > { %v6302_v23 = vpop.f32.mrf.mxu0 }
 0x1e2   : > { %v6304_v19 = vpop.f32.mrf.mxu1 }
 0x1e3   : > { %v6306_v4 = vpop.f32.mrf.mxu0 }
 0x1e4   : > { %v6308_v45 = vpop.f32.mrf.mxu1 }
 0x1e5   : > { %v6310_v63 = vpop.f32.mrf.mxu0 }
 0x1e6   : > { %v6312_v34 = vpop.f32.mrf.mxu1 }
 0x1e7   : > { %6582 = vst [vmem:[#allocation18_spill] sm:$0xff] %v6312_v34  ;;  %v6314_v50 = vpop.f32.mrf.mxu0 }
 0x1e8   : > { %v6316_v33 = vpop.f32.mrf.mxu1 }
 0x1e9   : > { %6583 = vst [vmem:[#allocation19_spill] sm:$0xff] %v6316_v33  ;;  %v6318_v41 = vpop.f32.mrf.mxu0 }
 0x1ea   : > { %6584 = vst [vmem:[#allocation20_spill] sm:$0xff] %v6318_v41  ;;  %v6320_v43 = vpop.f32.mrf.mxu1 }
 0x1eb   : > { %6585 = vst [vmem:[#allocation21_spill] sm:$0xff] %v6320_v43  ;;  %v6322_v42 = vpop.f32.mrf.mxu0 }
 0x1ec   : > { %6586 = vst [vmem:[#allocation22_spill] sm:$0xff] %v6322_v42  ;;  %v6324_v12 = vpop.f32.mrf.mxu1 }
 0x1ed   : > { %6587 = vst [vmem:[#allocation23_spill] sm:$0xff] %v6324_v12  ;;  %v6326_v52 = vpop.f32.mrf.mxu0 }
 0x1ee   : > { %6588 = vst [vmem:[#allocation24_spill] sm:$0xff] %v6326_v52  ;;  %v6328_v51 = vpop.f32.mrf.mxu1 }
 0x1ef   : > { %6589 = vst [vmem:[#allocation25_spill] sm:$0xff] %v6328_v51  ;;  %v6330_v56 = vpop.f32.mrf.mxu0 }
 0x1f0   : > { %6590 = vst [vmem:[#allocation26_spill] sm:$0xff] %v6330_v56  ;;  %v6332_v59 = vpop.f32.mrf.mxu1 }
 0x1f1   : > { %6591 = vst [vmem:[#allocation27_spill] sm:$0xff] %v6332_v59  ;;  %v6334_v18 = vpop.f32.mrf.mxu0 }
 0x1f2   : > { %6592 = vst [vmem:[#allocation28_spill] sm:$0xff] %v6334_v18  ;;  %v6336_v62 = vpop.f32.mrf.mxu1 }
 0x1f3   : > { %6593 = vst [vmem:[#allocation29_spill] sm:$0xff] %v6336_v62  ;;  %v6338_v28 = vpop.f32.mrf.mxu0 }
 0x1f4   : > { %6594 = vst [vmem:[#allocation30_spill] sm:$0xff] %v6338_v28  ;;  %v6340_v44 = vpop.f32.mrf.mxu1 }
 0x1f5   : > { %6595 = vst [vmem:[#allocation31_spill] sm:$0xff] %v6340_v44  ;;  %v3406_v60 = vpop.f32.mrf.mxu0 }
 0x1f6   : > { %v3519_v10 = vpop.f32.mrf.mxu1 }
 0x1f7   : > { %v3408_v53 = vpop.f32.mrf.mxu0 }
 0x1f8   : > { %v3521_v5 = vpop.f32.mrf.mxu1 }
 0x1f9   : > { %v3410_v46 = vpop.f32.mrf.mxu0 }
 0x1fa   : > { %v3523_v61 = vpop.f32.mrf.mxu1 }
 0x1fb   : > { %v3412_v12 = vpop.f32.mrf.mxu0 }
 0x1fc   : > { %v3525_v51 = vpop.f32.mrf.mxu1 }
 0x1fd   : > { %v3416_v36 = vpop.f32.mrf.mxu0 }
 0x1fe   : > { %v6342_v56 = vpop.f32.mrf.mxu1 }
 0x1ff   : > { %v3418_v59 = vpop.f32.mrf.mxu0 }
 0x200   : > { %v6344_v52 = vpop.f32.mrf.mxu1 }
 0x201   : > { %v6346_v18 = vpop.f32.mrf.mxu0 }
 0x202   : > { %v6348_v62 = vpop.f32.mrf.mxu1 }
 0x203   : > { %v6350_v44 = vpop.f32.mrf.mxu0 }
 0x204   : > { %v6352_v28 = vpop.f32.mrf.mxu1 }
 0x205   : > { %v6354_v54 = vpop.f32.mrf.mxu0 }
 0x206   : > { %v6356_v43 = vpop.f32.mrf.mxu1 }
 0x207   : > { %6596 = vst [vmem:[#allocation32_spill] sm:$0xff] %v6356_v43  ;;  %v6358_v27 = vpop.f32.mrf.mxu0 }
 0x208   : > { %6597 = vst [vmem:[#allocation33_spill] sm:$0xff] %v6358_v27  ;;  %v6360_v42 = vpop.f32.mrf.mxu1  ;;  %v3407_v27 = vadd.f32 %v3406_v60, %v6235_v15  ;;  %v3373_v60 = vadd.f32 %v6290_v17, %v6196_v55 }
 0x209   : > { %6598 = vst [vmem:[#allocation34_spill] sm:$0xff] %v6360_v42  ;;  %v6362_v39 = vpop.f32.mrf.mxu0  ;;  %v3367_v42 = vadd.f32 %v3366_v48, %v6187_v29 }
 0x20a   : > { %6599 = vst [vmem:[#allocation35_spill] sm:$0xff] %v6362_v39  ;;  %v6364_v33 = vpop.f32.mrf.mxu1  ;;  %v3369_v39 = vadd.f32 %v3368_v9, %v6190_v37  ;;  %v3520_v15 = vadd.f32 %v3519_v10, %v3407_v27  ;;  %v3411_v37 = vadd.f32 %v3410_v46, %v6241_v30 }
 0x20b   : > { %6600 = vst [vmem:[#allocation36_spill] sm:$0xff] %v6364_v33  ;;  %v6366_v21 = vpop.f32.mrf.mxu0  ;;  %v3480_v29 = vadd.f32 %v6280_v3, %v3367_v42  ;;  %v3377_v3 = vadd.f32 %v6294_v31, %v6199_v24  ;;  %v3379_v24 = vadd.f32 %v6298_v25, %v6202_v1  ;;  %v3423_v42 = vadd.f32 %v6350_v44, %v6256_v0 }
 0x20c   : > { %6601 = vst [vmem:[#allocation37_spill] sm:$0xff] %v6366_v21  ;;  %v6368_v41 = vpop.f32.mrf.mxu1  ;;  %v3482_v48 = vadd.f32 %v6284_v11, %v3369_v39  ;;  %v3524_v30 = vadd.f32 %v3523_v61, %v3411_v37  ;;  %v3417_v39 = vadd.f32 %v3416_v36, %v6247_v40  ;;  %v3419_v36 = vadd.f32 %v3418_v59, %v6250_v49  ;;  %v6610_v37 = vld [vmem:[#allocation18_spill] sm:$0xff] }
 0x20d   : > { %6602 = vst [vmem:[#allocation38_spill] sm:$0xff] %v6368_v41  ;;  %v6370_v8 = vpop.f32.mrf.mxu0  ;;  %v3409_v41 = vadd.f32 %v3408_v53, %v6238_v22  ;;  %v3490_v17 = vadd.f32 %v6296_v13, %v3377_v3  ;;  %v3383_v13 = vadd.f32 %v6306_v4, %v6208_v32  ;;  %v3536_v44 = vadd.f32 %v6352_v28, %v3423_v42 }
 0x20e   : > { %v6372_v34 = vpop.f32.mrf.mxu1  ;;  %v3530_v1 = vadd.f32 %v6342_v56, %v3417_v39  ;;  %v6617_v39 = vld [vmem:[#allocation6_spill] sm:$0xff] }
 0x20f   : > { %6603 = vst [vmem:[#allocation39_spill] sm:$0xff] %v6372_v34  ;;  %v6374_v16 = vpop.f32.mrf.mxu0  ;;  %v3371_v34 = vadd.f32 %v6286_v14, %v6193_v47  ;;  %v3522_v9 = vadd.f32 %v3521_v5, %v3409_v41  ;;  %v3532_v41 = vadd.f32 %v6344_v52, %v3419_v36  ;;  %v3427_v52 = vadd.f32 %v6354_v54, %v6259_v6 }
 0x210   : > { %6604 = vst [vmem:[#allocation40_spill] sm:$0xff] %v6374_v16  ;;  %v6376_v43 = vpop.f32.mrf.mxu1 }
 0x211   : > { %6605 = vst [vmem:[#allocation41_spill] sm:$0xff] %v6376_v43  ;;  %v6382_v33 = vpop.f32.mrf.mxu0  ;;  %v6615_v28 = vld [vmem:[#allocation35_spill] sm:$0xff] }
 0x212   : > { %v6384_v21 = vpop.f32.mrf.mxu1 }
 0x213   : > { %6606 = vst [vmem:[#allocation42_spill] sm:$0xff] %v6384_v21  ;;  %v6391_v16 = vpop.f32.mrf.mxu0  ;;  %v3413_v21 = vadd.f32 %v3412_v12, %v6244_v35  ;;  %v3486_v35 = vadd.f32 %v6292_v57, %v3373_v60  ;;  %v3381_v57 = vadd.f32 %v6302_v23, %v6205_v7  ;;  %v6611_v60 = vld [vmem:[#allocation5_spill] sm:$0xff] }
 0x214   : > { %6607 = vst [vmem:[#allocation43_spill] sm:$0xff] %v6391_v16  ;;  %v6393_v43 = vpop.f32.mrf.mxu1  ;;  %v3484_v16 = vadd.f32 %v6288_v2, %v3371_v34  ;;  %v6621_v36 = vld [vmem:[#allocation37_spill] sm:$0xff] }
 0x215   : > { %v3592_v22 = vpop.f32.mrf.mxu0  ;;  %v3526_v40 = vadd.f32 %v3525_v51, %v3413_v21  ;;  %v3421_v21 = vadd.f32 %v6346_v18, %v6253_v58  ;;  %v3494_v51 = vadd.f32 %v6304_v19, %v3381_v57  ;;  %v3496_v18 = vadd.f32 %v6308_v45, %v3383_v13  ;;  %v6612_v45 = vld [vmem:[#allocation20_spill] sm:$0xff]  ;;  %v6622_v57 = vld [vmem:[#allocation21_spill] sm:$0xff] }
 0x216   : > { %v3632_v53 = vpop.f32.mrf.mxu1  ;;  %v3593_v47 = vadd.f32 %v3592_v22, %v3480_v29  ;;  %v3389_v19 = vadd.f32 %v6314_v50, %v6214_v26  ;;  %v6608_v29 = vld [vmem:[#allocation11_spill] sm:$0xff]  ;;  %v3391_v22 = vadd.f32 %v6612_v45, %v6611_v60  ;;  %v6637_v60 = vld [vmem:[#allocation16_spill] sm:$0xff] }
 0x217   : > { %v3633_v14 = vadd.f32 %v3632_v53, %v3520_v15  ;;  %v3594_v10 = vpop.f32.mrf.mxu0  ;;  %v3534_v56 = vadd.f32 %v6348_v62, %v3421_v21  ;;  %v6609_v62 = vld [vmem:[#allocation33_spill] sm:$0xff]  ;;  %v6613_v53 = vld [vmem:[#allocation32_spill] sm:$0xff]  ;;  %v3441_v45 = vadd.f32 %v6382_v33, %v6637_v60 }
 0x218   : > { %v3634_v27 = vpop.f32.mrf.mxu1  ;;  %3671 = vst [vmem:[%s6405_s7] sm:$0xff] %v3593_v47  ;;  %v3595_v55 = vadd.f32 %v3594_v10, %v3482_v48  ;;  %v3429_v15 = vadd.f32 %v6609_v62, %v6608_v29  ;;  %v6614_v47 = vld [vmem:[#allocation12_spill] sm:$0xff]  ;;  %v6634_v29 = vld [vmem:[#allocation9_spill] sm:$0xff] }
 0x219   : > { %3687 = vst [vmem:[%s6405_s7 + $0x80] sm:$0xff] %v3633_v14  ;;  %v3635_v5 = vadd.f32 %v3634_v27, %v3522_v9  ;;  %v3596_v61 = vpop.f32.mrf.mxu0  ;;  %v3540_v9 = vadd.f32 %v6613_v53, %v3427_v52  ;;  %v3431_v14 = vadd.f32 %v6615_v28, %v6614_v47  ;;  %v6616_v27 = vld [vmem:[#allocation19_spill] sm:$0xff]  ;;  %v6630_v52 = vld [vmem:[#allocation38_spill] sm:$0xff]  ;;  %v6635_v62 = vld [vmem:[#allocation28_spill] sm:$0xff] }
 0x21a   : > { %v3636_v46 = vpop.f32.mrf.mxu1  ;;  %3672 = vst [vmem:[%s6405_s7 + $0x8] sm:$0xff] %v3595_v55  ;;  %v3597_v11 = vadd.f32 %v3596_v61, %v3484_v16  ;;  %v3492_v16 = vadd.f32 %v6300_v38, %v3379_v24  ;;  %v3387_v38 = vadd.f32 %v6310_v63, %v6211_v20  ;;  %v6618_v55 = vld [vmem:[#allocation22_spill] sm:$0xff] }
 0x21b   : > { %3688 = vst [vmem:[%s6405_s7 + $0x88] sm:$0xff] %v3635_v5  ;;  %v3637_v2 = vadd.f32 %v3636_v46, %v3524_v30  ;;  %v3598_v31 = vpop.f32.mrf.mxu0  ;;  %v3502_v30 = vadd.f32 %v6616_v27, %v3389_v19  ;;  %v3393_v5 = vadd.f32 %v6618_v55, %v6617_v39  ;;  %v6619_v61 = vld [vmem:[#allocation34_spill] sm:$0xff]  ;;  %v6643_v39 = vld [vmem:[#allocation43_spill] sm:$0xff] }
 0x21c   : > { %v3638_v34 = vpop.f32.mrf.mxu1  ;;  %3673 = vst [vmem:[%s6405_s7 + $0x10] sm:$0xff] %v3597_v11  ;;  %v3599_v49 = vadd.f32 %v3598_v31, %v3486_v35  ;;  %v3500_v48 = vadd.f32 %v6610_v37, %v3387_v38  ;;  %v3542_v46 = vadd.f32 %v6619_v61, %v3429_v15  ;;  %v3504_v31 = vadd.f32 %v6622_v57, %v3391_v22  ;;  %v6629_v38 = vld [vmem:[#allocation26_spill] sm:$0xff]  ;;  %v6636_v37 = vld [vmem:[#allocation39_spill] sm:$0xff]  ;;  %v6644_v61 = vld [vmem:[#allocation29_spill] sm:$0xff] }
 0x21d   : > { %3689 = vst [vmem:[%s6405_s7 + $0x90] sm:$0xff] %v3637_v2  ;;  %v3639_v25 = vadd.f32 %v3638_v34, %v3526_v40  ;;  %v3602_v7 = vpop.f32.mrf.mxu0  ;;  %v6620_v40 = vld [vmem:[#allocation13_spill] sm:$0xff]  ;;  %v6623_v34 = vld [vmem:[#allocation7_spill] sm:$0xff]  ;;  %v3401_v15 = vadd.f32 %v6635_v62, %v6634_v29  ;;  %v6640_v47 = vld [vmem:[#allocation30_spill] sm:$0xff] }
 0x21e   : > { %v3642_v23 = vpop.f32.mrf.mxu1  ;;  %3674 = vst [vmem:[%s6405_s7 + $0x18] sm:$0xff] %v3599_v49  ;;  %v3603_v58 = vadd.f32 %v3602_v7, %v3490_v17  ;;  %v3433_v11 = vadd.f32 %v6621_v36, %v6620_v40  ;;  %v6626_v7 = vld [vmem:[#allocation14_spill] sm:$0xff] }
 0x21f   : > { %3690 = vst [vmem:[%s6405_s7 + $0x98] sm:$0xff] %v3639_v25  ;;  %v3643_v12 = vadd.f32 %v3642_v23, %v3530_v1  ;;  %v3604_v32 = vpop.f32.mrf.mxu0  ;;  %v6624_v1 = vld [vmem:[#allocation24_spill] sm:$0xff]  ;;  %v3437_v23 = vadd.f32 %v6370_v8, %v6626_v7  ;;  %v6645_v40 = vld [vmem:[#allocation42_spill] sm:$0xff] }
 0x220   : > { %v3644_v4 = vpop.f32.mrf.mxu1  ;;  %3675 = vst [vmem:[%s6405_s7 + $0x20] sm:$0xff] %v3603_v58  ;;  %v3605_v0 = vadd.f32 %v3604_v32, %v3492_v16  ;;  %v3397_v21 = vadd.f32 %v6624_v1, %v6623_v34  ;;  %v6625_v16 = vld [vmem:[#allocation36_spill] sm:$0xff]  ;;  %v6627_v58 = vld [vmem:[#allocation23_spill] sm:$0xff]  ;;  %v3554_v36 = vadd.f32 %v6645_v40, %v3441_v45 }
 0x221   : > { %3691 = vst [vmem:[%s6405_s7 + $0xa0] sm:$0xff] %v3643_v12  ;;  %v3645_v59 = vadd.f32 %v3644_v4, %v3532_v41  ;;  %v3606_v20 = vpop.f32.mrf.mxu0  ;;  %v3544_v13 = vadd.f32 %v6625_v16, %v3431_v14  ;;  %v3506_v12 = vadd.f32 %v6627_v58, %v3393_v5 }
 0x222   : > { %v3646_v63 = vpop.f32.mrf.mxu1  ;;  %3676 = vst [vmem:[%s6405_s7 + $0x28] sm:$0xff] %v3605_v0  ;;  %v3607_v54 = vadd.f32 %v3606_v20, %v3494_v51  ;;  %v6628_v51 = vld [vmem:[#allocation8_spill] sm:$0xff]  ;;  %v3546_v0 = vadd.f32 %v6630_v52, %v3433_v11 }
 0x223   : > { %3692 = vst [vmem:[%s6405_s7 + $0xa8] sm:$0xff] %v3645_v59  ;;  %v3647_v6 = vadd.f32 %v3646_v63, %v3534_v56  ;;  %v3608_v26 = vpop.f32.mrf.mxu0  ;;  %v3399_v32 = vadd.f32 %v6629_v38, %v6628_v51  ;;  %v6631_v59 = vld [vmem:[#allocation15_spill] sm:$0xff]  ;;  %v6633_v63 = vld [vmem:[#allocation25_spill] sm:$0xff] }
 0x224   : > { %v3648_v50 = vpop.f32.mrf.mxu1  ;;  %3677 = vst [vmem:[%s6405_s7 + $0x30] sm:$0xff] %v3607_v54  ;;  %v3609_v3 = vadd.f32 %v3608_v26, %v3496_v18  ;;  %v6632_v18 = vld [vmem:[#allocation40_spill] sm:$0xff] }
 0x225   : > { %3693 = vst [vmem:[%s6405_s7 + $0xb0] sm:$0xff] %v3647_v6  ;;  %v3649_v10 = vadd.f32 %v3648_v50, %v3536_v44  ;;  %v3612_v35 = vpop.f32.mrf.mxu0  ;;  %v3439_v19 = vadd.f32 %v6632_v18, %v6631_v59  ;;  %v3510_v44 = vadd.f32 %v6633_v63, %v3397_v21  ;;  %v6638_v50 = vld [vmem:[#allocation27_spill] sm:$0xff] }
 0x226   : > { %v3652_v24 = vpop.f32.mrf.mxu1  ;;  %3678 = vst [vmem:[%s6405_s7 + $0x38] sm:$0xff] %v3609_v3  ;;  %v3613_v2 = vadd.f32 %v3612_v35, %v3500_v48  ;;  %v3550_v48 = vadd.f32 %v6636_v37, %v3437_v23  ;;  %v3512_v53 = vadd.f32 %v6638_v50, %v3399_v32 }
 0x227   : > { %3694 = vst [vmem:[%s6405_s7 + $0xb8] sm:$0xff] %v3649_v10  ;;  %v3653_v17 = vadd.f32 %v3652_v24, %v3540_v9  ;;  %v3614_v49 = vpop.f32.mrf.mxu0  ;;  %v6639_v9 = vld [vmem:[#allocation10_spill] sm:$0xff]  ;;  %v6641_v10 = vld [vmem:[#allocation41_spill] sm:$0xff] }
 0x228   : > { %v3654_v25 = vpop.f32.mrf.mxu1  ;;  %3679 = vst [vmem:[%s6405_s7 + $0x40] sm:$0xff] %v3613_v2  ;;  %v3615_v41 = vadd.f32 %v3614_v49, %v3502_v30  ;;  %v3403_v28 = vadd.f32 %v6640_v47, %v6639_v9  ;;  %v3552_v27 = vadd.f32 %v6641_v10, %v3439_v19  ;;  %v6642_v30 = vld [vmem:[#allocation17_spill] sm:$0xff] }
 0x229   : > { %3695 = vst [vmem:[%s6405_s7 + $0xc0] sm:$0xff] %v3653_v17  ;;  %v3655_v42 = vadd.f32 %v3654_v25, %v3542_v46  ;;  %v3616_v4 = vpop.f32.mrf.mxu0  ;;  %v3443_v33 = vadd.f32 %v6643_v39, %v6642_v30  ;;  %v3514_v46 = vadd.f32 %v6644_v61, %v3401_v15 }
 0x22a   : > { %v3656_v56 = vpop.f32.mrf.mxu1  ;;  %3680 = vst [vmem:[%s6405_s7 + $0x48] sm:$0xff] %v3615_v41  ;;  %v3617_v8 = vadd.f32 %v3616_v4, %v3504_v31  ;;  %v6646_v31 = vld [vmem:[#allocation31_spill] sm:$0xff] }
 0x22b   : > { %3696 = vst [vmem:[%s6405_s7 + $0xc8] sm:$0xff] %v3655_v42  ;;  %v3657_v20 = vadd.f32 %v3656_v56, %v3544_v13  ;;  %v3618_v54 = vpop.f32.mrf.mxu0  ;;  %v3516_v34 = vadd.f32 %v6646_v31, %v3403_v28  ;;  %v3556_v1 = vadd.f32 %v6393_v43, %v3443_v33 }
 0x22c   : > { %v3658_v6 = vpop.f32.mrf.mxu1  ;;  %3681 = vst [vmem:[%s6405_s7 + $0x50] sm:$0xff] %v3617_v8  ;;  %v3619_v22 = vadd.f32 %v3618_v54, %v3506_v12 }
 0x22d   : > { %3697 = vst [vmem:[%s6405_s7 + $0xd0] sm:$0xff] %v3657_v20  ;;  %v3659_v26 = vadd.f32 %v3658_v6, %v3546_v0  ;;  %v3622_v14 = vpop.f32.mrf.mxu0 }
 0x22e   : > { %v3662_v3 = vpop.f32.mrf.mxu1  ;;  %3682 = vst [vmem:[%s6405_s7 + $0x58] sm:$0xff] %v3619_v22  ;;  %v3623_v55 = vadd.f32 %v3622_v14, %v3510_v44 }
 0x22f   : > { %3698 = vst [vmem:[%s6405_s7 + $0xd8] sm:$0xff] %v3659_v26  ;;  %v3663_v5 = vadd.f32 %v3662_v3, %v3550_v48  ;;  %v3624_v35 = vpop.f32.mrf.mxu0 }
 0x230   : > { %v3664_v24 = vpop.f32.mrf.mxu1  ;;  %3683 = vst [vmem:[%s6405_s7 + $0x60] sm:$0xff] %v3623_v55  ;;  %v3625_v11 = vadd.f32 %v3624_v35, %v3512_v53 }
 0x231   : > { %3699 = vst [vmem:[%s6405_s7 + $0xe0] sm:$0xff] %v3663_v5  ;;  %v3665_v2 = vadd.f32 %v3664_v24, %v3552_v27  ;;  %v3626_v17 = vpop.f32.mrf.mxu0 }
 0x232   : > { %v3666_v57 = vpop.f32.mrf.mxu1  ;;  %3684 = vst [vmem:[%s6405_s7 + $0x68] sm:$0xff] %v3625_v11  ;;  %v3627_v21 = vadd.f32 %v3626_v17, %v3514_v46 }
 0x233   : > { %3700 = vst [vmem:[%s6405_s7 + $0xe8] sm:$0xff] %v3665_v2  ;;  %v3667_v49 = vadd.f32 %v3666_v57, %v3554_v36  ;;  %v3628_v25 = vpop.f32.mrf.mxu0 }
 0x234   : > { %v3668_v16 = vpop.f32.mrf.mxu1  ;;  %3685 = vst [vmem:[%s6405_s7 + $0x70] sm:$0xff] %v3627_v21  ;;  %v3629_v43 = vadd.f32 %v3628_v25, %v3516_v34 }
 0x235   : > { %3701 = vst [vmem:[%s6405_s7 + $0xf0] sm:$0xff] %v3667_v49  ;;  %v3669_v13 = vadd.f32 %v3668_v16, %v3556_v1 }
 0x236   : > { %3686 = vst [vmem:[%s6405_s7 + $0x78] sm:$0xff] %v3629_v43 }
 0x237   : > { %3702 = vst [vmem:[%s6405_s7 + $0xf8] sm:$0xff] %v3669_v13 }
 0x238   : > { %4908 = shalt.err (!%p4905_p5)
}
 0x239   : > { %s4909_s29 = scalar_lea.hbm %s6508_s15, 4096  ;;  %s4913_s5 = scalar_lea.hbm %s6566_s3, 16384 }
 0x23a   : > { %p4910_p6 = scmp.ne.s32.totalorder %s6508_s15, %s4909_s29  ;;  %p4914_p10 = scmp.lt.s32.totalorder %s6508_s15, %s6566_s3 }
 0x23b   : > { %p4915_p11 = scmp.lt.s32.totalorder %s4913_s5, %s4909_s29 }
 0x23c   : > { %p4911_p7 = pnand %p4910_p6, %p5037_p4 }
 0x23d   : > { %p4916_p12 = por %p4915_p11, %p4914_p10 }
 0x23e   : > { %p4912_p9 = pneg %p4911_p7 }
 0x240   : > { %p4917_p13 = pnand %p4916_p12, %p4912_p9 }
 0x242   : > { %4920 = shalt.err (!%p4917_p13)
}
 0x243   : > { %s4975_s8 = smov 256   ;;  %s4976_s7 = smov 16  }
 0x244   : > { %4248 = dma.vmem_to_hbm [thread:$0]  (%p5037_p4), %s6510_s11, 4096, %s6508_s15, %s6518_s21, %s4975_s8, %s4975_s8, %s4976_s7  }
 0x245 PF: > { %p4254_p0 = scmp.ge.s32.totalorder %s4971_s17, 2  ;;  %s3735_s10 = sand.u32 1, %s4951_s12  }
 0x246   : > { %s3736_s18 = scalar_lea.sflag [#allocation3], %s3735_s10 }
 0x247   : > { %p4251_p1 = pnand %p4254_p0, %p5044_p8 }
 0x249   : > { %p4252_p2 = pneg %p4251_p1 }
 0x24b   : > { %4946 = dma.done.wait (%p4252_p2), %s3736_s18, 4096  }
 0x24c   : > { %4948 = vsyncadd (%p4252_p2), %s3736_s18, 4294963200  ;;  %s16_s17 = sadd.s32 1, %s4971_s17   ;;  %s6647_s12 = smov %s4955_s13 }
 0x24d   : > { %p13_p3 = scmp.ge.s32.totalorder %s16_s17, 6   ;;  %s6648_s13 = smov %s4959_s14 }
 0x24e   : > { %s6649_s14 = smov %s5050_s25  ;;  %s6650_s15 = smov %s4967_s16 }
 0x24f   : > { %s6651_s16 = smov %s6653_s20  ;;  %15 = sbr.rel (!%p13_p3) target bundleno = 4 (0x4), region = 73 }
 0x254   :  { %3741 = vsyncpa [#allocation3], 1 }
 0x255   :  { %3743 = vsyncpa [#allocation3 + $0x1], 1 }

</bundles_post_ra>
